<compile_context>
chip_gen: v7x
topology: tpu7x:2x2x1
jax: 0.10.0
libtpu: 0.0.40
codegen_flags: <defaults>
</compile_context>

<pallas_src>
import collections
import functools

import numpy as np
import jax
import jax.numpy as jnp
from jax.experimental import pallas as pl
from jax.experimental.pallas import tpu as pltpu


LayerCfg = collections.namedtuple(
    "LayerCfg",
    ["k", "s", "pad", "Hin", "Win", "Cin", "Cout", "Hout", "Wout", "norm", "act"])


# ------------------------------- fused kernel --------------------------------

def _disc_kernel(x_ref, w1_ref, w2_ref, w3_ref, w4_ref, w5_ref,
                 red2_ref, bc2_ref, red3_ref, bc3_ref, red4_ref, bc4_ref,
                 b5_ref, o_ref,
                 ph2_ref, ph3_ref, a4_ref, a5_ref, *, cfgs):
    """One sample: conv1..conv5 + InstanceNorm + LeakyReLU + global avg pool.

    x_ref : (1, 2, Hp1/2, Win1*Cin1) bf16   H-phase-split, H-padded input
    w*_ref: (k, Win*Cin, Wout*Cout)  bf16   banded conv weights
    red*/bc*: f32 0/1 selector matrices for per-channel reduce / broadcast
    b5_ref: (1, 1) f32 bias of the last conv
    o_ref : (1, 1, 1) f32
    ph2/ph3: (2, ceil(Hp/2), Win*Cin) f32   H-phase-split padded activations
    a4/a5  : (Hp, Win*Cin) f32              plain padded activations (stride-1)
    """
    c1, c2, c3, c4, c5 = cfgs
    bf16 = jnp.bfloat16
    f32 = jnp.float32
    hi = jax.lax.Precision.HIGHEST

    # Zero the padded-activation scratches: the zero border rows implement the
    # H zero-padding of layers 2..5 (W padding is folded into the banded weights).
    ph2_ref[...] = jnp.zeros_like(ph2_ref)
    ph3_ref[...] = jnp.zeros_like(ph3_ref)
    a4_ref[...] = jnp.zeros_like(a4_ref)
    a5_ref[...] = jnp.zeros_like(a5_ref)

    def conv(read_tap, w_ref, k):
        # k MXU dots (one per H-tap), f32 accumulation.
        acc = jnp.dot(read_tap(0), w_ref[0], preferred_element_type=f32)
        for i in range(1, k):
            acc = acc + jnp.dot(read_tap(i), w_ref[i], preferred_element_type=f32)
        return acc                                        # (Hout, Wout*Cout) f32

    def leaky(y):
        return jnp.maximum(y, 0.2 * y)                    # LeakyReLU(0.2)

    def inorm(y, red_ref, bc_ref, n_spatial):
        # nn.InstanceNorm2d defaults: affine=False, eps=1e-5, biased variance.
        # Channels are interleaved on the lane axis (col = wo*Cout + c), so
        # per-channel reduce/broadcast is done with tiny 0/1 selector matmuls.
        inv = 1.0 / n_spatial
        rsum = jnp.sum(y, axis=0, keepdims=True)                        # (1, WoC)
        mean_c = jnp.dot(rsum, red_ref[...],
                         preferred_element_type=f32, precision=hi) * inv
        mean_r = jnp.dot(mean_c, bc_ref[...],
                         preferred_element_type=f32, precision=hi)      # (1, WoC)
        d = y - mean_r
        vsum = jnp.sum(d * d, axis=0, keepdims=True)
        var_c = jnp.dot(vsum, red_ref[...],
                        preferred_element_type=f32, precision=hi) * inv
        scale_r = jnp.dot(jax.lax.rsqrt(var_c + 1e-5), bc_ref[...],
                          preferred_element_type=f32, precision=hi)
        return d * scale_r

    def to_phases(y, dst_ref, pad):
        # Scatter produced rows into the H-parity phases the next stride-2 conv
        # reads.  Static single-row stores only: no strided or gather accesses.
        for r_out in range(y.shape[0]):
            r = r_out + pad
            dst_ref[r % 2, pl.ds(r // 2, 1), :] = y[r_out:r_out + 1, :]

    # ---- layer 1: Conv(4, s2, p1, bias=False) + LeakyReLU --------------------
    y = conv(lambda i: x_ref[0, i % 2, pl.ds(i // 2, c1.Hout), :], w1_ref, c1.k)
    y = leaky(y)
    to_phases(y, ph2_ref, c2.pad)

    # ---- layer 2: Conv(4, s2, p1, bias=False) + InstanceNorm + LeakyReLU -----
    y = conv(lambda i: ph2_ref[i % 2, pl.ds(i // 2, c2.Hout), :].astype(bf16),
             w2_ref, c2.k)
    y = leaky(inorm(y, red2_ref, bc2_ref, c2.Hout * c2.Wout))
    to_phases(y, ph3_ref, c3.pad)

    # ---- layer 3: Conv(4, s2, p1, bias=False) + InstanceNorm + LeakyReLU -----
    y = conv(lambda i: ph3_ref[i % 2, pl.ds(i // 2, c3.Hout), :].astype(bf16),
             w3_ref, c3.k)
    y = leaky(inorm(y, red3_ref, bc3_ref, c3.Hout * c3.Wout))
    a4_ref[pl.ds(c4.pad, c3.Hout), :] = y

    # ---- layer 4: Conv(4, s1, p1, bias=True) + InstanceNorm + LeakyReLU ------
    # Conv bias dropped: InstanceNorm(affine=False) subtracts the per-channel
    # spatial mean, so a per-channel constant cancels exactly.
    y = conv(lambda i: a4_ref[pl.ds(i, c4.Hout), :].astype(bf16), w4_ref, c4.k)
    y = leaky(inorm(y, red4_ref, bc4_ref, c4.Hout * c4.Wout))
    a5_ref[pl.ds(c5.pad, c4.Hout), :] = y

    # ---- layer 5: Conv(4, s1, p1, bias=True) fused with global avg pool ------
    y = conv(lambda i: a5_ref[pl.ds(i, c5.Hout), :].astype(bf16), w5_ref, c5.k)
    pooled = jnp.sum(jnp.sum(y, axis=1, keepdims=True), axis=0, keepdims=True)
    pooled = pooled * (1.0 / (c5.Hout * c5.Wout)) + b5_ref[...]
    o_ref[...] = pooled.reshape(1, 1, 1)


# ---------------------------- host-side preparation --------------------------

def _make_banded_weight(w, s, pad, Win):
    """w: (k, k, Cin, Cout) f32 -> (k, Win*Cin, Wout*Cout) bf16 banded matrices.

    B_i[w_in*Cin + c, wo*Cout + co] = w[i, w_in - s*wo + pad, c, co]  (else 0),
    which folds the W-taps, W-stride and W-zero-padding of the conv into a
    single MXU contraction per H-tap.
    """
    k, _, Cin, Cout = w.shape
    Wout = (Win + 2 * pad - k) // s + 1
    mask = np.zeros((k, Wout, Win), np.float32)
    for j in range(k):
        for wo in range(Wout):
            wi = s * wo - pad + j
            if 0 <= wi < Win:
                mask[j, wo, wi] = 1.0
    band = jnp.einsum("jow,ijcd->iwcod", jnp.asarray(mask), w.astype(jnp.float32))
    return band.reshape(k, Win * Cin, Wout * Cout).astype(jnp.bfloat16)


def _make_norm_selectors(Wout, Cout):
    """0/1 matrices for per-channel reduce / broadcast on the (H, W*C) layout."""
    red = np.tile(np.eye(Cout, dtype=np.float32), (Wout, 1))   # (Wout*Cout, Cout)
    return jnp.asarray(red), jnp.asarray(red.T.copy())         # reduce, broadcast


def prepare_discriminator(params, H, W):
    """One-time, batch-independent prep: geometry, banded weights, selectors."""
    cfgs = []
    h, w_ = H, W
    for p in params:
        k = p["w"].shape[0]
        cin, cout = p["w"].shape[2], p["w"].shape[3]
        s, pad = p["stride"], p["pad"]
        assert s in (1, 2), "fused kernel supports stride 1 and 2 only"
        ho = (h + 2 * pad - k) // s + 1
        wo = (w_ + 2 * pad - k) // s + 1
        cfgs.append(LayerCfg(k=k, s=s, pad=pad, Hin=h, Win=w_, Cin=cin, Cout=cout,
                             Hout=ho, Wout=wo, norm=p["use_norm"], act=p["use_act"]))
        h, w_ = ho, wo
    bands = [_make_banded_weight(p["w"], c.s, c.pad, c.Win)
             for p, c in zip(params, cfgs)]
    sels = []
    for c in cfgs:
        if c.norm:
            red, bc = _make_norm_selectors(c.Wout, c.Cout)
            sels += [red, bc]
    b5 = params[-1]["b"].reshape(1, 1).astype(jnp.float32)
    return dict(cfgs=tuple(cfgs), bands=bands, sels=sels, b5=b5)


# --------------------------------- forward -----------------------------------

def discriminator_forward(prep, x_nchw):
    cfgs = prep["cfgs"]
    c1, c2, c3, c4, c5 = cfgs
    N = x_nchw.shape[0]
    assert tuple(x_nchw.shape[1:]) == (c1.Cin, c1.Hin, c1.Win), x_nchw.shape

    # NCHW -> NHWC once; fold (W, C) onto the lane axis; zero-pad H; split the
    # padded rows into the two H-parity phases layer 1 reads.  Done once per
    # call in XLA (the only relayout outside the kernel).
    x = jnp.transpose(x_nchw, (0, 2, 3, 1)).astype(jnp.float32)
    xp = jnp.pad(x, ((0, 0), (c1.pad, c1.pad), (0, 0), (0, 0)))
    Hp1 = c1.Hin + 2 * c1.pad
    if Hp1 % 2:
        xp = jnp.pad(xp, ((0, 0), (0, 1), (0, 0), (0, 0)))
        Hp1 += 1
    wc1 = c1.Win * c1.Cin
    xph = (xp.reshape(N, Hp1 // 2, 2, wc1)
             .transpose(0, 2, 1, 3)
             .astype(jnp.bfloat16))                        # (N, 2, Hp1/2, Win*Cin)

    bands, sels, b5 = prep["bands"], prep["sels"], prep["b5"]

    in_specs = [pl.BlockSpec((1, 2, Hp1 // 2, wc1), lambda n: (n, 0, 0, 0))]
    in_specs += [pl.BlockSpec(b.shape, lambda n: (0, 0, 0)) for b in bands]
    in_specs += [pl.BlockSpec(s.shape, lambda n: (0, 0)) for s in sels]
    in_specs += [pl.BlockSpec((1, 1), lambda n: (0, 0))]

    def _phase_depth(c):
        return (c.Hin + 2 * c.pad + 1) // 2

    scratch_shapes = [
        pltpu.VMEM((2, _phase_depth(c2), c2.Win * c2.Cin), jnp.float32),
        pltpu.VMEM((2, _phase_depth(c3), c3.Win * c3.Cin), jnp.float32),
        pltpu.VMEM((c4.Hin + 2 * c4.pad, c4.Win * c4.Cin), jnp.float32),
        pltpu.VMEM((c5.Hin + 2 * c5.pad, c5.Win * c5.Cin), jnp.float32),
    ]

    flops = 2 * N * sum(c.k * c.Hout * c.Win * c.Cin * c.Wout * c.Cout for c in cfgs)
    bytes_accessed = int(xph.size * 2 + sum(b.size * 2 for b in bands)
                         + sum(s.size * 4 for s in sels) + b5.size * 4 + N * 4)
    cost = pl.CostEstimate(
        flops=flops,
        transcendentals=N * sum(c.Cout for c in cfgs if c.norm),
        bytes_accessed=bytes_accessed)

    out = pl.pallas_call(
        functools.partial(_disc_kernel, cfgs=cfgs),
        out_shape=jax.ShapeDtypeStruct((N, 1, 1), jnp.float32),
        grid_spec=pltpu.PrefetchScalarGridSpec(
            num_scalar_prefetch=0,
            grid=(N,),
            in_specs=in_specs,
            out_specs=pl.BlockSpec((1, 1, 1), lambda n: (n, 0, 0)),
            scratch_shapes=scratch_shapes),
        compiler_params=pltpu.CompilerParams(
            dimension_semantics=("parallel",),
            vmem_limit_bytes=32 * 1024 * 1024),
        cost_estimate=cost,
    )(xph, *bands, *sels, b5)

    return out.reshape(N, 1)   # == torch.flatten(avg_pool2d(conv_out, spatial), 1)


# ------------------------------- parameters ----------------------------------

def init_params(key, in_c, f):
    # (cin, cout, k, stride, pad, has_bias, use_instance_norm, use_leaky_relu)
    cfgs = [
        (in_c,  1 * f, 4, 2, 1, False, False, True),   # Conv + LReLU
        (1 * f, 2 * f, 4, 2, 1, False, True,  True),   # Conv + IN + LReLU
        (2 * f, 4 * f, 4, 2, 1, False, True,  True),   # Conv + IN + LReLU
        (4 * f, 8 * f, 4, 1, 1, True,  True,  True),   # Conv(bias) + IN + LReLU
        (8 * f, 1,     4, 1, 1, True,  False, False),  # Conv(bias)
    ]
    params = []
    for (cin, cout, k, s, p, has_bias, un, ua) in cfgs:
        key, wk, bk = jax.random.split(key, 3)
        fan_in = k * k * cin
        w = jax.random.normal(wk, (k, k, cin, cout), jnp.float32) / np.sqrt(fan_in)
        b = (jax.random.normal(bk, (1, cout), jnp.float32) * 0.01 if has_bias
             else jnp.zeros((1, cout), jnp.float32))
        params.append(dict(w=w, b=b, k=k, stride=s, pad=p, use_norm=un, use_act=ua))
    return params


# ----------------------------- pure-JAX reference ----------------------------

def reference_forward(params, x_nchw):
    # Same bf16-conv-inputs / f32-accumulation numerics as the kernel.
    x = jnp.transpose(x_nchw, (0, 2, 3, 1)).astype(jnp.float32)
    for p in params:
        y = jax.lax.conv_general_dilated(
            x.astype(jnp.bfloat16), p["w"].astype(jnp.bfloat16),
            (p["stride"], p["stride"]),
            [(p["pad"], p["pad"]), (p["pad"], p["pad"])],
            dimension_numbers=("NHWC", "HWIO", "NHWC"),
            preferred_element_type=jnp.float32)
        y = y + p["b"][0][None, None, None, :]
        if p["use_norm"]:
            mean = jnp.mean(y, axis=(1, 2), keepdims=True)
            var = jnp.mean(jnp.square(y - mean), axis=(1, 2), keepdims=True)
            y = (y - mean) * jax.lax.rsqrt(var + 1e-5)
        if p["use_act"]:
            y = jnp.maximum(y, 0.2 * y)
        x = y
    return jnp.mean(x, axis=(1, 2))


# ------------------------------------ main ------------------------------------

if __name__ == "__main__":
    key = jax.random.PRNGKey(0)
    key, pkey, xkey = jax.random.split(key, 3)

    in_c, f, N, H = 4, 8, 2, 32   # spatial path: 32 -> 16 -> 8 -> 4 -> 3 -> 2 -> pool
    params = init_params(pkey, in_c, f)
    x = jax.random.normal(xkey, (N, in_c, H, H), jnp.float32)   # NCHW, like PyTorch

    prep = prepare_discriminator(params, H, H)
    out = jax.block_until_ready(discriminator_forward(prep, x))
    ref = jax.block_until_ready(reference_forward(params, x))

    assert out.shape == (N, 1), out.shape
    np.testing.assert_allclose(np.asarray(out), np.asarray(ref), rtol=2e-2, atol=2e-2)
    print("KERNEL_OK")
</pallas_src>

<mosaic_0001>
module attributes {stable_mosaic.version = 11 : i64} {
  func.func @_disc_kernel(%arg0: i32, %arg1: memref<1x2x17x128xbf16, #tpu.memory_space<vmem>>, %arg2: memref<4x128x128xbf16, #tpu.memory_space<vmem>>, %arg3: memref<4x128x128xbf16, #tpu.memory_space<vmem>>, %arg4: memref<4x128x128xbf16, #tpu.memory_space<vmem>>, %arg5: memref<4x128x192xbf16, #tpu.memory_space<vmem>>, %arg6: memref<4x192x2xbf16, #tpu.memory_space<vmem>>, %arg7: memref<128x16xf32, #tpu.memory_space<vmem>>, %arg8: memref<16x128xf32, #tpu.memory_space<vmem>>, %arg9: memref<128x32xf32, #tpu.memory_space<vmem>>, %arg10: memref<32x128xf32, #tpu.memory_space<vmem>>, %arg11: memref<192x64xf32, #tpu.memory_space<vmem>>, %arg12: memref<64x192xf32, #tpu.memory_space<vmem>>, %arg13: memref<1x1xf32, #tpu.memory_space<vmem>>, %arg14: memref<1x1x1xf32, #tpu.memory_space<vmem>>, %arg15: memref<2x9x128xf32, #tpu.memory_space<vmem>>, %arg16: memref<2x5x128xf32, #tpu.memory_space<vmem>>, %arg17: memref<6x128xf32, #tpu.memory_space<vmem>>, %arg18: memref<5x192xf32, #tpu.memory_space<vmem>>) attributes {dimension_semantics = [#tpu.dimension_semantics<parallel>], iteration_bounds = array<i64: 2>, scalar_prefetch = 0 : i64, scratch_operands = 4 : i64, tpu.core_type = #tpu.core_type<tc>, window_params = [{transform_indices = @transform_0, window_bounds = array<i64: 1, 2, 17, 128>}, {pipeline_mode = #tpu.pipeline_mode<synchronous>, transform_indices = @transform_1, window_bounds = array<i64: 4, 128, 128>}, {pipeline_mode = #tpu.pipeline_mode<synchronous>, transform_indices = @transform_2, window_bounds = array<i64: 4, 128, 128>}, {pipeline_mode = #tpu.pipeline_mode<synchronous>, transform_indices = @transform_3, window_bounds = array<i64: 4, 128, 128>}, {pipeline_mode = #tpu.pipeline_mode<synchronous>, transform_indices = @transform_4, window_bounds = array<i64: 4, 128, 192>}, {pipeline_mode = #tpu.pipeline_mode<synchronous>, transform_indices = @transform_5, window_bounds = array<i64: 4, 192, 2>}, {pipeline_mode = #tpu.pipeline_mode<synchronous>, transform_indices = @transform_6, window_bounds = array<i64: 128, 16>}, {pipeline_mode = #tpu.pipeline_mode<synchronous>, transform_indices = @transform_7, window_bounds = array<i64: 16, 128>}, {pipeline_mode = #tpu.pipeline_mode<synchronous>, transform_indices = @transform_8, window_bounds = array<i64: 128, 32>}, {pipeline_mode = #tpu.pipeline_mode<synchronous>, transform_indices = @transform_9, window_bounds = array<i64: 32, 128>}, {pipeline_mode = #tpu.pipeline_mode<synchronous>, transform_indices = @transform_10, window_bounds = array<i64: 192, 64>}, {pipeline_mode = #tpu.pipeline_mode<synchronous>, transform_indices = @transform_11, window_bounds = array<i64: 64, 192>}, {pipeline_mode = #tpu.pipeline_mode<synchronous>, transform_indices = @transform_12, window_bounds = array<i64: 1, 1>}, {transform_indices = @transform_13, window_bounds = array<i64: 1, 1, 1>}]} {
    %cst = arith.constant 0.000000e+00 : f32
    %0 = vector.broadcast %cst : f32 to vector<2x9x128xf32>
    %c0 = arith.constant 0 : index
    %c0_0 = arith.constant 0 : index
    %c0_1 = arith.constant 0 : index
    %1 = vector.load %arg15[%c0, %c0_0, %c0_1] : memref<2x9x128xf32, #tpu.memory_space<vmem>>, vector<2x9x128xf32>
    tpu.vector_store %arg15[%c0, %c0_0, %c0_1], %0 {strides = array<i32>} : memref<2x9x128xf32, #tpu.memory_space<vmem>>, vector<2x9x128xf32>,
    %cst_2 = arith.constant 0.000000e+00 : f32
    %2 = vector.broadcast %cst_2 : f32 to vector<2x5x128xf32>
    %c0_3 = arith.constant 0 : index
    %c0_4 = arith.constant 0 : index
    %c0_5 = arith.constant 0 : index
    %3 = vector.load %arg16[%c0_3, %c0_4, %c0_5] : memref<2x5x128xf32, #tpu.memory_space<vmem>>, vector<2x5x128xf32>
    tpu.vector_store %arg16[%c0_3, %c0_4, %c0_5], %2 {strides = array<i32>} : memref<2x5x128xf32, #tpu.memory_space<vmem>>, vector<2x5x128xf32>,
    %cst_6 = arith.constant 0.000000e+00 : f32
    %4 = vector.broadcast %cst_6 : f32 to vector<6x128xf32>
    %c0_7 = arith.constant 0 : index
    %c0_8 = arith.constant 0 : index
    %5 = vector.load %arg17[%c0_7, %c0_8] : memref<6x128xf32, #tpu.memory_space<vmem>>, vector<6x128xf32>
    tpu.vector_store %arg17[%c0_7, %c0_8], %4 {strides = array<i32>} : memref<6x128xf32, #tpu.memory_space<vmem>>, vector<6x128xf32>,
    %cst_9 = arith.constant 0.000000e+00 : f32
    %6 = vector.broadcast %cst_9 : f32 to vector<5x192xf32>
    %c0_10 = arith.constant 0 : index
    %c0_11 = arith.constant 0 : index
    %7 = vector.load %arg18[%c0_10, %c0_11] : memref<5x192xf32, #tpu.memory_space<vmem>>, vector<5x192xf32>
    tpu.vector_store %arg18[%c0_10, %c0_11], %6 {strides = array<i32>} : memref<5x192xf32, #tpu.memory_space<vmem>>, vector<5x192xf32>,
    %c0_12 = arith.constant 0 : index
    %c0_13 = arith.constant 0 : index
    %c0_14 = arith.constant 0 : index
    %c0_15 = arith.constant 0 : index
    %8 = vector.load %arg1[%c0_12, %c0_13, %c0_14, %c0_15] : memref<1x2x17x128xbf16, #tpu.memory_space<vmem>>, vector<1x1x16x128xbf16>
    %9 = vector.shape_cast %8 : vector<1x1x16x128xbf16> to vector<16x128xbf16>
    %c0_16 = arith.constant 0 : index
    %c0_17 = arith.constant 0 : index
    %c0_18 = arith.constant 0 : index
    %10 = vector.load %arg2[%c0_16, %c0_17, %c0_18] : memref<4x128x128xbf16, #tpu.memory_space<vmem>>, vector<1x128x128xbf16>
    %11 = vector.shape_cast %10 : vector<1x128x128xbf16> to vector<128x128xbf16>
    %cst_19 = arith.constant dense<0.000000e+00> : vector<16x128xf32>
    %12 = tpu.matmul %9, %11, %cst_19 {dimension_numbers = #tpu.dot_dimension_numbers<[1], [0], [0], [1], [0, 0, 1, 1], [], []>} : vector<16x128xbf16>, vector<128x128xbf16>, vector<16x128xf32> -> vector<16x128xf32>
    %c0_20 = arith.constant 0 : index
    %c1 = arith.constant 1 : index
    %c0_21 = arith.constant 0 : index
    %c0_22 = arith.constant 0 : index
    %13 = vector.load %arg1[%c0_20, %c1, %c0_21, %c0_22] : memref<1x2x17x128xbf16, #tpu.memory_space<vmem>>, vector<1x1x16x128xbf16>
    %14 = vector.shape_cast %13 : vector<1x1x16x128xbf16> to vector<16x128xbf16>
    %c1_23 = arith.constant 1 : index
    %c0_24 = arith.constant 0 : index
    %c0_25 = arith.constant 0 : index
    %15 = vector.load %arg2[%c1_23, %c0_24, %c0_25] : memref<4x128x128xbf16, #tpu.memory_space<vmem>>, vector<1x128x128xbf16>
    %16 = vector.shape_cast %15 : vector<1x128x128xbf16> to vector<128x128xbf16>
    %cst_26 = arith.constant dense<0.000000e+00> : vector<16x128xf32>
    %17 = tpu.matmul %14, %16, %cst_26 {dimension_numbers = #tpu.dot_dimension_numbers<[1], [0], [0], [1], [0, 0, 1, 1], [], []>} : vector<16x128xbf16>, vector<128x128xbf16>, vector<16x128xf32> -> vector<16x128xf32>
    %18 = arith.addf %12, %17 : vector<16x128xf32>
    %c0_27 = arith.constant 0 : index
    %c0_28 = arith.constant 0 : index
    %c1_29 = arith.constant 1 : index
    %c0_30 = arith.constant 0 : index
    %19 = vector.load %arg1[%c0_27, %c0_28, %c1_29, %c0_30] : memref<1x2x17x128xbf16, #tpu.memory_space<vmem>>, vector<1x1x16x128xbf16>
    %20 = vector.shape_cast %19 : vector<1x1x16x128xbf16> to vector<16x128xbf16>
    %c2 = arith.constant 2 : index
    %c0_31 = arith.constant 0 : index
    %c0_32 = arith.constant 0 : index
    %21 = vector.load %arg2[%c2, %c0_31, %c0_32] : memref<4x128x128xbf16, #tpu.memory_space<vmem>>, vector<1x128x128xbf16>
    %22 = vector.shape_cast %21 : vector<1x128x128xbf16> to vector<128x128xbf16>
    %cst_33 = arith.constant dense<0.000000e+00> : vector<16x128xf32>
    %23 = tpu.matmul %20, %22, %cst_33 {dimension_numbers = #tpu.dot_dimension_numbers<[1], [0], [0], [1], [0, 0, 1, 1], [], []>} : vector<16x128xbf16>, vector<128x128xbf16>, vector<16x128xf32> -> vector<16x128xf32>
    %24 = arith.addf %18, %23 : vector<16x128xf32>
    %c0_34 = arith.constant 0 : index
    %c1_35 = arith.constant 1 : index
    %c1_36 = arith.constant 1 : index
    %c0_37 = arith.constant 0 : index
    %25 = vector.load %arg1[%c0_34, %c1_35, %c1_36, %c0_37] : memref<1x2x17x128xbf16, #tpu.memory_space<vmem>>, vector<1x1x16x128xbf16>
    %26 = vector.shape_cast %25 : vector<1x1x16x128xbf16> to vector<16x128xbf16>
    %c3 = arith.constant 3 : index
    %c0_38 = arith.constant 0 : index
    %c0_39 = arith.constant 0 : index
    %27 = vector.load %arg2[%c3, %c0_38, %c0_39] : memref<4x128x128xbf16, #tpu.memory_space<vmem>>, vector<1x128x128xbf16>
    %28 = vector.shape_cast %27 : vector<1x128x128xbf16> to vector<128x128xbf16>
    %cst_40 = arith.constant dense<0.000000e+00> : vector<16x128xf32>
    %29 = tpu.matmul %26, %28, %cst_40 {dimension_numbers = #tpu.dot_dimension_numbers<[1], [0], [0], [1], [0, 0, 1, 1], [], []>} : vector<16x128xbf16>, vector<128x128xbf16>, vector<16x128xf32> -> vector<16x128xf32>
    %30 = arith.addf %24, %29 : vector<16x128xf32>
    %cst_41 = arith.constant 2.000000e-01 : f32
    %31 = vector.broadcast %cst_41 : f32 to vector<16x128xf32>
    %32 = arith.mulf %31, %30 : vector<16x128xf32>
    %33 = arith.maximumf %30, %32 : vector<16x128xf32>
    %34 = vector.extract_strided_slice %33 {offsets = [0, 0], sizes = [1, 128], strides = [1, 1]} : vector<16x128xf32> to vector<1x128xf32>
    %c1_42 = arith.constant 1 : index
    %c0_43 = arith.constant 0 : index
    %c0_44 = arith.constant 0 : index
    %35 = vector.load %arg15[%c1_42, %c0_43, %c0_44] : memref<2x9x128xf32, #tpu.memory_space<vmem>>, vector<1x1x128xf32>
    %36 = vector.shape_cast %35 : vector<1x1x128xf32> to vector<1x128xf32>
    %37 = vector.shape_cast %34 : vector<1x128xf32> to vector<1x1x128xf32>
    tpu.vector_store %arg15[%c1_42, %c0_43, %c0_44], %37 {strides = array<i32>} : memref<2x9x128xf32, #tpu.memory_space<vmem>>, vector<1x1x128xf32>,
    %38 = vector.extract_strided_slice %33 {offsets = [1, 0], sizes = [1, 128], strides = [1, 1]} : vector<16x128xf32> to vector<1x128xf32>
    %c0_45 = arith.constant 0 : index
    %c1_46 = arith.constant 1 : index
    %c0_47 = arith.constant 0 : index
    %39 = vector.load %arg15[%c0_45, %c1_46, %c0_47] : memref<2x9x128xf32, #tpu.memory_space<vmem>>, vector<1x1x128xf32>
    %40 = vector.shape_cast %39 : vector<1x1x128xf32> to vector<1x128xf32>
    %41 = vector.shape_cast %38 : vector<1x128xf32> to vector<1x1x128xf32>
    tpu.vector_store %arg15[%c0_45, %c1_46, %c0_47], %41 {strides = array<i32>} : memref<2x9x128xf32, #tpu.memory_space<vmem>>, vector<1x1x128xf32>,
    %42 = vector.extract_strided_slice %33 {offsets = [2, 0], sizes = [1, 128], strides = [1, 1]} : vector<16x128xf32> to vector<1x128xf32>
    %c1_48 = arith.constant 1 : index
    %c1_49 = arith.constant 1 : index
    %c0_50 = arith.constant 0 : index
    %43 = vector.load %arg15[%c1_48, %c1_49, %c0_50] : memref<2x9x128xf32, #tpu.memory_space<vmem>>, vector<1x1x128xf32>
    %44 = vector.shape_cast %43 : vector<1x1x128xf32> to vector<1x128xf32>
    %45 = vector.shape_cast %42 : vector<1x128xf32> to vector<1x1x128xf32>
    tpu.vector_store %arg15[%c1_48, %c1_49, %c0_50], %45 {strides = array<i32>} : memref<2x9x128xf32, #tpu.memory_space<vmem>>, vector<1x1x128xf32>,
    %46 = vector.extract_strided_slice %33 {offsets = [3, 0], sizes = [1, 128], strides = [1, 1]} : vector<16x128xf32> to vector<1x128xf32>
    %c0_51 = arith.constant 0 : index
    %c2_52 = arith.constant 2 : index
    %c0_53 = arith.constant 0 : index
    %47 = vector.load %arg15[%c0_51, %c2_52, %c0_53] : memref<2x9x128xf32, #tpu.memory_space<vmem>>, vector<1x1x128xf32>
    %48 = vector.shape_cast %47 : vector<1x1x128xf32> to vector<1x128xf32>
    %49 = vector.shape_cast %46 : vector<1x128xf32> to vector<1x1x128xf32>
    tpu.vector_store %arg15[%c0_51, %c2_52, %c0_53], %49 {strides = array<i32>} : memref<2x9x128xf32, #tpu.memory_space<vmem>>, vector<1x1x128xf32>,
    %50 = vector.extract_strided_slice %33 {offsets = [4, 0], sizes = [1, 128], strides = [1, 1]} : vector<16x128xf32> to vector<1x128xf32>
    %c1_54 = arith.constant 1 : index
    %c2_55 = arith.constant 2 : index
    %c0_56 = arith.constant 0 : index
    %51 = vector.load %arg15[%c1_54, %c2_55, %c0_56] : memref<2x9x128xf32, #tpu.memory_space<vmem>>, vector<1x1x128xf32>
    %52 = vector.shape_cast %51 : vector<1x1x128xf32> to vector<1x128xf32>
    %53 = vector.shape_cast %50 : vector<1x128xf32> to vector<1x1x128xf32>
    tpu.vector_store %arg15[%c1_54, %c2_55, %c0_56], %53 {strides = array<i32>} : memref<2x9x128xf32, #tpu.memory_space<vmem>>, vector<1x1x128xf32>,
    %54 = vector.extract_strided_slice %33 {offsets = [5, 0], sizes = [1, 128], strides = [1, 1]} : vector<16x128xf32> to vector<1x128xf32>
    %c0_57 = arith.constant 0 : index
    %c3_58 = arith.constant 3 : index
    %c0_59 = arith.constant 0 : index
    %55 = vector.load %arg15[%c0_57, %c3_58, %c0_59] : memref<2x9x128xf32, #tpu.memory_space<vmem>>, vector<1x1x128xf32>
    %56 = vector.shape_cast %55 : vector<1x1x128xf32> to vector<1x128xf32>
    %57 = vector.shape_cast %54 : vector<1x128xf32> to vector<1x1x128xf32>
    tpu.vector_store %arg15[%c0_57, %c3_58, %c0_59], %57 {strides = array<i32>} : memref<2x9x128xf32, #tpu.memory_space<vmem>>, vector<1x1x128xf32>,
    %58 = vector.extract_strided_slice %33 {offsets = [6, 0], sizes = [1, 128], strides = [1, 1]} : vector<16x128xf32> to vector<1x128xf32>
    %c1_60 = arith.constant 1 : index
    %c3_61 = arith.constant 3 : index
    %c0_62 = arith.constant 0 : index
    %59 = vector.load %arg15[%c1_60, %c3_61, %c0_62] : memref<2x9x128xf32, #tpu.memory_space<vmem>>, vector<1x1x128xf32>
    %60 = vector.shape_cast %59 : vector<1x1x128xf32> to vector<1x128xf32>
    %61 = vector.shape_cast %58 : vector<1x128xf32> to vector<1x1x128xf32>
    tpu.vector_store %arg15[%c1_60, %c3_61, %c0_62], %61 {strides = array<i32>} : memref<2x9x128xf32, #tpu.memory_space<vmem>>, vector<1x1x128xf32>,
    %62 = vector.extract_strided_slice %33 {offsets = [7, 0], sizes = [1, 128], strides = [1, 1]} : vector<16x128xf32> to vector<1x128xf32>
    %c0_63 = arith.constant 0 : index
    %c4 = arith.constant 4 : index
    %c0_64 = arith.constant 0 : index
    %63 = vector.load %arg15[%c0_63, %c4, %c0_64] : memref<2x9x128xf32, #tpu.memory_space<vmem>>, vector<1x1x128xf32>
    %64 = vector.shape_cast %63 : vector<1x1x128xf32> to vector<1x128xf32>
    %65 = vector.shape_cast %62 : vector<1x128xf32> to vector<1x1x128xf32>
    tpu.vector_store %arg15[%c0_63, %c4, %c0_64], %65 {strides = array<i32>} : memref<2x9x128xf32, #tpu.memory_space<vmem>>, vector<1x1x128xf32>,
    %66 = vector.extract_strided_slice %33 {offsets = [8, 0], sizes = [1, 128], strides = [1, 1]} : vector<16x128xf32> to vector<1x128xf32>
    %c1_65 = arith.constant 1 : index
    %c4_66 = arith.constant 4 : index
    %c0_67 = arith.constant 0 : index
    %67 = vector.load %arg15[%c1_65, %c4_66, %c0_67] : memref<2x9x128xf32, #tpu.memory_space<vmem>>, vector<1x1x128xf32>
    %68 = vector.shape_cast %67 : vector<1x1x128xf32> to vector<1x128xf32>
    %69 = vector.shape_cast %66 : vector<1x128xf32> to vector<1x1x128xf32>
    tpu.vector_store %arg15[%c1_65, %c4_66, %c0_67], %69 {strides = array<i32>} : memref<2x9x128xf32, #tpu.memory_space<vmem>>, vector<1x1x128xf32>,
    %70 = vector.extract_strided_slice %33 {offsets = [9, 0], sizes = [1, 128], strides = [1, 1]} : vector<16x128xf32> to vector<1x128xf32>
    %c0_68 = arith.constant 0 : index
    %c5 = arith.constant 5 : index
    %c0_69 = arith.constant 0 : index
    %71 = vector.load %arg15[%c0_68, %c5, %c0_69] : memref<2x9x128xf32, #tpu.memory_space<vmem>>, vector<1x1x128xf32>
    %72 = vector.shape_cast %71 : vector<1x1x128xf32> to vector<1x128xf32>
    %73 = vector.shape_cast %70 : vector<1x128xf32> to vector<1x1x128xf32>
    tpu.vector_store %arg15[%c0_68, %c5, %c0_69], %73 {strides = array<i32>} : memref<2x9x128xf32, #tpu.memory_space<vmem>>, vector<1x1x128xf32>,
    %74 = vector.extract_strided_slice %33 {offsets = [10, 0], sizes = [1, 128], strides = [1, 1]} : vector<16x128xf32> to vector<1x128xf32>
    %c1_70 = arith.constant 1 : index
    %c5_71 = arith.constant 5 : index
    %c0_72 = arith.constant 0 : index
    %75 = vector.load %arg15[%c1_70, %c5_71, %c0_72] : memref<2x9x128xf32, #tpu.memory_space<vmem>>, vector<1x1x128xf32>
    %76 = vector.shape_cast %75 : vector<1x1x128xf32> to vector<1x128xf32>
    %77 = vector.shape_cast %74 : vector<1x128xf32> to vector<1x1x128xf32>
    tpu.vector_store %arg15[%c1_70, %c5_71, %c0_72], %77 {strides = array<i32>} : memref<2x9x128xf32, #tpu.memory_space<vmem>>, vector<1x1x128xf32>,
    %78 = vector.extract_strided_slice %33 {offsets = [11, 0], sizes = [1, 128], strides = [1, 1]} : vector<16x128xf32> to vector<1x128xf32>
    %c0_73 = arith.constant 0 : index
    %c6 = arith.constant 6 : index
    %c0_74 = arith.constant 0 : index
    %79 = vector.load %arg15[%c0_73, %c6, %c0_74] : memref<2x9x128xf32, #tpu.memory_space<vmem>>, vector<1x1x128xf32>
    %80 = vector.shape_cast %79 : vector<1x1x128xf32> to vector<1x128xf32>
    %81 = vector.shape_cast %78 : vector<1x128xf32> to vector<1x1x128xf32>
    tpu.vector_store %arg15[%c0_73, %c6, %c0_74], %81 {strides = array<i32>} : memref<2x9x128xf32, #tpu.memory_space<vmem>>, vector<1x1x128xf32>,
    %82 = vector.extract_strided_slice %33 {offsets = [12, 0], sizes = [1, 128], strides = [1, 1]} : vector<16x128xf32> to vector<1x128xf32>
    %c1_75 = arith.constant 1 : index
    %c6_76 = arith.constant 6 : index
    %c0_77 = arith.constant 0 : index
    %83 = vector.load %arg15[%c1_75, %c6_76, %c0_77] : memref<2x9x128xf32, #tpu.memory_space<vmem>>, vector<1x1x128xf32>
    %84 = vector.shape_cast %83 : vector<1x1x128xf32> to vector<1x128xf32>
    %85 = vector.shape_cast %82 : vector<1x128xf32> to vector<1x1x128xf32>
    tpu.vector_store %arg15[%c1_75, %c6_76, %c0_77], %85 {strides = array<i32>} : memref<2x9x128xf32, #tpu.memory_space<vmem>>, vector<1x1x128xf32>,
    %86 = vector.extract_strided_slice %33 {offsets = [13, 0], sizes = [1, 128], strides = [1, 1]} : vector<16x128xf32> to vector<1x128xf32>
    %c0_78 = arith.constant 0 : index
    %c7 = arith.constant 7 : index
    %c0_79 = arith.constant 0 : index
    %87 = vector.load %arg15[%c0_78, %c7, %c0_79] : memref<2x9x128xf32, #tpu.memory_space<vmem>>, vector<1x1x128xf32>
    %88 = vector.shape_cast %87 : vector<1x1x128xf32> to vector<1x128xf32>
    %89 = vector.shape_cast %86 : vector<1x128xf32> to vector<1x1x128xf32>
    tpu.vector_store %arg15[%c0_78, %c7, %c0_79], %89 {strides = array<i32>} : memref<2x9x128xf32, #tpu.memory_space<vmem>>, vector<1x1x128xf32>,
    %90 = vector.extract_strided_slice %33 {offsets = [14, 0], sizes = [1, 128], strides = [1, 1]} : vector<16x128xf32> to vector<1x128xf32>
    %c1_80 = arith.constant 1 : index
    %c7_81 = arith.constant 7 : index
    %c0_82 = arith.constant 0 : index
    %91 = vector.load %arg15[%c1_80, %c7_81, %c0_82] : memref<2x9x128xf32, #tpu.memory_space<vmem>>, vector<1x1x128xf32>
    %92 = vector.shape_cast %91 : vector<1x1x128xf32> to vector<1x128xf32>
    %93 = vector.shape_cast %90 : vector<1x128xf32> to vector<1x1x128xf32>
    tpu.vector_store %arg15[%c1_80, %c7_81, %c0_82], %93 {strides = array<i32>} : memref<2x9x128xf32, #tpu.memory_space<vmem>>, vector<1x1x128xf32>,
    %94 = vector.extract_strided_slice %33 {offsets = [15, 0], sizes = [1, 128], strides = [1, 1]} : vector<16x128xf32> to vector<1x128xf32>
    %c0_83 = arith.constant 0 : index
    %c8 = arith.constant 8 : index
    %c0_84 = arith.constant 0 : index
    %95 = vector.load %arg15[%c0_83, %c8, %c0_84] : memref<2x9x128xf32, #tpu.memory_space<vmem>>, vector<1x1x128xf32>
    %96 = vector.shape_cast %95 : vector<1x1x128xf32> to vector<1x128xf32>
    %97 = vector.shape_cast %94 : vector<1x128xf32> to vector<1x1x128xf32>
    tpu.vector_store %arg15[%c0_83, %c8, %c0_84], %97 {strides = array<i32>} : memref<2x9x128xf32, #tpu.memory_space<vmem>>, vector<1x1x128xf32>,
    %c0_85 = arith.constant 0 : index
    %c0_86 = arith.constant 0 : index
    %c0_87 = arith.constant 0 : index
    %98 = vector.load %arg15[%c0_85, %c0_86, %c0_87] : memref<2x9x128xf32, #tpu.memory_space<vmem>>, vector<1x8x128xf32>
    %99 = vector.shape_cast %98 : vector<1x8x128xf32> to vector<8x128xf32>
    %100 = arith.truncf %99 : vector<8x128xf32> to vector<8x128xbf16>
    %c0_88 = arith.constant 0 : index
    %c0_89 = arith.constant 0 : index
    %c0_90 = arith.constant 0 : index
    %101 = vector.load %arg3[%c0_88, %c0_89, %c0_90] : memref<4x128x128xbf16, #tpu.memory_space<vmem>>, vector<1x128x128xbf16>
    %102 = vector.shape_cast %101 : vector<1x128x128xbf16> to vector<128x128xbf16>
    %cst_91 = arith.constant dense<0.000000e+00> : vector<8x128xf32>
    %103 = tpu.matmul %100, %102, %cst_91 {dimension_numbers = #tpu.dot_dimension_numbers<[1], [0], [0], [1], [0, 0, 1, 1], [], []>} : vector<8x128xbf16>, vector<128x128xbf16>, vector<8x128xf32> -> vector<8x128xf32>
    %c1_92 = arith.constant 1 : index
    %c0_93 = arith.constant 0 : index
    %c0_94 = arith.constant 0 : index
    %104 = vector.load %arg15[%c1_92, %c0_93, %c0_94] : memref<2x9x128xf32, #tpu.memory_space<vmem>>, vector<1x8x128xf32>
    %105 = vector.shape_cast %104 : vector<1x8x128xf32> to vector<8x128xf32>
    %106 = arith.truncf %105 : vector<8x128xf32> to vector<8x128xbf16>
    %c1_95 = arith.constant 1 : index
    %c0_96 = arith.constant 0 : index
    %c0_97 = arith.constant 0 : index
    %107 = vector.load %arg3[%c1_95, %c0_96, %c0_97] : memref<4x128x128xbf16, #tpu.memory_space<vmem>>, vector<1x128x128xbf16>
    %108 = vector.shape_cast %107 : vector<1x128x128xbf16> to vector<128x128xbf16>
    %cst_98 = arith.constant dense<0.000000e+00> : vector<8x128xf32>
    %109 = tpu.matmul %106, %108, %cst_98 {dimension_numbers = #tpu.dot_dimension_numbers<[1], [0], [0], [1], [0, 0, 1, 1], [], []>} : vector<8x128xbf16>, vector<128x128xbf16>, vector<8x128xf32> -> vector<8x128xf32>
    %110 = arith.addf %103, %109 : vector<8x128xf32>
    %c0_99 = arith.constant 0 : index
    %c1_100 = arith.constant 1 : index
    %c0_101 = arith.constant 0 : index
    %111 = vector.load %arg15[%c0_99, %c1_100, %c0_101] : memref<2x9x128xf32, #tpu.memory_space<vmem>>, vector<1x8x128xf32>
    %112 = vector.shape_cast %111 : vector<1x8x128xf32> to vector<8x128xf32>
    %113 = arith.truncf %112 : vector<8x128xf32> to vector<8x128xbf16>
    %c2_102 = arith.constant 2 : index
    %c0_103 = arith.constant 0 : index
    %c0_104 = arith.constant 0 : index
    %114 = vector.load %arg3[%c2_102, %c0_103, %c0_104] : memref<4x128x128xbf16, #tpu.memory_space<vmem>>, vector<1x128x128xbf16>
    %115 = vector.shape_cast %114 : vector<1x128x128xbf16> to vector<128x128xbf16>
    %cst_105 = arith.constant dense<0.000000e+00> : vector<8x128xf32>
    %116 = tpu.matmul %113, %115, %cst_105 {dimension_numbers = #tpu.dot_dimension_numbers<[1], [0], [0], [1], [0, 0, 1, 1], [], []>} : vector<8x128xbf16>, vector<128x128xbf16>, vector<8x128xf32> -> vector<8x128xf32>
    %117 = arith.addf %110, %116 : vector<8x128xf32>
    %c1_106 = arith.constant 1 : index
    %c1_107 = arith.constant 1 : index
    %c0_108 = arith.constant 0 : index
    %118 = vector.load %arg15[%c1_106, %c1_107, %c0_108] : memref<2x9x128xf32, #tpu.memory_space<vmem>>, vector<1x8x128xf32>
    %119 = vector.shape_cast %118 : vector<1x8x128xf32> to vector<8x128xf32>
    %120 = arith.truncf %119 : vector<8x128xf32> to vector<8x128xbf16>
    %c3_109 = arith.constant 3 : index
    %c0_110 = arith.constant 0 : index
    %c0_111 = arith.constant 0 : index
    %121 = vector.load %arg3[%c3_109, %c0_110, %c0_111] : memref<4x128x128xbf16, #tpu.memory_space<vmem>>, vector<1x128x128xbf16>
    %122 = vector.shape_cast %121 : vector<1x128x128xbf16> to vector<128x128xbf16>
    %cst_112 = arith.constant dense<0.000000e+00> : vector<8x128xf32>
    %123 = tpu.matmul %120, %122, %cst_112 {dimension_numbers = #tpu.dot_dimension_numbers<[1], [0], [0], [1], [0, 0, 1, 1], [], []>} : vector<8x128xbf16>, vector<128x128xbf16>, vector<8x128xf32> -> vector<8x128xf32>
    %124 = arith.addf %117, %123 : vector<8x128xf32>
    %cst_113 = arith.constant dense<0.000000e+00> : vector<128xf32>
    %125 = vector.multi_reduction <add>, %124, %cst_113 [0] : vector<8x128xf32> to vector<128xf32>
    %126 = vector.shape_cast %125 : vector<128xf32> to vector<1x128xf32>
    %c0_114 = arith.constant 0 : index
    %c0_115 = arith.constant 0 : index
    %127 = vector.load %arg7[%c0_114, %c0_115] : memref<128x16xf32, #tpu.memory_space<vmem>>, vector<128x16xf32>
    %cst_116 = arith.constant dense<0.000000e+00> : vector<1x16xf32>
    %128 = tpu.matmul %126, %127, %cst_116 {dimension_numbers = #tpu.dot_dimension_numbers<[1], [0], [0], [1], [0, 0, 1, 1], [], []>, precision = #tpu.contract_precision<fp32>} : vector<1x128xf32>, vector<128x16xf32>, vector<1x16xf32> -> vector<1x16xf32>
    %cst_117 = arith.constant 1.562500e-02 : f32
    %129 = vector.broadcast %cst_117 : f32 to vector<1x16xf32>
    %130 = arith.mulf %128, %129 : vector<1x16xf32>
    %c0_118 = arith.constant 0 : index
    %c0_119 = arith.constant 0 : index
    %131 = vector.load %arg8[%c0_118, %c0_119] : memref<16x128xf32, #tpu.memory_space<vmem>>, vector<16x128xf32>
    %cst_120 = arith.constant dense<0.000000e+00> : vector<1x128xf32>
    %132 = tpu.matmul %130, %131, %cst_120 {dimension_numbers = #tpu.dot_dimension_numbers<[1], [0], [0], [1], [0, 0, 1, 1], [], []>, precision = #tpu.contract_precision<fp32>} : vector<1x16xf32>, vector<16x128xf32>, vector<1x128xf32> -> vector<1x128xf32>
    %133 = vector.broadcast %132 : vector<1x128xf32> to vector<8x128xf32>
    %134 = arith.subf %124, %133 : vector<8x128xf32>
    %135 = arith.mulf %134, %134 : vector<8x128xf32>
    %cst_121 = arith.constant dense<0.000000e+00> : vector<128xf32>
    %136 = vector.multi_reduction <add>, %135, %cst_121 [0] : vector<8x128xf32> to vector<128xf32>
    %137 = vector.shape_cast %136 : vector<128xf32> to vector<1x128xf32>
    %c0_122 = arith.constant 0 : index
    %c0_123 = arith.constant 0 : index
    %138 = vector.load %arg7[%c0_122, %c0_123] : memref<128x16xf32, #tpu.memory_space<vmem>>, vector<128x16xf32>
    %cst_124 = arith.constant dense<0.000000e+00> : vector<1x16xf32>
    %139 = tpu.matmul %137, %138, %cst_124 {dimension_numbers = #tpu.dot_dimension_numbers<[1], [0], [0], [1], [0, 0, 1, 1], [], []>, precision = #tpu.contract_precision<fp32>} : vector<1x128xf32>, vector<128x16xf32>, vector<1x16xf32> -> vector<1x16xf32>
    %cst_125 = arith.constant 1.562500e-02 : f32
    %140 = vector.broadcast %cst_125 : f32 to vector<1x16xf32>
    %141 = arith.mulf %139, %140 : vector<1x16xf32>
    %cst_126 = arith.constant 9.99999974E-6 : f32
    %142 = vector.broadcast %cst_126 : f32 to vector<1x16xf32>
    %143 = arith.addf %141, %142 : vector<1x16xf32>
    %144 = math.rsqrt %143 : vector<1x16xf32>
    %c0_127 = arith.constant 0 : index
    %c0_128 = arith.constant 0 : index
    %145 = vector.load %arg8[%c0_127, %c0_128] : memref<16x128xf32, #tpu.memory_space<vmem>>, vector<16x128xf32>
    %cst_129 = arith.constant dense<0.000000e+00> : vector<1x128xf32>
    %146 = tpu.matmul %144, %145, %cst_129 {dimension_numbers = #tpu.dot_dimension_numbers<[1], [0], [0], [1], [0, 0, 1, 1], [], []>, precision = #tpu.contract_precision<fp32>} : vector<1x16xf32>, vector<16x128xf32>, vector<1x128xf32> -> vector<1x128xf32>
    %147 = vector.broadcast %146 : vector<1x128xf32> to vector<8x128xf32>
    %148 = arith.mulf %134, %147 : vector<8x128xf32>
    %cst_130 = arith.constant 2.000000e-01 : f32
    %149 = vector.broadcast %cst_130 : f32 to vector<8x128xf32>
    %150 = arith.mulf %149, %148 : vector<8x128xf32>
    %151 = arith.maximumf %148, %150 : vector<8x128xf32>
    %152 = vector.extract_strided_slice %151 {offsets = [0, 0], sizes = [1, 128], strides = [1, 1]} : vector<8x128xf32> to vector<1x128xf32>
    %c1_131 = arith.constant 1 : index
    %c0_132 = arith.constant 0 : index
    %c0_133 = arith.constant 0 : index
    %153 = vector.load %arg16[%c1_131, %c0_132, %c0_133] : memref<2x5x128xf32, #tpu.memory_space<vmem>>, vector<1x1x128xf32>
    %154 = vector.shape_cast %153 : vector<1x1x128xf32> to vector<1x128xf32>
    %155 = vector.shape_cast %152 : vector<1x128xf32> to vector<1x1x128xf32>
    tpu.vector_store %arg16[%c1_131, %c0_132, %c0_133], %155 {strides = array<i32>} : memref<2x5x128xf32, #tpu.memory_space<vmem>>, vector<1x1x128xf32>,
    %156 = vector.extract_strided_slice %151 {offsets = [1, 0], sizes = [1, 128], strides = [1, 1]} : vector<8x128xf32> to vector<1x128xf32>
    %c0_134 = arith.constant 0 : index
    %c1_135 = arith.constant 1 : index
    %c0_136 = arith.constant 0 : index
    %157 = vector.load %arg16[%c0_134, %c1_135, %c0_136] : memref<2x5x128xf32, #tpu.memory_space<vmem>>, vector<1x1x128xf32>
    %158 = vector.shape_cast %157 : vector<1x1x128xf32> to vector<1x128xf32>
    %159 = vector.shape_cast %156 : vector<1x128xf32> to vector<1x1x128xf32>
    tpu.vector_store %arg16[%c0_134, %c1_135, %c0_136], %159 {strides = array<i32>} : memref<2x5x128xf32, #tpu.memory_space<vmem>>, vector<1x1x128xf32>,
    %160 = vector.extract_strided_slice %151 {offsets = [2, 0], sizes = [1, 128], strides = [1, 1]} : vector<8x128xf32> to vector<1x128xf32>
    %c1_137 = arith.constant 1 : index
    %c1_138 = arith.constant 1 : index
    %c0_139 = arith.constant 0 : index
    %161 = vector.load %arg16[%c1_137, %c1_138, %c0_139] : memref<2x5x128xf32, #tpu.memory_space<vmem>>, vector<1x1x128xf32>
    %162 = vector.shape_cast %161 : vector<1x1x128xf32> to vector<1x128xf32>
    %163 = vector.shape_cast %160 : vector<1x128xf32> to vector<1x1x128xf32>
    tpu.vector_store %arg16[%c1_137, %c1_138, %c0_139], %163 {strides = array<i32>} : memref<2x5x128xf32, #tpu.memory_space<vmem>>, vector<1x1x128xf32>,
    %164 = vector.extract_strided_slice %151 {offsets = [3, 0], sizes = [1, 128], strides = [1, 1]} : vector<8x128xf32> to vector<1x128xf32>
    %c0_140 = arith.constant 0 : index
    %c2_141 = arith.constant 2 : index
    %c0_142 = arith.constant 0 : index
    %165 = vector.load %arg16[%c0_140, %c2_141, %c0_142] : memref<2x5x128xf32, #tpu.memory_space<vmem>>, vector<1x1x128xf32>
    %166 = vector.shape_cast %165 : vector<1x1x128xf32> to vector<1x128xf32>
    %167 = vector.shape_cast %164 : vector<1x128xf32> to vector<1x1x128xf32>
    tpu.vector_store %arg16[%c0_140, %c2_141, %c0_142], %167 {strides = array<i32>} : memref<2x5x128xf32, #tpu.memory_space<vmem>>, vector<1x1x128xf32>,
    %168 = vector.extract_strided_slice %151 {offsets = [4, 0], sizes = [1, 128], strides = [1, 1]} : vector<8x128xf32> to vector<1x128xf32>
    %c1_143 = arith.constant 1 : index
    %c2_144 = arith.constant 2 : index
    %c0_145 = arith.constant 0 : index
    %169 = vector.load %arg16[%c1_143, %c2_144, %c0_145] : memref<2x5x128xf32, #tpu.memory_space<vmem>>, vector<1x1x128xf32>
    %170 = vector.shape_cast %169 : vector<1x1x128xf32> to vector<1x128xf32>
    %171 = vector.shape_cast %168 : vector<1x128xf32> to vector<1x1x128xf32>
    tpu.vector_store %arg16[%c1_143, %c2_144, %c0_145], %171 {strides = array<i32>} : memref<2x5x128xf32, #tpu.memory_space<vmem>>, vector<1x1x128xf32>,
    %172 = vector.extract_strided_slice %151 {offsets = [5, 0], sizes = [1, 128], strides = [1, 1]} : vector<8x128xf32> to vector<1x128xf32>
    %c0_146 = arith.constant 0 : index
    %c3_147 = arith.constant 3 : index
    %c0_148 = arith.constant 0 : index
    %173 = vector.load %arg16[%c0_146, %c3_147, %c0_148] : memref<2x5x128xf32, #tpu.memory_space<vmem>>, vector<1x1x128xf32>
    %174 = vector.shape_cast %173 : vector<1x1x128xf32> to vector<1x128xf32>
    %175 = vector.shape_cast %172 : vector<1x128xf32> to vector<1x1x128xf32>
    tpu.vector_store %arg16[%c0_146, %c3_147, %c0_148], %175 {strides = array<i32>} : memref<2x5x128xf32, #tpu.memory_space<vmem>>, vector<1x1x128xf32>,
    %176 = vector.extract_strided_slice %151 {offsets = [6, 0], sizes = [1, 128], strides = [1, 1]} : vector<8x128xf32> to vector<1x128xf32>
    %c1_149 = arith.constant 1 : index
    %c3_150 = arith.constant 3 : index
    %c0_151 = arith.constant 0 : index
    %177 = vector.load %arg16[%c1_149, %c3_150, %c0_151] : memref<2x5x128xf32, #tpu.memory_space<vmem>>, vector<1x1x128xf32>
    %178 = vector.shape_cast %177 : vector<1x1x128xf32> to vector<1x128xf32>
    %179 = vector.shape_cast %176 : vector<1x128xf32> to vector<1x1x128xf32>
    tpu.vector_store %arg16[%c1_149, %c3_150, %c0_151], %179 {strides = array<i32>} : memref<2x5x128xf32, #tpu.memory_space<vmem>>, vector<1x1x128xf32>,
    %180 = vector.extract_strided_slice %151 {offsets = [7, 0], sizes = [1, 128], strides = [1, 1]} : vector<8x128xf32> to vector<1x128xf32>
    %c0_152 = arith.constant 0 : index
    %c4_153 = arith.constant 4 : index
    %c0_154 = arith.constant 0 : index
    %181 = vector.load %arg16[%c0_152, %c4_153, %c0_154] : memref<2x5x128xf32, #tpu.memory_space<vmem>>, vector<1x1x128xf32>
    %182 = vector.shape_cast %181 : vector<1x1x128xf32> to vector<1x128xf32>
    %183 = vector.shape_cast %180 : vector<1x128xf32> to vector<1x1x128xf32>
    tpu.vector_store %arg16[%c0_152, %c4_153, %c0_154], %183 {strides = array<i32>} : memref<2x5x128xf32, #tpu.memory_space<vmem>>, vector<1x1x128xf32>,
    %c0_155 = arith.constant 0 : index
    %c0_156 = arith.constant 0 : index
    %c0_157 = arith.constant 0 : index
    %184 = vector.load %arg16[%c0_155, %c0_156, %c0_157] : memref<2x5x128xf32, #tpu.memory_space<vmem>>, vector<1x4x128xf32>
    %185 = vector.shape_cast %184 : vector<1x4x128xf32> to vector<4x128xf32>
    %186 = arith.truncf %185 : vector<4x128xf32> to vector<4x128xbf16>
    %c0_158 = arith.constant 0 : index
    %c0_159 = arith.constant 0 : index
    %c0_160 = arith.constant 0 : index
    %187 = vector.load %arg4[%c0_158, %c0_159, %c0_160] : memref<4x128x128xbf16, #tpu.memory_space<vmem>>, vector<1x128x128xbf16>
    %188 = vector.shape_cast %187 : vector<1x128x128xbf16> to vector<128x128xbf16>
    %cst_161 = arith.constant dense<0.000000e+00> : vector<4x128xf32>
    %189 = tpu.matmul %186, %188, %cst_161 {dimension_numbers = #tpu.dot_dimension_numbers<[1], [0], [0], [1], [0, 0, 1, 1], [], []>} : vector<4x128xbf16>, vector<128x128xbf16>, vector<4x128xf32> -> vector<4x128xf32>
    %c1_162 = arith.constant 1 : index
    %c0_163 = arith.constant 0 : index
    %c0_164 = arith.constant 0 : index
    %190 = vector.load %arg16[%c1_162, %c0_163, %c0_164] : memref<2x5x128xf32, #tpu.memory_space<vmem>>, vector<1x4x128xf32>
    %191 = vector.shape_cast %190 : vector<1x4x128xf32> to vector<4x128xf32>
    %192 = arith.truncf %191 : vector<4x128xf32> to vector<4x128xbf16>
    %c1_165 = arith.constant 1 : index
    %c0_166 = arith.constant 0 : index
    %c0_167 = arith.constant 0 : index
    %193 = vector.load %arg4[%c1_165, %c0_166, %c0_167] : memref<4x128x128xbf16, #tpu.memory_space<vmem>>, vector<1x128x128xbf16>
    %194 = vector.shape_cast %193 : vector<1x128x128xbf16> to vector<128x128xbf16>
    %cst_168 = arith.constant dense<0.000000e+00> : vector<4x128xf32>
    %195 = tpu.matmul %192, %194, %cst_168 {dimension_numbers = #tpu.dot_dimension_numbers<[1], [0], [0], [1], [0, 0, 1, 1], [], []>} : vector<4x128xbf16>, vector<128x128xbf16>, vector<4x128xf32> -> vector<4x128xf32>
    %196 = arith.addf %189, %195 : vector<4x128xf32>
    %c0_169 = arith.constant 0 : index
    %c1_170 = arith.constant 1 : index
    %c0_171 = arith.constant 0 : index
    %197 = vector.load %arg16[%c0_169, %c1_170, %c0_171] : memref<2x5x128xf32, #tpu.memory_space<vmem>>, vector<1x4x128xf32>
    %198 = vector.shape_cast %197 : vector<1x4x128xf32> to vector<4x128xf32>
    %199 = arith.truncf %198 : vector<4x128xf32> to vector<4x128xbf16>
    %c2_172 = arith.constant 2 : index
    %c0_173 = arith.constant 0 : index
    %c0_174 = arith.constant 0 : index
    %200 = vector.load %arg4[%c2_172, %c0_173, %c0_174] : memref<4x128x128xbf16, #tpu.memory_space<vmem>>, vector<1x128x128xbf16>
    %201 = vector.shape_cast %200 : vector<1x128x128xbf16> to vector<128x128xbf16>
    %cst_175 = arith.constant dense<0.000000e+00> : vector<4x128xf32>
    %202 = tpu.matmul %199, %201, %cst_175 {dimension_numbers = #tpu.dot_dimension_numbers<[1], [0], [0], [1], [0, 0, 1, 1], [], []>} : vector<4x128xbf16>, vector<128x128xbf16>, vector<4x128xf32> -> vector<4x128xf32>
    %203 = arith.addf %196, %202 : vector<4x128xf32>
    %c1_176 = arith.constant 1 : index
    %c1_177 = arith.constant 1 : index
    %c0_178 = arith.constant 0 : index
    %204 = vector.load %arg16[%c1_176, %c1_177, %c0_178] : memref<2x5x128xf32, #tpu.memory_space<vmem>>, vector<1x4x128xf32>
    %205 = vector.shape_cast %204 : vector<1x4x128xf32> to vector<4x128xf32>
    %206 = arith.truncf %205 : vector<4x128xf32> to vector<4x128xbf16>
    %c3_179 = arith.constant 3 : index
    %c0_180 = arith.constant 0 : index
    %c0_181 = arith.constant 0 : index
    %207 = vector.load %arg4[%c3_179, %c0_180, %c0_181] : memref<4x128x128xbf16, #tpu.memory_space<vmem>>, vector<1x128x128xbf16>
    %208 = vector.shape_cast %207 : vector<1x128x128xbf16> to vector<128x128xbf16>
    %cst_182 = arith.constant dense<0.000000e+00> : vector<4x128xf32>
    %209 = tpu.matmul %206, %208, %cst_182 {dimension_numbers = #tpu.dot_dimension_numbers<[1], [0], [0], [1], [0, 0, 1, 1], [], []>} : vector<4x128xbf16>, vector<128x128xbf16>, vector<4x128xf32> -> vector<4x128xf32>
    %210 = arith.addf %203, %209 : vector<4x128xf32>
    %cst_183 = arith.constant dense<0.000000e+00> : vector<128xf32>
    %211 = vector.multi_reduction <add>, %210, %cst_183 [0] : vector<4x128xf32> to vector<128xf32>
    %212 = vector.shape_cast %211 : vector<128xf32> to vector<1x128xf32>
    %c0_184 = arith.constant 0 : index
    %c0_185 = arith.constant 0 : index
    %213 = vector.load %arg9[%c0_184, %c0_185] : memref<128x32xf32, #tpu.memory_space<vmem>>, vector<128x32xf32>
    %cst_186 = arith.constant dense<0.000000e+00> : vector<1x32xf32>
    %214 = tpu.matmul %212, %213, %cst_186 {dimension_numbers = #tpu.dot_dimension_numbers<[1], [0], [0], [1], [0, 0, 1, 1], [], []>, precision = #tpu.contract_precision<fp32>} : vector<1x128xf32>, vector<128x32xf32>, vector<1x32xf32> -> vector<1x32xf32>
    %cst_187 = arith.constant 6.250000e-02 : f32
    %215 = vector.broadcast %cst_187 : f32 to vector<1x32xf32>
    %216 = arith.mulf %214, %215 : vector<1x32xf32>
    %c0_188 = arith.constant 0 : index
    %c0_189 = arith.constant 0 : index
    %217 = vector.load %arg10[%c0_188, %c0_189] : memref<32x128xf32, #tpu.memory_space<vmem>>, vector<32x128xf32>
    %cst_190 = arith.constant dense<0.000000e+00> : vector<1x128xf32>
    %218 = tpu.matmul %216, %217, %cst_190 {dimension_numbers = #tpu.dot_dimension_numbers<[1], [0], [0], [1], [0, 0, 1, 1], [], []>, precision = #tpu.contract_precision<fp32>} : vector<1x32xf32>, vector<32x128xf32>, vector<1x128xf32> -> vector<1x128xf32>
    %219 = vector.broadcast %218 : vector<1x128xf32> to vector<4x128xf32>
    %220 = arith.subf %210, %219 : vector<4x128xf32>
    %221 = arith.mulf %220, %220 : vector<4x128xf32>
    %cst_191 = arith.constant dense<0.000000e+00> : vector<128xf32>
    %222 = vector.multi_reduction <add>, %221, %cst_191 [0] : vector<4x128xf32> to vector<128xf32>
    %223 = vector.shape_cast %222 : vector<128xf32> to vector<1x128xf32>
    %c0_192 = arith.constant 0 : index
    %c0_193 = arith.constant 0 : index
    %224 = vector.load %arg9[%c0_192, %c0_193] : memref<128x32xf32, #tpu.memory_space<vmem>>, vector<128x32xf32>
    %cst_194 = arith.constant dense<0.000000e+00> : vector<1x32xf32>
    %225 = tpu.matmul %223, %224, %cst_194 {dimension_numbers = #tpu.dot_dimension_numbers<[1], [0], [0], [1], [0, 0, 1, 1], [], []>, precision = #tpu.contract_precision<fp32>} : vector<1x128xf32>, vector<128x32xf32>, vector<1x32xf32> -> vector<1x32xf32>
    %cst_195 = arith.constant 6.250000e-02 : f32
    %226 = vector.broadcast %cst_195 : f32 to vector<1x32xf32>
    %227 = arith.mulf %225, %226 : vector<1x32xf32>
    %cst_196 = arith.constant 9.99999974E-6 : f32
    %228 = vector.broadcast %cst_196 : f32 to vector<1x32xf32>
    %229 = arith.addf %227, %228 : vector<1x32xf32>
    %230 = math.rsqrt %229 : vector<1x32xf32>
    %c0_197 = arith.constant 0 : index
    %c0_198 = arith.constant 0 : index
    %231 = vector.load %arg10[%c0_197, %c0_198] : memref<32x128xf32, #tpu.memory_space<vmem>>, vector<32x128xf32>
    %cst_199 = arith.constant dense<0.000000e+00> : vector<1x128xf32>
    %232 = tpu.matmul %230, %231, %cst_199 {dimension_numbers = #tpu.dot_dimension_numbers<[1], [0], [0], [1], [0, 0, 1, 1], [], []>, precision = #tpu.contract_precision<fp32>} : vector<1x32xf32>, vector<32x128xf32>, vector<1x128xf32> -> vector<1x128xf32>
    %233 = vector.broadcast %232 : vector<1x128xf32> to vector<4x128xf32>
    %234 = arith.mulf %220, %233 : vector<4x128xf32>
    %cst_200 = arith.constant 2.000000e-01 : f32
    %235 = vector.broadcast %cst_200 : f32 to vector<4x128xf32>
    %236 = arith.mulf %235, %234 : vector<4x128xf32>
    %237 = arith.maximumf %234, %236 : vector<4x128xf32>
    %c1_201 = arith.constant 1 : index
    %c0_202 = arith.constant 0 : index
    %238 = vector.load %arg17[%c1_201, %c0_202] : memref<6x128xf32, #tpu.memory_space<vmem>>, vector<4x128xf32>
    tpu.vector_store %arg17[%c1_201, %c0_202], %237 {strides = array<i32>} : memref<6x128xf32, #tpu.memory_space<vmem>>, vector<4x128xf32>,
    %c0_203 = arith.constant 0 : index
    %c0_204 = arith.constant 0 : index
    %239 = vector.load %arg17[%c0_203, %c0_204] : memref<6x128xf32, #tpu.memory_space<vmem>>, vector<3x128xf32>
    %240 = arith.truncf %239 : vector<3x128xf32> to vector<3x128xbf16>
    %c0_205 = arith.constant 0 : index
    %c0_206 = arith.constant 0 : index
    %c0_207 = arith.constant 0 : index
    %241 = vector.load %arg5[%c0_205, %c0_206, %c0_207] : memref<4x128x192xbf16, #tpu.memory_space<vmem>>, vector<1x128x192xbf16>
    %242 = vector.shape_cast %241 : vector<1x128x192xbf16> to vector<128x192xbf16>
    %cst_208 = arith.constant dense<0.000000e+00> : vector<3x192xf32>
    %243 = tpu.matmul %240, %242, %cst_208 {dimension_numbers = #tpu.dot_dimension_numbers<[1], [0], [0], [1], [0, 0, 1, 1], [], []>} : vector<3x128xbf16>, vector<128x192xbf16>, vector<3x192xf32> -> vector<3x192xf32>
    %c1_209 = arith.constant 1 : index
    %c0_210 = arith.constant 0 : index
    %244 = vector.load %arg17[%c1_209, %c0_210] : memref<6x128xf32, #tpu.memory_space<vmem>>, vector<3x128xf32>
    %245 = arith.truncf %244 : vector<3x128xf32> to vector<3x128xbf16>
    %c1_211 = arith.constant 1 : index
    %c0_212 = arith.constant 0 : index
    %c0_213 = arith.constant 0 : index
    %246 = vector.load %arg5[%c1_211, %c0_212, %c0_213] : memref<4x128x192xbf16, #tpu.memory_space<vmem>>, vector<1x128x192xbf16>
    %247 = vector.shape_cast %246 : vector<1x128x192xbf16> to vector<128x192xbf16>
    %cst_214 = arith.constant dense<0.000000e+00> : vector<3x192xf32>
    %248 = tpu.matmul %245, %247, %cst_214 {dimension_numbers = #tpu.dot_dimension_numbers<[1], [0], [0], [1], [0, 0, 1, 1], [], []>} : vector<3x128xbf16>, vector<128x192xbf16>, vector<3x192xf32> -> vector<3x192xf32>
    %249 = arith.addf %243, %248 : vector<3x192xf32>
    %c2_215 = arith.constant 2 : index
    %c0_216 = arith.constant 0 : index
    %250 = vector.load %arg17[%c2_215, %c0_216] : memref<6x128xf32, #tpu.memory_space<vmem>>, vector<3x128xf32>
    %251 = arith.truncf %250 : vector<3x128xf32> to vector<3x128xbf16>
    %c2_217 = arith.constant 2 : index
    %c0_218 = arith.constant 0 : index
    %c0_219 = arith.constant 0 : index
    %252 = vector.load %arg5[%c2_217, %c0_218, %c0_219] : memref<4x128x192xbf16, #tpu.memory_space<vmem>>, vector<1x128x192xbf16>
    %253 = vector.shape_cast %252 : vector<1x128x192xbf16> to vector<128x192xbf16>
    %cst_220 = arith.constant dense<0.000000e+00> : vector<3x192xf32>
    %254 = tpu.matmul %251, %253, %cst_220 {dimension_numbers = #tpu.dot_dimension_numbers<[1], [0], [0], [1], [0, 0, 1, 1], [], []>} : vector<3x128xbf16>, vector<128x192xbf16>, vector<3x192xf32> -> vector<3x192xf32>
    %255 = arith.addf %249, %254 : vector<3x192xf32>
    %c3_221 = arith.constant 3 : index
    %c0_222 = arith.constant 0 : index
    %256 = vector.load %arg17[%c3_221, %c0_222] : memref<6x128xf32, #tpu.memory_space<vmem>>, vector<3x128xf32>
    %257 = arith.truncf %256 : vector<3x128xf32> to vector<3x128xbf16>
    %c3_223 = arith.constant 3 : index
    %c0_224 = arith.constant 0 : index
    %c0_225 = arith.constant 0 : index
    %258 = vector.load %arg5[%c3_223, %c0_224, %c0_225] : memref<4x128x192xbf16, #tpu.memory_space<vmem>>, vector<1x128x192xbf16>
    %259 = vector.shape_cast %258 : vector<1x128x192xbf16> to vector<128x192xbf16>
    %cst_226 = arith.constant dense<0.000000e+00> : vector<3x192xf32>
    %260 = tpu.matmul %257, %259, %cst_226 {dimension_numbers = #tpu.dot_dimension_numbers<[1], [0], [0], [1], [0, 0, 1, 1], [], []>} : vector<3x128xbf16>, vector<128x192xbf16>, vector<3x192xf32> -> vector<3x192xf32>
    %261 = arith.addf %255, %260 : vector<3x192xf32>
    %cst_227 = arith.constant dense<0.000000e+00> : vector<192xf32>
    %262 = vector.multi_reduction <add>, %261, %cst_227 [0] : vector<3x192xf32> to vector<192xf32>
    %263 = vector.shape_cast %262 : vector<192xf32> to vector<1x192xf32>
    %c0_228 = arith.constant 0 : index
    %c0_229 = arith.constant 0 : index
    %264 = vector.load %arg11[%c0_228, %c0_229] : memref<192x64xf32, #tpu.memory_space<vmem>>, vector<192x64xf32>
    %cst_230 = arith.constant dense<0.000000e+00> : vector<1x64xf32>
    %265 = tpu.matmul %263, %264, %cst_230 {dimension_numbers = #tpu.dot_dimension_numbers<[1], [0], [0], [1], [0, 0, 1, 1], [], []>, precision = #tpu.contract_precision<fp32>} : vector<1x192xf32>, vector<192x64xf32>, vector<1x64xf32> -> vector<1x64xf32>
    %cst_231 = arith.constant 0.111111112 : f32
    %266 = vector.broadcast %cst_231 : f32 to vector<1x64xf32>
    %267 = arith.mulf %265, %266 : vector<1x64xf32>
    %c0_232 = arith.constant 0 : index
    %c0_233 = arith.constant 0 : index
    %268 = vector.load %arg12[%c0_232, %c0_233] : memref<64x192xf32, #tpu.memory_space<vmem>>, vector<64x192xf32>
    %cst_234 = arith.constant dense<0.000000e+00> : vector<1x192xf32>
    %269 = tpu.matmul %267, %268, %cst_234 {dimension_numbers = #tpu.dot_dimension_numbers<[1], [0], [0], [1], [0, 0, 1, 1], [], []>, precision = #tpu.contract_precision<fp32>} : vector<1x64xf32>, vector<64x192xf32>, vector<1x192xf32> -> vector<1x192xf32>
    %270 = vector.broadcast %269 : vector<1x192xf32> to vector<3x192xf32>
    %271 = arith.subf %261, %270 : vector<3x192xf32>
    %272 = arith.mulf %271, %271 : vector<3x192xf32>
    %cst_235 = arith.constant dense<0.000000e+00> : vector<192xf32>
    %273 = vector.multi_reduction <add>, %272, %cst_235 [0] : vector<3x192xf32> to vector<192xf32>
    %274 = vector.shape_cast %273 : vector<192xf32> to vector<1x192xf32>
    %c0_236 = arith.constant 0 : index
    %c0_237 = arith.constant 0 : index
    %275 = vector.load %arg11[%c0_236, %c0_237] : memref<192x64xf32, #tpu.memory_space<vmem>>, vector<192x64xf32>
    %cst_238 = arith.constant dense<0.000000e+00> : vector<1x64xf32>
    %276 = tpu.matmul %274, %275, %cst_238 {dimension_numbers = #tpu.dot_dimension_numbers<[1], [0], [0], [1], [0, 0, 1, 1], [], []>, precision = #tpu.contract_precision<fp32>} : vector<1x192xf32>, vector<192x64xf32>, vector<1x64xf32> -> vector<1x64xf32>
    %cst_239 = arith.constant 0.111111112 : f32
    %277 = vector.broadcast %cst_239 : f32 to vector<1x64xf32>
    %278 = arith.mulf %276, %277 : vector<1x64xf32>
    %cst_240 = arith.constant 9.99999974E-6 : f32
    %279 = vector.broadcast %cst_240 : f32 to vector<1x64xf32>
    %280 = arith.addf %278, %279 : vector<1x64xf32>
    %281 = math.rsqrt %280 : vector<1x64xf32>
    %c0_241 = arith.constant 0 : index
    %c0_242 = arith.constant 0 : index
    %282 = vector.load %arg12[%c0_241, %c0_242] : memref<64x192xf32, #tpu.memory_space<vmem>>, vector<64x192xf32>
    %cst_243 = arith.constant dense<0.000000e+00> : vector<1x192xf32>
    %283 = tpu.matmul %281, %282, %cst_243 {dimension_numbers = #tpu.dot_dimension_numbers<[1], [0], [0], [1], [0, 0, 1, 1], [], []>, precision = #tpu.contract_precision<fp32>} : vector<1x64xf32>, vector<64x192xf32>, vector<1x192xf32> -> vector<1x192xf32>
    %284 = vector.broadcast %283 : vector<1x192xf32> to vector<3x192xf32>
    %285 = arith.mulf %271, %284 : vector<3x192xf32>
    %cst_244 = arith.constant 2.000000e-01 : f32
    %286 = vector.broadcast %cst_244 : f32 to vector<3x192xf32>
    %287 = arith.mulf %286, %285 : vector<3x192xf32>
    %288 = arith.maximumf %285, %287 : vector<3x192xf32>
    %c1_245 = arith.constant 1 : index
    %c0_246 = arith.constant 0 : index
    %289 = vector.load %arg18[%c1_245, %c0_246] : memref<5x192xf32, #tpu.memory_space<vmem>>, vector<3x192xf32>
    tpu.vector_store %arg18[%c1_245, %c0_246], %288 {strides = array<i32>} : memref<5x192xf32, #tpu.memory_space<vmem>>, vector<3x192xf32>,
    %c0_247 = arith.constant 0 : index
    %c0_248 = arith.constant 0 : index
    %290 = vector.load %arg18[%c0_247, %c0_248] : memref<5x192xf32, #tpu.memory_space<vmem>>, vector<2x192xf32>
    %291 = arith.truncf %290 : vector<2x192xf32> to vector<2x192xbf16>
    %c0_249 = arith.constant 0 : index
    %c0_250 = arith.constant 0 : index
    %c0_251 = arith.constant 0 : index
    %292 = vector.load %arg6[%c0_249, %c0_250, %c0_251] : memref<4x192x2xbf16, #tpu.memory_space<vmem>>, vector<1x192x2xbf16>
    %293 = vector.shape_cast %292 : vector<1x192x2xbf16> to vector<192x2xbf16>
    %cst_252 = arith.constant dense<0.000000e+00> : vector<2x2xf32>
    %294 = tpu.matmul %291, %293, %cst_252 {dimension_numbers = #tpu.dot_dimension_numbers<[1], [0], [0], [1], [0, 0, 1, 1], [], []>} : vector<2x192xbf16>, vector<192x2xbf16>, vector<2x2xf32> -> vector<2x2xf32>
    %c1_253 = arith.constant 1 : index
    %c0_254 = arith.constant 0 : index
    %295 = vector.load %arg18[%c1_253, %c0_254] : memref<5x192xf32, #tpu.memory_space<vmem>>, vector<2x192xf32>
    %296 = arith.truncf %295 : vector<2x192xf32> to vector<2x192xbf16>
    %c1_255 = arith.constant 1 : index
    %c0_256 = arith.constant 0 : index
    %c0_257 = arith.constant 0 : index
    %297 = vector.load %arg6[%c1_255, %c0_256, %c0_257] : memref<4x192x2xbf16, #tpu.memory_space<vmem>>, vector<1x192x2xbf16>
    %298 = vector.shape_cast %297 : vector<1x192x2xbf16> to vector<192x2xbf16>
    %cst_258 = arith.constant dense<0.000000e+00> : vector<2x2xf32>
    %299 = tpu.matmul %296, %298, %cst_258 {dimension_numbers = #tpu.dot_dimension_numbers<[1], [0], [0], [1], [0, 0, 1, 1], [], []>} : vector<2x192xbf16>, vector<192x2xbf16>, vector<2x2xf32> -> vector<2x2xf32>
    %300 = arith.addf %294, %299 : vector<2x2xf32>
    %c2_259 = arith.constant 2 : index
    %c0_260 = arith.constant 0 : index
    %301 = vector.load %arg18[%c2_259, %c0_260] : memref<5x192xf32, #tpu.memory_space<vmem>>, vector<2x192xf32>
    %302 = arith.truncf %301 : vector<2x192xf32> to vector<2x192xbf16>
    %c2_261 = arith.constant 2 : index
    %c0_262 = arith.constant 0 : index
    %c0_263 = arith.constant 0 : index
    %303 = vector.load %arg6[%c2_261, %c0_262, %c0_263] : memref<4x192x2xbf16, #tpu.memory_space<vmem>>, vector<1x192x2xbf16>
    %304 = vector.shape_cast %303 : vector<1x192x2xbf16> to vector<192x2xbf16>
    %cst_264 = arith.constant dense<0.000000e+00> : vector<2x2xf32>
    %305 = tpu.matmul %302, %304, %cst_264 {dimension_numbers = #tpu.dot_dimension_numbers<[1], [0], [0], [1], [0, 0, 1, 1], [], []>} : vector<2x192xbf16>, vector<192x2xbf16>, vector<2x2xf32> -> vector<2x2xf32>
    %306 = arith.addf %300, %305 : vector<2x2xf32>
    %c3_265 = arith.constant 3 : index
    %c0_266 = arith.constant 0 : index
    %307 = vector.load %arg18[%c3_265, %c0_266] : memref<5x192xf32, #tpu.memory_space<vmem>>, vector<2x192xf32>
    %308 = arith.truncf %307 : vector<2x192xf32> to vector<2x192xbf16>
    %c3_267 = arith.constant 3 : index
    %c0_268 = arith.constant 0 : index
    %c0_269 = arith.constant 0 : index
    %309 = vector.load %arg6[%c3_267, %c0_268, %c0_269] : memref<4x192x2xbf16, #tpu.memory_space<vmem>>, vector<1x192x2xbf16>
    %310 = vector.shape_cast %309 : vector<1x192x2xbf16> to vector<192x2xbf16>
    %cst_270 = arith.constant dense<0.000000e+00> : vector<2x2xf32>
    %311 = tpu.matmul %308, %310, %cst_270 {dimension_numbers = #tpu.dot_dimension_numbers<[1], [0], [0], [1], [0, 0, 1, 1], [], []>} : vector<2x192xbf16>, vector<192x2xbf16>, vector<2x2xf32> -> vector<2x2xf32>
    %312 = arith.addf %306, %311 : vector<2x2xf32>
    %cst_271 = arith.constant dense<0.000000e+00> : vector<2xf32>
    %313 = vector.multi_reduction <add>, %312, %cst_271 [1] : vector<2x2xf32> to vector<2xf32>
    %314 = vector.shape_cast %313 : vector<2xf32> to vector<2x1xf32>
    %cst_272 = arith.constant dense<0.000000e+00> : vector<1xf32>
    %315 = vector.multi_reduction <add>, %314, %cst_272 [0] : vector<2x1xf32> to vector<1xf32>
    %316 = vector.shape_cast %315 : vector<1xf32> to vector<1x1xf32>
    %cst_273 = arith.constant 2.500000e-01 : f32
    %317 = vector.broadcast %cst_273 : f32 to vector<1x1xf32>
    %318 = arith.mulf %316, %317 : vector<1x1xf32>
    %c0_274 = arith.constant 0 : index
    %c0_275 = arith.constant 0 : index
    %319 = vector.load %arg13[%c0_274, %c0_275] : memref<1x1xf32, #tpu.memory_space<vmem>>, vector<1x1xf32>
    %320 = arith.addf %318, %319 : vector<1x1xf32>
    %321 = vector.shape_cast %320 : vector<1x1xf32> to vector<1x1x1xf32>
    %c0_276 = arith.constant 0 : index
    %c0_277 = arith.constant 0 : index
    %c0_278 = arith.constant 0 : index
    %322 = vector.load %arg14[%c0_276, %c0_277, %c0_278] : memref<1x1x1xf32, #tpu.memory_space<vmem>>, vector<1x1x1xf32>
    tpu.vector_store %arg14[%c0_276, %c0_277, %c0_278], %321 {strides = array<i32>} : memref<1x1x1xf32, #tpu.memory_space<vmem>>, vector<1x1x1xf32>,
    return
  }
  func.func @transform_0(%arg0: i32) -> (i32, i32, i32, i32) {
    %c0_i32 = arith.constant 0 : i32
    %c0_i32_0 = arith.constant 0 : i32
    %c0_i32_1 = arith.constant 0 : i32
    %c0_i32_2 = arith.constant 0 : i32
    return %arg0, %c0_i32, %c0_i32_0, %c0_i32_1 : i32, i32, i32, i32
  }
  func.func @transform_1(%arg0: i32) -> (i32, i32, i32) {
    %c0_i32 = arith.constant 0 : i32
    %c0_i32_0 = arith.constant 0 : i32
    %c0_i32_1 = arith.constant 0 : i32
    %c0_i32_2 = arith.constant 0 : i32
    return %c0_i32, %c0_i32_0, %c0_i32_1 : i32, i32, i32
  }
  func.func @transform_2(%arg0: i32) -> (i32, i32, i32) {
    %c0_i32 = arith.constant 0 : i32
    %c0_i32_0 = arith.constant 0 : i32
    %c0_i32_1 = arith.constant 0 : i32
    %c0_i32_2 = arith.constant 0 : i32
    return %c0_i32, %c0_i32_0, %c0_i32_1 : i32, i32, i32
  }
  func.func @transform_3(%arg0: i32) -> (i32, i32, i32) {
    %c0_i32 = arith.constant 0 : i32
    %c0_i32_0 = arith.constant 0 : i32
    %c0_i32_1 = arith.constant 0 : i32
    %c0_i32_2 = arith.constant 0 : i32
    return %c0_i32, %c0_i32_0, %c0_i32_1 : i32, i32, i32
  }
  func.func @transform_4(%arg0: i32) -> (i32, i32, i32) {
    %c0_i32 = arith.constant 0 : i32
    %c0_i32_0 = arith.constant 0 : i32
    %c0_i32_1 = arith.constant 0 : i32
    %c0_i32_2 = arith.constant 0 : i32
    return %c0_i32, %c0_i32_0, %c0_i32_1 : i32, i32, i32
  }
  func.func @transform_5(%arg0: i32) -> (i32, i32, i32) {
    %c0_i32 = arith.constant 0 : i32
    %c0_i32_0 = arith.constant 0 : i32
    %c0_i32_1 = arith.constant 0 : i32
    %c0_i32_2 = arith.constant 0 : i32
    return %c0_i32, %c0_i32_0, %c0_i32_1 : i32, i32, i32
  }
  func.func @transform_6(%arg0: i32) -> (i32, i32) {
    %c0_i32 = arith.constant 0 : i32
    %c0_i32_0 = arith.constant 0 : i32
    %c0_i32_1 = arith.constant 0 : i32
    return %c0_i32, %c0_i32_0 : i32, i32
  }
  func.func @transform_7(%arg0: i32) -> (i32, i32) {
    %c0_i32 = arith.constant 0 : i32
    %c0_i32_0 = arith.constant 0 : i32
    %c0_i32_1 = arith.constant 0 : i32
    return %c0_i32, %c0_i32_0 : i32, i32
  }
  func.func @transform_8(%arg0: i32) -> (i32, i32) {
    %c0_i32 = arith.constant 0 : i32
    %c0_i32_0 = arith.constant 0 : i32
    %c0_i32_1 = arith.constant 0 : i32
    return %c0_i32, %c0_i32_0 : i32, i32
  }
  func.func @transform_9(%arg0: i32) -> (i32, i32) {
    %c0_i32 = arith.constant 0 : i32
    %c0_i32_0 = arith.constant 0 : i32
    %c0_i32_1 = arith.constant 0 : i32
    return %c0_i32, %c0_i32_0 : i32, i32
  }
  func.func @transform_10(%arg0: i32) -> (i32, i32) {
    %c0_i32 = arith.constant 0 : i32
    %c0_i32_0 = arith.constant 0 : i32
    %c0_i32_1 = arith.constant 0 : i32
    return %c0_i32, %c0_i32_0 : i32, i32
  }
  func.func @transform_11(%arg0: i32) -> (i32, i32) {
    %c0_i32 = arith.constant 0 : i32
    %c0_i32_0 = arith.constant 0 : i32
    %c0_i32_1 = arith.constant 0 : i32
    return %c0_i32, %c0_i32_0 : i32, i32
  }
  func.func @transform_12(%arg0: i32) -> (i32, i32) {
    %c0_i32 = arith.constant 0 : i32
    %c0_i32_0 = arith.constant 0 : i32
    %c0_i32_1 = arith.constant 0 : i32
    return %c0_i32, %c0_i32_0 : i32, i32
  }
  func.func @transform_13(%arg0: i32) -> (i32, i32, i32) {
    %c0_i32 = arith.constant 0 : i32
    %c0_i32_0 = arith.constant 0 : i32
    %c0_i32_1 = arith.constant 0 : i32
    return %arg0, %c0_i32, %c0_i32_0 : i32, i32, i32
  }
}

</mosaic_0001>

<bundles_post_ra>
// kernel: tpu_custom_call.1
= control target key start
LH: loop header
LB: loop body
LE: loop exit
PB: predicated region body
PF: predicated region fallthrough
CT: control target
= control target key end

     0   :  { %s14811_s27 = smov 0   ;;  %s17902_s0 = inlined_call_operand.vmem [shape: bf16[2,2,17,128], index: 0, kind: input, shape index: {}]   ;;  %s17903_s1 = inlined_call_operand.vmem [shape: bf16[4,128,128], index: 1, kind: input, shape index: {}]   ;;  %s17904_s2 = inlined_call_operand.vmem [shape: bf16[4,128,128], index: 2, kind: input, shape index: {}]   ;;  %s17905_s3 = inlined_call_operand.vmem [shape: bf16[4,128,128], index: 3, kind: input, shape index: {}]   ;;  %s17906_s4 = inlined_call_operand.vmem [shape: bf16[4,128,192], index: 4, kind: input, shape index: {}]   ;;  %s17907_s5 = inlined_call_operand.vmem [shape: bf16[4,192,2], index: 5, kind: input, shape index: {}]   ;;  %s17908_s6 = inlined_call_operand.vmem [shape: f32[128,16], index: 6, kind: input, shape index: {}]   ;;  %s17909_s7 = inlined_call_operand.vmem [shape: f32[16,128], index: 7, kind: input, shape index: {}]   ;;  %s17910_s8 = inlined_call_operand.vmem [shape: f32[128,32], index: 8, kind: input, shape index: {}]   ;;  %s17911_s9 = inlined_call_operand.vmem [shape: f32[32,128], index: 9, kind: input, shape index: {}]   ;;  %s17912_s10 = inlined_call_operand.vmem [shape: f32[192,64], index: 10, kind: input, shape index: {}]   ;;  %s17913_s11 = inlined_call_operand.vmem [shape: f32[64,192], index: 11, kind: input, shape index: {}]   ;;  %s17914_s12 = inlined_call_operand.<no memory space> [shape: f32[1,1], index: 12, kind: input, shape index: {}]   ;;  %s17915_s13 = inlined_call_operand.vmem [shape: f32[2,1,1], index: 13, kind: output, shape index: {}]  }
   0x1   :  { %v18_v0 = vstv %s17914_s12 }
   0x2   :  { %19 = vst [vmem:[#allocation6] sm:$0x1] %v18_v0 }
   0x3 LB: > { %s10570_s28 = sadd.s32 4294967295, %s14732_s27   ;;  %p10574_p0 = scmp.ge.s32.totalorder %s14732_s27, 1  ;;  %s14732_s27 = sphi %s14811_s27, %s25_s27  }
   0x4   : > { %p389_p1 = scmp.lt.s32.totalorder %s14732_s27, 3 }
   0x6   : > { %p390_p2 = pnand %p10574_p0, %p389_p1 }
   0x8   : > { %393 = sbr.rel (%p390_p2) target bundleno = 6040 (0x1798), region = 72 }
   0xf   : > { %v14473_v1 = vld [vmem:[%s17903_s1 + $0x40] sm:$0xff]   ;;  %v14734_v2 = vmov 0.0   ;;  %v14474_v3 = vld [vmem:[%s17903_s1 + $0x48] sm:$0xff]   ;;  %vm14735_vm0 = vmmov 0   ;;  %p431_p3 = scmp.lt.s32.totalorder %s10570_s28, 1  ;;  %v14475_v4 = vld [vmem:[%s17903_s1 + $0x50] sm:$0xff]  }
  0x10   : > { %11677 = vmatprep.subr.bf16.mxu0 %v14734_v2  ;;  %440 = vst [vmem:[#allocation2] sm:$0xff] %v14734_v2  ;;  %441 = vst [vmem:[#allocation2 + $0x8] sm:$0x1] %v14734_v2  ;;  %11757 = vmatprep.subr.bf16.mxu1 %v14734_v2  ;;  %v14476_v5 = vld [vmem:[%s17903_s1 + $0x58] sm:$0xff]   ;;  %v14477_v6 = vld [vmem:[%s17903_s1 + $0x60] sm:$0xff]   ;;  %vm2059_vm2 = vcmask 130048  }
  0x11   : > { %442 = vst [vmem:[#allocation2 + $0x10] sm:$0xff] %v14734_v2  ;;  %443 = vst [vmem:[#allocation2 + $0x18] sm:$0x1] %v14734_v2  ;;  %11678 = vmatpush3.bf16.msra.mxu0 %v14473_v1  ;;  %11693 = vmatprep.mubr.msk.bf16.mxu0 %vm14735_vm0, %v14734_v2  ;;  %s18129_s28 = smov (!%p431_p3, %s10570_s28), 1  ;;  %v14478_v7 = vld [vmem:[%s17903_s1 + $0x68] sm:$0xff]   ;;  %v14479_v8 = vld [vmem:[%s17903_s1 + $0x70] sm:$0xff]  }
  0x12   : > { %444 = vst [vmem:[#allocation3] sm:$0x1f] %v14734_v2  ;;  %445 = vst [vmem:[#allocation3 + $0x8] sm:$0x1f] %v14734_v2  ;;  %11679 = vmatprep.subr.bf16.mxu0 %v14734_v2  ;;  %11773 = vmatprep.mubr.msk.bf16.mxu1 %vm14735_vm0, %v14734_v2  ;;  %s14460_s17 = smul.u32 24, %s18129_s28  ;;  %v14480_v9 = vld [vmem:[%s17903_s1 + $0x78] sm:$0xff]   ;;  %s438_s15 = scalar_lea.vmem %s17915_s13, %s18129_s28 }
  0x13   : > { %446 = vst [vmem:[#allocation4] sm:$0x3f] %v14734_v2  ;;  %447 = vst [vmem:[#allocation5] sm:$0x1f] %v14734_v2  ;;  %v14482_v11 = vld [vmem:[%s17903_s1] sm:$0xff]   ;;  %v14483_v12 = vld [vmem:[%s17903_s1 + $0x8] sm:$0xff]  }
  0x14   : > { %s14850_s20 = scalar_lea.vmem %s17902_s0, %s14460_s17  ;;  %v14484_v13 = vld [vmem:[%s17903_s1 + $0x10] sm:$0xff]   ;;  %v14511_v14 = vld [vmem:[%s17904_s2 + $0x40] sm:$0xff]   ;;  %v14512_v15 = vld [vmem:[%s17904_s2 + $0x48] sm:$0xff]   ;;  %vm706_vm1 = vsmask.f32 7424  ;;  %vm4085_vm3 = vcmask 1043456  }
  0x15   : > { %11680 = vmatpush3.bf16.msra.mxu0 %v14474_v3  ;;  %v14481_v10 = vld [vmem:[%s14850_s20 + $0xc] sm:$0xff]   ;;  %11758 = vmatpush3.bf16.msra.mxu1 %v14511_v14  ;;  %v14485_v16 = vld [vmem:[%s17903_s1 + $0x18] sm:$0xff]   ;;  %v14486_v18 = vld [vmem:[%s17903_s1 + $0x20] sm:$0xff]   ;;  %vm4755_vm4 = vcmask 261120   ;;  %vm6960_vm5 = vcmask 1042432   ;;  %vm6968_vm6 = vcmask 518144  }
  0x16   : > { %11681 = vmatprep.subr.bf16.mxu0 %v14734_v2  ;;  %11759 = vmatprep.subr.bf16.mxu1 %v14734_v2  ;;  %v14513_v17 = vld [vmem:[%s17904_s2 + $0x50] sm:$0xff]   ;;  %v14514_v19 = vld [vmem:[%s17904_s2 + $0x58] sm:$0xff]   ;;  %v14487_v20 = vld [vmem:[%s17903_s1 + $0x28] sm:$0xff]   ;;  %vm7000_vm7 = vcmask 523264   ;;  %vm448_vm8 = vcmask 520192   ;;  %vm9890_vm9 = vcmask 519169  }
  0x17   : > { %v14488_v21 = vld [vmem:[%s17903_s1 + $0x30] sm:$0xff]   ;;  %v14489_v22 = vld [vmem:[%s17903_s1 + $0x38] sm:$0xff]   ;;  %v14490_v23 = vld [vmem:[%s14850_s20] sm:$0xff]   ;;  %vm10506_vm10 = vcmask 9216   ;;  %vm10510_vm11 = vcmask 1041408   ;;  %vm10521_vm12 = vcmask 0  }
  0x18   : > { %v14491_v24 = vld [vmem:[%s17903_s1 + $0x80] sm:$0xff]   ;;  %v14492_v25 = vld [vmem:[%s17903_s1 + $0x88] sm:$0xff]   ;;  %v14493_v26 = vld [vmem:[%s17903_s1 + $0x90] sm:$0xff]  }
  0x19   : > { %11682 = vmatpush3.bf16.msra.mxu0 %v14475_v4  ;;  %11760 = vmatpush3.bf16.msra.mxu1 %v14512_v15  ;;  %v14494_v27 = vld [vmem:[%s17903_s1 + $0x98] sm:$0xff]   ;;  %v14495_v28 = vld [vmem:[%s17903_s1 + $0xa0] sm:$0xff]   ;;  %v14496_v30 = vld [vmem:[%s17903_s1 + $0xa8] sm:$0xff]  }
  0x1a   : > { %11683 = vmatprep.subr.bf16.mxu0 %v14734_v2  ;;  %11761 = vmatprep.subr.bf16.mxu1 %v14734_v2  ;;  %v14499_v29 = vld [vmem:[%s14850_s20] sm:$0xff]   ;;  %v14500_v31 = vld [vmem:[%s14850_s20 + $0x8] ss:$0 sps:$4 sm:$0x11]   ;;  %v14497_v33 = vld [vmem:[%s17903_s1 + $0xb0] sm:$0xff]  }
  0x1b   : > { %v710_v32 = vshll.u32 %v14499_v29, 16  ;;  %v708_v34 = vshrl.u32 %v14499_v29, 16  ;;  %v715_v36 = vshll.u32 %v14500_v31, 16  ;;  %v14498_v37 = vld [vmem:[%s17903_s1 + $0xb8] sm:$0xff]   ;;  %v14501_v40 = vld [vmem:[%s17903_s1 + $0xc0] sm:$0xff]   ;;  %v14509_v41 = vld [vmem:[%s14850_s20 + $0xc] sm:$0xff]  }
  0x1c   : > { %v14510_v42 = vld [vmem:[%s14850_s20 + $0x14] ss:$0 sps:$4 sm:$0x11]   ;;  %v14502_v44 = vld [vmem:[%s17903_s1 + $0xc8] sm:$0xff]   ;;  %v842_v45 = vshll.u32 %v14509_v41, 16  ;;  %v840_v48 = vshrl.u32 %v14509_v41, 16 }
  0x1d   : > { %11684 = vmatpush3.bf16.msra.mxu0 %v14476_v5  ;;  %11762 = vmatpush3.bf16.msra.mxu1 %v14513_v17  ;;  %v712_v35 = vrot.slane %v710_v32, 1  ;;  %v717_v39 = vrot.slane %v715_v36, 1  ;;  %v847_v46 = vshll.u32 %v14510_v42, 16  ;;  %v14503_v47 = vld [vmem:[%s17903_s1 + $0xd0] sm:$0xff]   ;;  %v14504_v51 = vld [vmem:[%s17903_s1 + $0xd8] sm:$0xff]   ;;  %v14505_v52 = vld [vmem:[%s17903_s1 + $0xe0] sm:$0xff]  }
  0x1e   : > { %11685 = vmatprep.subr.bf16.mxu0 %v14734_v2  ;;  %11763 = vmatprep.subr.bf16.mxu1 %v14734_v2  ;;  %v844_v49 = vrot.slane %v842_v45, 1  ;;  %v14506_v53 = vld [vmem:[%s17903_s1 + $0xe8] sm:$0xff]   ;;  %v14507_v54 = vld [vmem:[%s17903_s1 + $0xf0] sm:$0xff]   ;;  %v14508_v55 = vld [vmem:[%s17903_s1 + $0xf8] sm:$0xff]  }
  0x1f   : > { %v713_v38 = vor.u32 %v712_v35, %v708_v34  ;;  %v849_v50 = vrot.slane %v847_v46, 1  ;;  %v14515_v58 = vld [vmem:[%s17904_s2 + $0x60] sm:$0xff]   ;;  %v14516_v60 = vld [vmem:[%s17904_s2 + $0x68] sm:$0xff]   ;;  %v14517_v61 = vld [vmem:[%s17904_s2 + $0x70] sm:$0xff]  }
  0x20   : > { %v845_v56 = vor.u32 %v844_v49, %v840_v48  ;;  %v15003_v59 = vld [vmem:[#allocation2] sm:$0xff]  ;;  %v14518_v62 = vld [vmem:[%s17904_s2 + $0x78] sm:$0xff]   ;;  %v15026_v0 = vld [vmem:[%s17908_s6 + $0x8] sm:$0xff] }
  0x21   : > { %11686 = vmatpush3.bf16.msra.mxu0 %v14477_v6  ;;  %11764 = vmatpush3.bf16.msra.mxu1 %v14514_v19  ;;  %v718_v43 = vsel %vm706_vm1, %v713_v38, %v717_v39  ;;  %v15021_v63 = vld [vmem:[%s17908_s6] sm:$0xff]  ;;  %v15031_v1 = vld [vmem:[%s17908_s6 + $0x10] sm:$0xff]  ;;  %v1419_v4 = vand.u32 4294901760, %v15026_v0  ;;  %v15039_v5 = vld [vmem:[%s17908_s6 + $0x18] sm:$0xff]  ;;  %449 = vst.msk [vmem:[#allocation5 + $0x8] sm:$0x1f] %vm448_vm8, %v15003_v59 }
  0x22   : > { %11687 = vmatprep.subr.bf16.mxu0 %v14734_v2  ;;  %11765 = vmatprep.subr.bf16.mxu1 %v14734_v2  ;;  %v850_v57 = vsel %vm706_vm1, %v845_v56, %v849_v50  ;;  %v1416_v3 = vand.u32 4294901760, %v15021_v63  ;;  %v1422_v6 = vand.u32 4294901760, %v15031_v1  ;;  %v14523_v29 = vld [vmem:[%s17904_s2 + $0x20] sm:$0xff]   ;;  %v14525_v31 = vld [vmem:[%s17904_s2 + $0x30] sm:$0xff]   ;;  %v14526_v32 = vld [vmem:[%s17904_s2 + $0x38] sm:$0xff]  }
  0x23   : > { %v14527_v34 = vld [vmem:[%s17904_s2 + $0x80] sm:$0xff]   ;;  %v14528_v36 = vld [vmem:[%s17904_s2 + $0x88] sm:$0xff]   ;;  %v14530_v38 = vld [vmem:[%s17904_s2 + $0x98] sm:$0xff]  }
  0x24   : > { %v14531_v39 = vld [vmem:[%s17904_s2 + $0xa0] sm:$0xff]   ;;  %v14533_v41 = vld [vmem:[%s17904_s2 + $0xb0] sm:$0xff]   ;;  %v14534_v42 = vld [vmem:[%s17904_s2 + $0xb8] sm:$0xff]  }
  0x25   : > { %11688 = vmatpush3.bf16.msra.mxu0 %v14478_v7  ;;  %11766 = vmatpush3.bf16.msra.mxu1 %v14515_v58  ;;  %v1425_v7 = vand.u32 4294901760, %v15039_v5  ;;  %v14536_v46 = vld [vmem:[%s17904_s2 + $0xc8] sm:$0xff]   ;;  %v14538_v48 = vld [vmem:[%s17904_s2 + $0xd8] sm:$0xff]   ;;  %v14539_v49 = vld [vmem:[%s17904_s2 + $0xe0] sm:$0xff]  }
  0x26   : > { %11689 = vmatprep.subr.bf16.mxu0 %v14734_v2  ;;  %11767 = vmatprep.subr.bf16.mxu1 %v15003_v59  ;;  %v14540_v50 = vld [vmem:[%s17904_s2 + $0xe8] sm:$0xff]   ;;  %v1406_v56 = vld [vmem:[%s17908_s6 + $0x38] sm:$0xff] }
  0x27   : > { %v1437_v58 = vand.u32 4294901760, %v1406_v56 }
  0x29   : > { %11690 = vmatpush3.bf16.msra.mxu0 %v14479_v8  ;;  %11768 = vmatpush3.bf16.msra.mxu1 %v14516_v60  ;;  %v15046_v8 = vld [vmem:[%s17908_s6 + $0x20] sm:$0xff] }
  0x2a   : > { %11691 = vmatprep.subr.bf16.mxu0 %v14734_v2  ;;  %11769 = vmatprep.subr.bf16.mxu1 %v15003_v59 }
  0x2d   : > { %11692 = vmatpush3.bf16.msra.mxu0 %v14480_v9  ;;  %11770 = vmatpush3.bf16.msra.mxu1 %v14517_v61  ;;  %v15051_v9 = vld [vmem:[%s17908_s6 + $0x28] sm:$0xff]  ;;  %v1407_v61 = vld [vmem:[%s17908_s6 + $0x40] sm:$0xff] }
  0x2e   : > { %11697 = vmatprep.subr.bf16.mxu0 %v14734_v2  ;;  %11771 = vmatprep.subr.bf16.mxu1 %v15003_v59 }
  0x30   : > { %11694 = vmatmul.mubr.bf16.vlgmr.msra.gmra.mrb[0].mxu0 %v14481_v10  ;;  %v15057_v10 = vpack.c.bf16 %v1419_v4, %v1416_v3 }
  0x31   : > { %11698 = vmatpush3.bf16.msra.mxu0 %v14482_v11  ;;  %11713 = vmatprep.mubr.msk.bf16.mxu0 %vm14735_vm0, %v14734_v2  ;;  %v15064_v11 = vpack.c.bf16 %v1425_v7, %v1422_v6 }
  0x32   : > { %11699 = vmatprep.subr.bf16.mxu0 %v14734_v2  ;;  %11772 = vmatpush3.bf16.msra.mxu1 %v14518_v62  ;;  %v1408_v62 = vld [vmem:[%s17908_s6 + $0x48] sm:$0xff] }
  0x33   : > { %11777 = vmatprep.subr.bf16.mxu1 %v15003_v59 }
  0x35   : > { %11700 = vmatpush3.bf16.msra.mxu0 %v14483_v12  ;;  %v1428_v12 = vand.u32 4294901760, %v15046_v8 }
  0x36   : > { %11701 = vmatprep.subr.bf16.mxu0 %v14734_v2 }
  0x39   : > { %11702 = vmatpush3.bf16.msra.mxu0 %v14484_v13  ;;  %v1431_v13 = vand.u32 4294901760, %v15051_v9 }
  0x3a   : > { %11703 = vmatprep.subr.bf16.mxu0 %v14734_v2 }
  0x3b   : > { %v15074_v14 = vpack.c.bf16 %v1431_v13, %v1428_v12 }
  0x3d   : > { %11704 = vmatpush3.bf16.msra.mxu0 %v14485_v16 }
  0x3e   : > { %11705 = vmatprep.subr.bf16.mxu0 %v14734_v2 }
  0x41   : > { %11706 = vmatpush3.bf16.msra.mxu0 %v14486_v18 }
  0x42   : > { %11707 = vmatprep.subr.bf16.mxu0 %v14734_v2 }
  0x45   : > { %11708 = vmatpush3.bf16.msra.mxu0 %v14487_v20 }
  0x46   : > { %11709 = vmatprep.subr.bf16.mxu0 %v14734_v2 }
  0x49   : > { %11710 = vmatpush3.bf16.msra.mxu0 %v14488_v21 }
  0x4a   : > { %11711 = vmatprep.subr.bf16.mxu0 %v14734_v2 }
  0x4d   : > { %11712 = vmatpush3.bf16.msra.mxu0 %v14489_v22 }
  0x4e   : > { %11717 = vmatprep.subr.bf16.mxu0 %v14734_v2 }
  0x50   : > { %11714 = vmatmul.mubr.bf16.vlgmr.msra.gmra.mrb[0].mxu0 %v14490_v23 }
  0x51   : > { %11718 = vmatpush3.bf16.msra.mxu0 %v14491_v24  ;;  %11733 = vmatprep.mubr.msk.bf16.mxu0 %vm14735_vm0, %v14734_v2  ;;  %v14519_v24 = vld [vmem:[%s17904_s2] sm:$0xff]  }
  0x52   : > { %11719 = vmatprep.subr.bf16.mxu0 %v14734_v2 }
  0x55   : > { %11720 = vmatpush3.bf16.msra.mxu0 %v14492_v25 }
  0x56   : > { %11721 = vmatprep.subr.bf16.mxu0 %v14734_v2 }
  0x59   : > { %11722 = vmatpush3.bf16.msra.mxu0 %v14493_v26  ;;  %v14520_v26 = vld [vmem:[%s17904_s2 + $0x8] sm:$0xff]  }
  0x5a   : > { %11723 = vmatprep.subr.bf16.mxu0 %v14734_v2 }
  0x5d   : > { %11724 = vmatpush3.bf16.msra.mxu0 %v14494_v27  ;;  %v14521_v27 = vld [vmem:[%s17904_s2 + $0x10] sm:$0xff]  }
  0x5e   : > { %11725 = vmatprep.subr.bf16.mxu0 %v14734_v2 }
  0x61   : > { %11726 = vmatpush3.bf16.msra.mxu0 %v14495_v28  ;;  %v14522_v28 = vld [vmem:[%s17904_s2 + $0x18] sm:$0xff]  }
  0x62   : > { %11727 = vmatprep.subr.bf16.mxu0 %v14734_v2 }
  0x65   : > { %11728 = vmatpush3.bf16.msra.mxu0 %v14496_v30  ;;  %v14524_v30 = vld [vmem:[%s17904_s2 + $0x28] sm:$0xff]  }
  0x66   : > { %11729 = vmatprep.subr.bf16.mxu0 %v14734_v2 }
  0x69   : > { %11730 = vmatpush3.bf16.msra.mxu0 %v14497_v33 }
  0x6a   : > { %11731 = vmatprep.subr.bf16.mxu0 %v14734_v2 }
  0x6d   : > { %11732 = vmatpush3.bf16.msra.mxu0 %v14498_v37  ;;  %v14529_v37 = vld [vmem:[%s17904_s2 + $0x90] sm:$0xff]  }
  0x6e   : > { %11737 = vmatprep.subr.bf16.mxu0 %v14734_v2 }
  0x70   : > { %11734 = vmatmul.mubr.bf16.vlgmr.msra.gmra.mrb[0].mxu0 %v718_v43 }
  0x71   : > { %11738 = vmatpush3.bf16.msra.mxu0 %v14501_v40  ;;  %11753 = vmatprep.mubr.msk.bf16.mxu0 %vm14735_vm0, %v14734_v2  ;;  %v14532_v40 = vld [vmem:[%s17904_s2 + $0xa8] sm:$0xff]  }
  0x72   : > { %11739 = vmatprep.subr.bf16.mxu0 %v14734_v2 }
  0x75   : > { %11740 = vmatpush3.bf16.msra.mxu0 %v14502_v44  ;;  %v14535_v44 = vld [vmem:[%s17904_s2 + $0xc0] sm:$0xff]  }
  0x76   : > { %11741 = vmatprep.subr.bf16.mxu0 %v14734_v2 }
  0x79   : > { %11742 = vmatpush3.bf16.msra.mxu0 %v14503_v47  ;;  %v14537_v47 = vld [vmem:[%s17904_s2 + $0xd0] sm:$0xff]  }
  0x7a   : > { %11743 = vmatprep.subr.bf16.mxu0 %v14734_v2 }
  0x7d   : > { %11744 = vmatpush3.bf16.msra.mxu0 %v14504_v51  ;;  %v14541_v51 = vld [vmem:[%s17904_s2 + $0xf0] sm:$0xff]  }
  0x7e   : > { %11745 = vmatprep.subr.bf16.mxu0 %v14734_v2 }
  0x81   : > { %11746 = vmatpush3.bf16.msra.mxu0 %v14505_v52  ;;  %v14542_v52 = vld [vmem:[%s17904_s2 + $0xf8] sm:$0xff]  }
  0x82   : > { %11747 = vmatprep.subr.bf16.mxu0 %v14734_v2 }
  0x85   : > { %11748 = vmatpush3.bf16.msra.mxu0 %v14506_v53 }
  0x86   : > { %11749 = vmatprep.subr.bf16.mxu0 %v14734_v2 }
  0x89   : > { %11750 = vmatpush3.bf16.msra.mxu0 %v14507_v54 }
  0x8a   : > { %11751 = vmatprep.subr.bf16.mxu0 %v14734_v2 }
  0x8d   : > { %11752 = vmatpush3.bf16.msra.mxu0 %v14508_v55  ;;  %v1405_v55 = vld [vmem:[%s17908_s6 + $0x30] sm:$0xff] }
  0x90   : > { %11754 = vmatmul.mubr.bf16.vlgmr.msra.gmra.mrb[0].mxu0 %v850_v57  ;;  %v1434_v57 = vand.u32 4294901760, %v1405_v55 }
  0x91   : > { %11869 = vmatprep.mubr.msk.f32.mxu0 %vm14735_vm0, %v14734_v2  ;;  %v17929_v2 = vmov 0.0|0.0  }
  0x92   : > { %12973 = vmatprep.subr.bf16.mxu0 %v17929_v2  ;;  %v15189_v60 = vpack.c.bf16 %v1437_v58, %v1434_v57 }
  0x93   : > { %12975 = vmatpush3.bf16.msra.mxu0 %v15057_v10 }
  0x94   : > { %12976 = vmatprep.subr.bf16.mxu0 %v17929_v2 }
  0x97   : > { %12978 = vmatpush3.bf16.msra.mxu0 %v15064_v11 }
  0x98   : > { %12979 = vmatprep.subr.bf16.mxu0 %v17929_v2 }
  0x9b   : > { %12981 = vmatpush3.bf16.msra.mxu0 %v15074_v14 }
  0x9c   : > { %12982 = vmatprep.subr.bf16.mxu0 %v17929_v2 }
  0x9f   : > { %12984 = vmatpush3.bf16.msra.mxu0 %v15189_v60 }
  0xa0   : > { %12985 = vmatprep.subr.bf16.mxu0 %v17929_v2 }
 0x163   : > { %v934_v15 = vpop.f32.mrb[0].mxu0 }
 0x164   : > { %v943_v16 = vmul.f32 0.2, %v934_v15  ;;  %v11755_v17 = vpop.f32.mrb[1].mxu0 }
 0x165   : > { %v937_v18 = vpop.f32.mrb[2].mxu0 }
 0x166   : > { %v945_v19 = vmax.f32 %v934_v15, %v943_v16  ;;  %v944_v20 = vmul.f32 0.2, %v937_v18  ;;  %v11756_v21 = vpop.f32.mrb[3].mxu0  ;;  %v1440_v15 = vand.u32 4294901760, %v1407_v61  ;;  %v1443_v16 = vand.u32 4294901760, %v1408_v62 }
 0x168   : > { %948 = vst [vmem:[#allocation2 + $0x10] ss:$-14 sps:$4 sm:$0x21] %v945_v19   ;;  %949 = vst [vmem:[#allocation2] ss:$18 sps:$4 sm:$0x12] %v945_v19   ;;  %v946_v22 = vmax.f32 %v937_v18, %v944_v20  ;;  %v15199_v17 = vpack.c.bf16 %v1443_v16, %v1440_v15 }
 0x169   : > { %950 = vst [vmem:[#allocation2 + $0xf] ss:$-14 sps:$4 sm:$0x84] %v945_v19   ;;  %951 = vst [vmem:[#allocation2 - $0x1] ss:$18 sps:$4 sm:$0x48] %v945_v19  }
 0x16a   : > { %956 = vst [vmem:[#allocation2 + $0x14] ss:$-14 sps:$4 sm:$0x21] %v946_v22   ;;  %957 = vst [vmem:[#allocation2 + $0x4] ss:$18 sps:$4 sm:$0x12] %v946_v22   ;;  %12987 = vmatpush3.bf16.msra.mxu0 %v15199_v17 }
 0x16b   : > { %958 = vst [vmem:[#allocation2 + $0x13] ss:$-14 sps:$4 sm:$0x84] %v946_v22   ;;  %959 = vst [vmem:[#allocation2 + $0x3] ss:$18 sps:$4 sm:$0x48] %v946_v22   ;;  %12988 = vmatprep.subr.bf16.mxu0 %v17929_v2 }
 0x16c   : > { %v1409_v18 = vld [vmem:[%s17908_s6 + $0x50] sm:$0xff]  ;;  %v1410_v19 = vld [vmem:[%s17908_s6 + $0x58] sm:$0xff] }
 0x16d   : > { %v1446_v20 = vand.u32 4294901760, %v1409_v18  ;;  %v1449_v21 = vand.u32 4294901760, %v1410_v19 }
 0x16f   : > { %v15209_v22 = vpack.c.bf16 %v1449_v21, %v1446_v20 }
 0x171   : > { %12990 = vmatpush3.bf16.msra.mxu0 %v15209_v22 }
 0x172   : > { %v982_v23 = vld [vmem:[#allocation2 + $0x10] sm:$0xff]  ;;  %v964_v33 = vld [vmem:[#allocation2] sm:$0xff]  ;;  %12991 = vmatprep.subr.bf16.mxu0 %v17929_v2 }
 0x173   : > { %v983_v25 = vpack.c.bf16 %v982_v23, %v982_v23  ;;  %v965_v35 = vpack.c.bf16 %v964_v33, %v964_v33  ;;  %v1177_v43 = vld [vmem:[#allocation2 + $0x1] sm:$0xff]  ;;  %v1285_v53 = vld [vmem:[#allocation2 + $0x11] sm:$0xff]  ;;  %v15233_v33 = vsub.f32 %v1405_v55, %v1434_v57 }
 0x174   : > { %v1178_v45 = vpack.c.bf16 %v1177_v43, %v1177_v43  ;;  %v1286_v54 = vpack.c.bf16 %v1285_v53, %v1285_v53  ;;  %v1411_v23 = vld [vmem:[%s17908_s6 + $0x60] sm:$0xff] }
 0x175   : > { %11774 = vmatmul.mubr.bf16.vlgmr.msra.gmra.mrb[0].mxu1 %v983_v25  ;;  %v1452_v25 = vand.u32 4294901760, %v1411_v23 }
 0x176   : > { %11778 = vmatpush3.bf16.msra.mxu1 %v14519_v24  ;;  %11793 = vmatprep.mubr.msk.bf16.mxu1 %vm14735_vm0, %v15003_v59  ;;  %v1412_v24 = vld [vmem:[%s17908_s6 + $0x68] sm:$0xff] }
 0x177   : > { %11779 = vmatprep.subr.bf16.mxu1 %v15003_v59  ;;  %v15273_v57 = vsub.f32 %v1411_v23, %v1452_v25 }
 0x17a   : > { %11780 = vmatpush3.bf16.msra.mxu1 %v14520_v26  ;;  %v1455_v26 = vand.u32 4294901760, %v1412_v24 }
 0x17b   : > { %11781 = vmatprep.subr.bf16.mxu1 %v15003_v59 }
 0x17e   : > { %11782 = vmatpush3.bf16.msra.mxu1 %v14521_v27  ;;  %v15219_v27 = vpack.c.bf16 %v1455_v26, %v1452_v25 }
 0x17f   : > { %11783 = vmatprep.subr.bf16.mxu1 %v15003_v59 }
 0x180   : > { %12993 = vmatpush3.bf16.msra.mxu0 %v15219_v27 }
 0x181   : > { %12994 = vmatprep.subr.bf16.mxu0 %v17929_v2 }
 0x182   : > { %11784 = vmatpush3.bf16.msra.mxu1 %v14522_v28  ;;  %v1413_v28 = vld [vmem:[%s17908_s6 + $0x70] sm:$0xff] }
 0x183   : > { %11785 = vmatprep.subr.bf16.mxu1 %v15003_v59 }
 0x186   : > { %11786 = vmatpush3.bf16.msra.mxu1 %v14523_v29  ;;  %v1414_v29 = vld [vmem:[%s17908_s6 + $0x78] sm:$0xff] }
 0x187   : > { %11787 = vmatprep.subr.bf16.mxu1 %v15003_v59 }
 0x18a   : > { %11788 = vmatpush3.bf16.msra.mxu1 %v14524_v30  ;;  %v1458_v30 = vand.u32 4294901760, %v1413_v28 }
 0x18b   : > { %11789 = vmatprep.subr.bf16.mxu1 %v15003_v59 }
 0x18e   : > { %11790 = vmatpush3.bf16.msra.mxu1 %v14525_v31  ;;  %v1461_v31 = vand.u32 4294901760, %v1414_v29 }
 0x18f   : > { %11791 = vmatprep.subr.bf16.mxu1 %v15003_v59 }
 0x192   : > { %11792 = vmatpush3.bf16.msra.mxu1 %v14526_v32  ;;  %v15229_v32 = vpack.c.bf16 %v1461_v31, %v1458_v30 }
 0x193   : > { %11797 = vmatprep.subr.bf16.mxu1 %v15003_v59 }
 0x194   : > { %12996 = vmatpush3.bf16.msra.mxu0 %v15229_v32 }
 0x195   : > { %11794 = vmatmul.mubr.bf16.vlgmr.msra.gmra.mrb[0].mxu1 %v965_v35  ;;  %12997 = vmatprep.subr.bf16.mxu0 %v17929_v2  ;;  %v1551_v35 = vand.u32 4294901760, %v15233_v33 }
 0x196   : > { %11798 = vmatpush3.bf16.msra.mxu1 %v14527_v34  ;;  %11813 = vmatprep.mubr.msk.bf16.mxu1 %vm14735_vm0, %v15003_v59  ;;  %v15235_v34 = vsub.f32 %v1406_v56, %v1437_v58  ;;  %v15275_v58 = vsub.f32 %v1412_v24, %v1455_v26 }
 0x197   : > { %11799 = vmatprep.subr.bf16.mxu1 %v15003_v59 }
 0x19a   : > { %11800 = vmatpush3.bf16.msra.mxu1 %v14528_v36  ;;  %v1558_v36 = vand.u32 4294901760, %v15235_v34 }
 0x19b   : > { %11801 = vmatprep.subr.bf16.mxu1 %v15003_v59 }
 0x19e   : > { %11802 = vmatpush3.bf16.msra.mxu1 %v14529_v37  ;;  %v1552_v37 = vsub.f32 %v15233_v33, %v1551_v35 }
 0x19f   : > { %11803 = vmatprep.subr.bf16.mxu1 %v15003_v59 }
 0x1a2   : > { %11804 = vmatpush3.bf16.msra.mxu1 %v14530_v38  ;;  %v15242_v38 = vsub.f32 %v1407_v61, %v1440_v15  ;;  %v17919_v15 = vand.u32 4294901760, %v15273_v57 }
 0x1a3   : > { %11805 = vmatprep.subr.bf16.mxu1 %v15003_v59 }
 0x1a6   : > { %11806 = vmatpush3.bf16.msra.mxu1 %v14531_v39  ;;  %v15244_v39 = vsub.f32 %v1408_v62, %v1443_v16  ;;  %v17918_v16 = vand.u32 4294901760, %v15275_v58 }
 0x1a7   : > { %11807 = vmatprep.subr.bf16.mxu1 %v15003_v59 }
 0x1a8   : > { %v1572_v43 = vand.u32 4294901760, %v15244_v39  ;;  %v1601_v23 = vsub.f32 %v15275_v58, %v17918_v16 }
 0x1aa   : > { %11808 = vmatpush3.bf16.msra.mxu1 %v14532_v40  ;;  %v1559_v40 = vsub.f32 %v15235_v34, %v1558_v36 }
 0x1ab   : > { %11809 = vmatprep.subr.bf16.mxu1 %v15003_v59 }
 0x1ae   : > { %11810 = vmatpush3.bf16.msra.mxu1 %v14533_v41  ;;  %v1553_v41 = vand.u32 4294901760, %v1552_v37  ;;  %v1602_v37 = vand.u32 4294901760, %v1601_v23 }
 0x1af   : > { %11811 = vmatprep.subr.bf16.mxu1 %v15003_v59 }
 0x1b2   : > { %11812 = vmatpush3.bf16.msra.mxu1 %v14534_v42  ;;  %v1565_v42 = vand.u32 4294901760, %v15242_v38 }
 0x1b3   : > { %11817 = vmatprep.subr.bf16.mxu1 %v15003_v59 }
 0x1b5   : > { %11814 = vmatmul.mubr.bf16.vlgmr.msra.gmra.mrb[0].mxu1 %v1178_v45  ;;  %v1566_v45 = vsub.f32 %v15242_v38, %v1565_v42 }
 0x1b6   : > { %11818 = vmatpush3.bf16.msra.mxu1 %v14535_v44  ;;  %11833 = vmatprep.mubr.msk.bf16.mxu1 %vm14735_vm0, %v15003_v59  ;;  %v1560_v44 = vand.u32 4294901760, %v1559_v40 }
 0x1b7   : > { %11819 = vmatprep.subr.bf16.mxu1 %v15003_v59 }
 0x1ba   : > { %11820 = vmatpush3.bf16.msra.mxu1 %v14536_v46  ;;  %v1573_v46 = vsub.f32 %v15244_v39, %v1572_v43 }
 0x1bb   : > { %11821 = vmatprep.subr.bf16.mxu1 %v15003_v59 }
 0x1be   : > { %11822 = vmatpush3.bf16.msra.mxu1 %v14537_v47  ;;  %v15257_v47 = vsub.f32 %v1409_v18, %v1446_v20  ;;  %v15284_v20 = vsub.f32 %v1413_v28, %v1458_v30 }
 0x1bf   : > { %11823 = vmatprep.subr.bf16.mxu1 %v15003_v59 }
 0x1c0   : > { %v17917_v25 = vand.u32 4294901760, %v15284_v20 }
 0x1c2   : > { %11824 = vmatpush3.bf16.msra.mxu1 %v14538_v48  ;;  %v15259_v48 = vsub.f32 %v1410_v19, %v1449_v21  ;;  %v1594_v19 = vsub.f32 %v15273_v57, %v17919_v15  ;;  %v15286_v21 = vsub.f32 %v1414_v29, %v1461_v31  ;;  %v1608_v40 = vsub.f32 %v15284_v20, %v17917_v25 }
 0x1c3   : > { %11825 = vmatprep.subr.bf16.mxu1 %v15003_v59 }
 0x1c4   : > { %v17920_v53 = vand.u32 4294901760, %v15259_v48  ;;  %v1595_v24 = vand.u32 4294901760, %v1594_v19  ;;  %v17916_v26 = vand.u32 4294901760, %v15286_v21  ;;  %v1609_v30 = vand.u32 4294901760, %v1608_v40 }
 0x1c6   : > { %11826 = vmatpush3.bf16.msra.mxu1 %v14539_v49  ;;  %v15261_v49 = vpack.c.bf16 %v1560_v44, %v1553_v41  ;;  %v1587_v56 = vsub.f32 %v15259_v48, %v17920_v53  ;;  %v1615_v28 = vsub.f32 %v15286_v21, %v17916_v26  ;;  %v15299_v29 = vpack.c.bf16 %v1602_v37, %v1595_v24 }
 0x1c7   : > { %11827 = vmatprep.subr.bf16.mxu1 %v15003_v59  ;;  %v15305_v44 = vpack.c.bf16 %v15235_v34, %v15233_v33  ;;  %v15330_v24 = vsub.f32 %v15021_v63, %v1416_v3  ;;  %v15335_v37 = vsub.f32 %v15026_v0, %v1419_v4  ;;  %v15347_v63 = vsub.f32 %v15039_v5, %v1425_v7 }
 0x1c8   : > { %v1588_v62 = vand.u32 4294901760, %v1587_v56  ;;  %v1616_v31 = vand.u32 4294901760, %v1615_v28  ;;  %v15365_v5 = vsub.f32 %v15051_v9, %v1431_v13  ;;  %v18000_v33 = vand.u32 4294901760, %v15257_v47 }
 0x1c9   : > { %v18001_v34 = vand.u32 4294901760, %v15259_v48 }
 0x1ca   : > { %11828 = vmatpush3.bf16.msra.mxu1 %v14540_v50  ;;  %v1567_v50 = vand.u32 4294901760, %v1566_v45  ;;  %v15301_v41 = vpack.c.bf16 %v1616_v31, %v1609_v30  ;;  %v15309_v45 = vpack.c.bf16 %v15244_v39, %v15242_v38  ;;  %v1509_v30 = vand.u32 4294901760, %v15330_v24 }
 0x1cb   : > { %11829 = vmatprep.subr.bf16.mxu1 %v15003_v59  ;;  %v1516_v31 = vand.u32 4294901760, %v15335_v37  ;;  %v1544_v9 = vand.u32 4294901760, %v15365_v5  ;;  %v18003_v38 = vand.u32 4294901760, %v15275_v58 }
 0x1cc   : > { %v1510_v0 = vsub.f32 %v15330_v24, %v1509_v30 }
 0x1cd   : > { %v1517_v4 = vsub.f32 %v15335_v37, %v1516_v31  ;;  %v1545_v25 = vsub.f32 %v15365_v5, %v1544_v9 }
 0x1ce   : > { %11830 = vmatpush3.bf16.msra.mxu1 %v14541_v51  ;;  %v1574_v51 = vand.u32 4294901760, %v1573_v46  ;;  %v15313_v46 = vpack.c.bf16 %v15259_v48, %v15257_v47  ;;  %v2057_v48 = vld [vmem:[%s17909_s7] sm:$0xff] }
 0x1cf   : > { %11831 = vmatprep.subr.bf16.mxu1 %v15003_v59 }
 0x1d2   : > { %11832 = vmatpush3.bf16.msra.mxu1 %v14542_v52  ;;  %v17921_v52 = vand.u32 4294901760, %v15257_v47 }
 0x1d3   : > { %13117 = vmatprep.subr.bf16.mxu1 %v17929_v2 }
 0x1d4   : > { %v1580_v55 = vsub.f32 %v15257_v47, %v17921_v52  ;;  %v1546_v52 = vand.u32 4294901760, %v1545_v25  ;;  %v15467_v25 = vpack.c.bf16 %v1516_v31, %v1509_v30  ;;  %v15503_v30 = vpack.c.bf16 %v1572_v43, %v1565_v42 }
 0x1d5   : > { %11834 = vmatmul.mubr.bf16.vlgmr.msra.gmra.mrb[0].mxu1 %v1286_v54  ;;  %v15265_v54 = vpack.c.bf16 %v1574_v51, %v1567_v50  ;;  %v15317_v50 = vpack.c.bf16 %v15275_v58, %v15273_v57  ;;  %v15321_v51 = vpack.c.bf16 %v15286_v21, %v15284_v20  ;;  %v18004_v42 = vand.u32 4294901760, %v15284_v20 }
 0x1d6   : > { %12051 = vmatprep.mubr.msk.f32.mxu1 %vm14735_vm0, %v15003_v59  ;;  %v1581_v61 = vand.u32 4294901760, %v1580_v55  ;;  %v18005_v43 = vand.u32 4294901760, %v15286_v21  ;;  %v2064_v58 = vand.u32 4294901760, %v2057_v48 }
 0x1d8   : > { %v15279_v18 = vpack.c.bf16 %v1588_v62, %v1581_v61  ;;  %v15527_v47 = vpack.c.bf16 %v18005_v43, %v18004_v42  ;;  %v2142_v31 = vsub.f32 %v2057_v48, %v2064_v58 }
 0x2a8   : > { %v15323_v55 = vpop.f32.mrb[0].mxu1 }
 0x2a9   : > { %v1393_v56 = vrot.slane %v15323_v55, 4  ;;  %v11835_v61 = vpop.f32.mrb[1].mxu1 }
 0x2aa   : > { %v1389_v62 = vpop.f32.mrb[2].mxu1 }
 0x2ab   : > { %v1394_v19 = vadd.f32 %v1393_v56, %v15323_v55  ;;  %v11836_v23 = vpop.f32.mrb[3].mxu1  ;;  %v15342_v56 = vsub.f32 %v15031_v1, %v1422_v6  ;;  %v1530_v1 = vand.u32 4294901760, %v15347_v63  ;;  %v15360_v6 = vsub.f32 %v15046_v8, %v1428_v12 }
 0x2ac   : > { %v1511_v23 = vand.u32 4294901760, %v1510_v0 }
 0x2ad   : > { %v1395_v40 = vrot.slane %v1394_v19, 2  ;;  %v1523_v62 = vand.u32 4294901760, %v15342_v56  ;;  %v1531_v8 = vsub.f32 %v15347_v63, %v1530_v1  ;;  %v1537_v12 = vand.u32 4294901760, %v15360_v6 }
 0x2af   : > { %v1396_v28 = vadd.f32 %v1395_v40, %v1394_v19  ;;  %v1518_v40 = vand.u32 4294901760, %v1517_v4  ;;  %v1532_v4 = vand.u32 4294901760, %v1531_v8  ;;  %v1538_v26 = vsub.f32 %v15360_v6, %v1537_v12 }
 0x2b1   : > { %v1397_v3 = vrot.slane %v1396_v28, 1  ;;  %v1539_v53 = vand.u32 4294901760, %v1538_v26  ;;  %v15477_v26 = vpack.c.bf16 %v1530_v1, %v1523_v62 }
 0x2b3   : > { %v1398_v61 = vadd.f32 %v1397_v3, %v1396_v28  ;;  %v1524_v28 = vsub.f32 %v15342_v56, %v1523_v62 }
 0x2b5   : > { %v15367_v7 = vand.u32 4294901760, %v1398_v61  ;;  %v1525_v0 = vand.u32 4294901760, %v1524_v28 }
 0x2b7   : > { %v15370_v19 = vsub.f32 %v1398_v61, %v15367_v7  ;;  %v15384_v61 = vpack.c.bf16 %v1518_v40, %v1511_v23  ;;  %v15393_v15 = vpack.c.bf16 %v1532_v4, %v1525_v0  ;;  %v15399_v23 = vpack.c.bf16 %v1546_v52, %v1539_v53 }
 0x2b8   : > { %v15415_v52 = vpack.c.bf16 %v15335_v37, %v15330_v24  ;;  %v15422_v53 = vpack.c.bf16 %v15347_v63, %v15342_v56  ;;  %v15487_v24 = vpack.c.bf16 %v1544_v9, %v1537_v12  ;;  %v15495_v37 = vpack.c.bf16 %v1558_v36, %v1551_v35 }
 0x2b9   : > { %v1498_v13 = vand.u32 4294901760, %v15370_v19  ;;  %v15511_v35 = vpack.c.bf16 %v18001_v34, %v18000_v33  ;;  %v18002_v36 = vand.u32 4294901760, %v15273_v57  ;;  %v2058_v57 = vld [vmem:[%s17909_s7 + $0x8] sm:$0xff]  ;;  %v2143_v63 = vand.u32 4294901760, %v2142_v31 }
 0x2ba   : > { %v2067_v20 = vand.u32 4294901760, %v2058_v57 }
 0x2bb   : > { %v1499_v3 = vsub.f32 %v15370_v19, %v1498_v13  ;;  %v15519_v39 = vpack.c.bf16 %v18003_v38, %v18002_v36  ;;  %v2144_v1 = vsub.f32 %v2142_v31, %v2143_v63  ;;  %v2522_v36 = vlaneseq }
 0x2bc   : > { %v15560_v21 = vpack.c.bf16 %v2067_v20, %v2064_v58  ;;  %v2149_v56 = vsub.f32 %v2058_v57, %v2067_v20 }
 0x2bd   : > { %v1500_v16 = vand.u32 4294901760, %v1499_v3  ;;  %v2523_v38 = vshrl.u32 %v2522_v36, 7  ;;  %v14557_v36 = vld [vmem:[%s17905_s3 + $0x30] sm:$0xff]  }
 0x2be   : > { %13119 = vmatpush3.bf16.msra.mxu1 %v15560_v21  ;;  %v2150_v62 = vand.u32 4294901760, %v2149_v56  ;;  %v15568_v40 = vpack.c.bf16 %v2149_v56, %v2142_v31 }
 0x2bf   : > { %11870 = vmatmul.mubr.f32.vlgmr.msra.gmra.mrb[4].mxu0 %v1500_v16  ;;  %v15430_v16 = vpack.c.bf16 %v15365_v5, %v15360_v6  ;;  %13120 = vmatprep.subr.bf16.mxu1 %v17929_v2  ;;  %v2145_v5 = vand.u32 4294901760, %v2144_v1  ;;  %v15611_v42 = vsub.s32 0, %v2523_v38  ;;  %v14558_v38 = vld [vmem:[%s17905_s3 + $0x38] sm:$0xff]  }
 0x2c0   : > { %12999 = vmatpush3.bf16.msra.mxu0 %v15384_v61  ;;  %11904 = vmatprep.mubr.msk.f32.mxu0 %vm14735_vm0, %v15003_v59  ;;  %v2151_v6 = vsub.f32 %v2149_v56, %v2150_v62  ;;  %v15570_v28 = vpack.c.bf16 %v2150_v62, %v2143_v63 }
 0x2c1   : > { %13000 = vmatprep.subr.bf16.mxu0 %v17929_v2  ;;  %18006 = vst [vmem:[#allocation7_spill] sm:$0xff] %v15611_v42 }
 0x2c4   : > { %13002 = vmatpush3.bf16.msra.mxu0 %v15393_v15 }
 0x2c5   : > { %13003 = vmatprep.subr.bf16.mxu0 %v17929_v2 }
 0x2c8   : > { %13005 = vmatpush3.bf16.msra.mxu0 %v15399_v23 }
 0x2c9   : > { %13006 = vmatprep.subr.bf16.mxu0 %v17929_v2 }
 0x2cc   : > { %13008 = vmatpush3.bf16.msra.mxu0 %v15261_v49 }
 0x2cd   : > { %13009 = vmatprep.subr.bf16.mxu0 %v17929_v2 }
 0x2d0   : > { %13011 = vmatpush3.bf16.msra.mxu0 %v15265_v54 }
 0x2d1   : > { %13012 = vmatprep.subr.bf16.mxu0 %v17929_v2 }
 0x2d4   : > { %13014 = vmatpush3.bf16.msra.mxu0 %v15279_v18 }
 0x2d5   : > { %13015 = vmatprep.subr.bf16.mxu0 %v17929_v2 }
 0x2d8   : > { %13017 = vmatpush3.bf16.msra.mxu0 %v15299_v29 }
 0x2d9   : > { %13018 = vmatprep.subr.bf16.mxu0 %v17929_v2 }
 0x2dc   : > { %13020 = vmatpush3.bf16.msra.mxu0 %v15301_v41 }
 0x2dd   : > { %13021 = vmatprep.subr.bf16.mxu0 %v17929_v2 }
 0x2df   : > { %11905 = vmatmul.mubr.f32.vlgmr.msra.gmra.mrb[4].mxu0 %v15367_v7 }
 0x2e0   : > { %13023 = vmatpush3.bf16.msra.mxu0 %v15415_v52  ;;  %11939 = vmatprep.mubr.msk.f32.mxu0 %vm14735_vm0, %v15003_v59 }
 0x2e1   : > { %13024 = vmatprep.subr.bf16.mxu0 %v17929_v2 }
 0x2e4   : > { %13026 = vmatpush3.bf16.msra.mxu0 %v15422_v53 }
 0x2e5   : > { %13027 = vmatprep.subr.bf16.mxu0 %v17929_v2 }
 0x2e8   : > { %13029 = vmatpush3.bf16.msra.mxu0 %v15430_v16 }
 0x2e9   : > { %13030 = vmatprep.subr.bf16.mxu0 %v17929_v2 }
 0x2ec   : > { %13032 = vmatpush3.bf16.msra.mxu0 %v15305_v44 }
 0x2ed   : > { %13033 = vmatprep.subr.bf16.mxu0 %v17929_v2 }
 0x2f0   : > { %13035 = vmatpush3.bf16.msra.mxu0 %v15309_v45 }
 0x2f1   : > { %13036 = vmatprep.subr.bf16.mxu0 %v17929_v2 }
 0x2f4   : > { %13038 = vmatpush3.bf16.msra.mxu0 %v15313_v46 }
 0x2f5   : > { %13039 = vmatprep.subr.bf16.mxu0 %v17929_v2 }
 0x2f8   : > { %13041 = vmatpush3.bf16.msra.mxu0 %v15317_v50 }
 0x2f9   : > { %13042 = vmatprep.subr.bf16.mxu0 %v17929_v2 }
 0x2fc   : > { %13044 = vmatpush3.bf16.msra.mxu0 %v15321_v51 }
 0x2fd   : > { %13045 = vmatprep.subr.bf16.mxu0 %v17929_v2 }
 0x2ff   : > { %11940 = vmatmul.mubr.f32.vlgmr.msra.gmra.mrb[4].mxu0 %v15370_v19 }
 0x300   : > { %13047 = vmatpush3.bf16.msra.mxu0 %v15057_v10  ;;  %11974 = vmatprep.mubr.msk.f32.mxu0 %vm14735_vm0, %v15003_v59 }
 0x301   : > { %13048 = vmatprep.subr.bf16.mxu0 %v17929_v2 }
 0x304   : > { %13050 = vmatpush3.bf16.msra.mxu0 %v15064_v11 }
 0x305   : > { %13051 = vmatprep.subr.bf16.mxu0 %v17929_v2 }
 0x308   : > { %13053 = vmatpush3.bf16.msra.mxu0 %v15074_v14 }
 0x309   : > { %13054 = vmatprep.subr.bf16.mxu0 %v17929_v2 }
 0x30c   : > { %13056 = vmatpush3.bf16.msra.mxu0 %v15189_v60 }
 0x30d   : > { %13057 = vmatprep.subr.bf16.mxu0 %v17929_v2 }
 0x310   : > { %13059 = vmatpush3.bf16.msra.mxu0 %v15199_v17 }
 0x311   : > { %13060 = vmatprep.subr.bf16.mxu0 %v17929_v2 }
 0x314   : > { %13062 = vmatpush3.bf16.msra.mxu0 %v15209_v22 }
 0x315   : > { %13063 = vmatprep.subr.bf16.mxu0 %v17929_v2 }
 0x318   : > { %13065 = vmatpush3.bf16.msra.mxu0 %v15219_v27 }
 0x319   : > { %13066 = vmatprep.subr.bf16.mxu0 %v17929_v2 }
 0x31c   : > { %13068 = vmatpush3.bf16.msra.mxu0 %v15229_v32 }
 0x31d   : > { %13069 = vmatprep.subr.bf16.mxu0 %v17929_v2 }
 0x31f   : > { %11975 = vmatmul.mubr.f32.vlgmr.msra.gmra.mrb[4].mxu0 %v1498_v13 }
 0x320   : > { %13071 = vmatpush3.bf16.msra.mxu0 %v15467_v25  ;;  %12009 = vmatprep.mubr.msk.f32.mxu0 %vm14735_vm0, %v15003_v59 }
 0x321   : > { %13072 = vmatprep.subr.bf16.mxu0 %v17929_v2 }
 0x324   : > { %13074 = vmatpush3.bf16.msra.mxu0 %v15477_v26 }
 0x325   : > { %13075 = vmatprep.subr.bf16.mxu0 %v17929_v2 }
 0x328   : > { %13077 = vmatpush3.bf16.msra.mxu0 %v15487_v24 }
 0x329   : > { %13078 = vmatprep.subr.bf16.mxu0 %v17929_v2 }
 0x32c   : > { %13080 = vmatpush3.bf16.msra.mxu0 %v15495_v37 }
 0x32d   : > { %13081 = vmatprep.subr.bf16.mxu0 %v17929_v2 }
 0x330   : > { %13083 = vmatpush3.bf16.msra.mxu0 %v15503_v30 }
 0x331   : > { %13084 = vmatprep.subr.bf16.mxu0 %v17929_v2 }
 0x334   : > { %13086 = vmatpush3.bf16.msra.mxu0 %v15511_v35 }
 0x335   : > { %13087 = vmatprep.subr.bf16.mxu0 %v17929_v2 }
 0x338   : > { %13089 = vmatpush3.bf16.msra.mxu0 %v15519_v39 }
 0x339   : > { %13090 = vmatprep.subr.bf16.mxu0 %v17929_v2 }
 0x33c   : > { %13092 = vmatpush3.bf16.msra.mxu0 %v15527_v47 }
 0x33d   : > { %13093 = vmatprep.subr.bf16.mxu0 %v17929_v2 }
 0x33f   : > { %12010 = vmatmul.mubr.f32.vlgmr.msra.gmra.mrb[4].mxu0 %v15367_v7 }
 0x340   : > { %13095 = vmatpush3.bf16.msra.mxu0 %v15057_v10  ;;  %12044 = vmatprep.mubr.msk.f32.mxu0 %vm14735_vm0, %v15003_v59 }
 0x341   : > { %13096 = vmatprep.subr.bf16.mxu0 %v17929_v2 }
 0x344   : > { %13098 = vmatpush3.bf16.msra.mxu0 %v15064_v11 }
 0x345   : > { %13099 = vmatprep.subr.bf16.mxu0 %v17929_v2 }
 0x348   : > { %13101 = vmatpush3.bf16.msra.mxu0 %v15074_v14 }
 0x349   : > { %13102 = vmatprep.subr.bf16.mxu0 %v17929_v2 }
 0x34c   : > { %13104 = vmatpush3.bf16.msra.mxu0 %v15189_v60 }
 0x34d   : > { %13105 = vmatprep.subr.bf16.mxu0 %v17929_v2 }
 0x350   : > { %13107 = vmatpush3.bf16.msra.mxu0 %v15199_v17 }
 0x351   : > { %13108 = vmatprep.subr.bf16.mxu0 %v17929_v2 }
 0x354   : > { %13110 = vmatpush3.bf16.msra.mxu0 %v15209_v22 }
 0x355   : > { %13111 = vmatprep.subr.bf16.mxu0 %v17929_v2 }
 0x358   : > { %13113 = vmatpush3.bf16.msra.mxu0 %v15219_v27 }
 0x359   : > { %13114 = vmatprep.subr.bf16.mxu0 %v17929_v2 }
 0x35c   : > { %13116 = vmatpush3.bf16.msra.mxu0 %v15229_v32 }
 0x35d   : > { %13279 = vmatprep.subr.bf16.mxu0 %v17929_v2 }
 0x35f   : > { %12045 = vmatmul.mubr.f32.vlgmr.msra.gmra.mrb[4].mxu0 %v15367_v7  ;;  %v2152_v7 = vand.u32 4294901760, %v2151_v6 }
 0x360   : > { %12303 = vmatprep.mubr.msk.f32.mxu0 %vm14735_vm0, %v15003_v59  ;;  %13281 = vmatpush3.bf16.msra.mxu0 %v15560_v21 }
 0x361   : > { %13282 = vmatprep.subr.bf16.mxu0 %v17929_v2  ;;  %v15566_v19 = vpack.c.bf16 %v2152_v7, %v2145_v5 }
 0x432   : > { %v2052_v8 = vpop.f32.mrb[4].mxu0 }
 0x433   : > { %v2056_v12 = vmul.f32 0.015625, %v2052_v8  ;;  %v12046_v9 = vpop.f32.mrb[5].mxu0 }
 0x435   : > { %v2061_v13 = vsel %vm2059_vm2, %v2056_v12, 0 }
 0x436   : > { %v2130_v3 = vand.u32 4294901760, %v2061_v13 }
 0x438   : > { %v2131_v0 = vsub.f32 %v2061_v13, %v2130_v3 }
 0x43a   : > { %v2132_v4 = vand.u32 4294901760, %v2131_v0 }
 0x43c   : > { %v2133_v33 = vsub.f32 %v2131_v0, %v2132_v4 }
 0x43e   : > { %v2134_v34 = vand.u32 4294901760, %v2133_v33  ;;  %v14555_v33 = vld [vmem:[%s17905_s3 + $0x20] sm:$0xff]  }
 0x440   : > { %12052 = vmatmul.mubr.f32.vlgmr.msra.gmra.mrb[4].mxu1 %v2134_v34  ;;  %v14556_v34 = vld [vmem:[%s17905_s3 + $0x28] sm:$0xff]  }
 0x441   : > { %13122 = vmatpush3.bf16.msra.mxu1 %v15566_v19  ;;  %12058 = vmatprep.mubr.msk.f32.mxu1 %vm14735_vm0, %v15003_v59 }
 0x442   : > { %13123 = vmatprep.subr.bf16.mxu1 %v17929_v2 }
 0x448   : > { %12059 = vmatmul.mubr.f32.vlgmr.msra.gmra.mrb[4].mxu1 %v2130_v3 }
 0x449   : > { %13125 = vmatpush3.bf16.msra.mxu1 %v15568_v40  ;;  %12065 = vmatprep.mubr.msk.f32.mxu1 %vm14735_vm0, %v15003_v59 }
 0x44a   : > { %13126 = vmatprep.subr.bf16.mxu1 %v17929_v2 }
 0x450   : > { %12066 = vmatmul.mubr.f32.vlgmr.msra.gmra.mrb[4].mxu1 %v2131_v0  ;;  %v14553_v0 = vld [vmem:[%s17905_s3 + $0x10] sm:$0xff]  }
 0x451   : > { %13128 = vmatpush3.bf16.msra.mxu1 %v15560_v21  ;;  %12072 = vmatprep.mubr.msk.f32.mxu1 %vm14735_vm0, %v15003_v59 }
 0x452   : > { %13129 = vmatprep.subr.bf16.mxu1 %v17929_v2 }
 0x458   : > { %12073 = vmatmul.mubr.f32.vlgmr.msra.gmra.mrb[4].mxu1 %v2132_v4  ;;  %v14554_v4 = vld [vmem:[%s17905_s3 + $0x18] sm:$0xff]  }
 0x459   : > { %13131 = vmatpush3.bf16.msra.mxu1 %v15570_v28  ;;  %12079 = vmatprep.mubr.msk.f32.mxu1 %vm14735_vm0, %v15003_v59 }
 0x45a   : > { %13132 = vmatprep.subr.bf16.mxu1 %v17929_v2 }
 0x460   : > { %12080 = vmatmul.mubr.f32.vlgmr.msra.gmra.mrb[4].mxu1 %v2130_v3 }
 0x461   : > { %13134 = vmatpush3.bf16.msra.mxu1 %v15560_v21  ;;  %12086 = vmatprep.mubr.msk.f32.mxu1 %vm14735_vm0, %v15003_v59 }
 0x462   : > { %13135 = vmatprep.subr.bf16.mxu1 %v17929_v2 }
 0x468   : > { %12087 = vmatmul.mubr.f32.vlgmr.msra.gmra.mrb[4].mxu1 %v2130_v3  ;;  %v14552_v3 = vld [vmem:[%s17905_s3 + $0x8] sm:$0xff]  }
 0x469   : > { %13137 = vmatpush3.bf16.msra.mxu1 %v15057_v10  ;;  %12121 = vmatprep.mubr.msk.f32.mxu1 %vm14735_vm0, %v15003_v59 }
 0x46a   : > { %13138 = vmatprep.subr.bf16.mxu1 %v17929_v2 }
 0x46d   : > { %13140 = vmatpush3.bf16.msra.mxu1 %v15064_v11 }
 0x46e   : > { %13141 = vmatprep.subr.bf16.mxu1 %v17929_v2 }
 0x471   : > { %13143 = vmatpush3.bf16.msra.mxu1 %v15074_v14 }
 0x472   : > { %13144 = vmatprep.subr.bf16.mxu1 %v17929_v2 }
 0x475   : > { %13146 = vmatpush3.bf16.msra.mxu1 %v15189_v60 }
 0x476   : > { %13147 = vmatprep.subr.bf16.mxu1 %v17929_v2 }
 0x479   : > { %13149 = vmatpush3.bf16.msra.mxu1 %v15199_v17 }
 0x47a   : > { %13150 = vmatprep.subr.bf16.mxu1 %v17929_v2 }
 0x47d   : > { %13152 = vmatpush3.bf16.msra.mxu1 %v15209_v22 }
 0x47e   : > { %13153 = vmatprep.subr.bf16.mxu1 %v17929_v2 }
 0x481   : > { %13155 = vmatpush3.bf16.msra.mxu1 %v15219_v27 }
 0x482   : > { %13156 = vmatprep.subr.bf16.mxu1 %v17929_v2 }
 0x485   : > { %13158 = vmatpush3.bf16.msra.mxu1 %v15229_v32 }
 0x486   : > { %13159 = vmatprep.subr.bf16.mxu1 %v17929_v2 }
 0x53b   : > { %v2518_v43 = vpop.f32.mrb[4].mxu1 }
 0x53c   : > { %v2525_v48 = vrot.slane %v2518_v43, %v15611_v42  ;;  %v12088_v57 = vpop.f32.mrb[5].mxu1 }
 0x53e   : > { %v15615_v58 = vsub.f32 %v15323_v55, %v2525_v48  ;;  %v15775_v55 = vld [vmem:[%s17910_s8] sm:$0xff] }
 0x53f   : > { %v14559_v48 = vld [vmem:[%s17905_s3 + $0x80] sm:$0xff]  }
 0x540   : > { %v2527_v20 = vmul.f32 %v15615_v58, %v15615_v58 }
 0x542   : > { %v2528_v31 = vrot.slane %v2527_v20, 4 }
 0x544   : > { %v2529_v56 = vadd.f32 %v2528_v31, %v2527_v20  ;;  %v14561_v20 = vld [vmem:[%s17905_s3 + $0x90] sm:$0xff]   ;;  %v14562_v31 = vld [vmem:[%s17905_s3 + $0x98] sm:$0xff]  }
 0x546   : > { %v2530_v63 = vrot.slane %v2529_v56, 2 }
 0x548   : > { %v2531_v62 = vadd.f32 %v2530_v63, %v2529_v56  ;;  %v14563_v56 = vld [vmem:[%s17905_s3 + $0xa0] sm:$0xff]   ;;  %v14564_v63 = vld [vmem:[%s17905_s3 + $0xa8] sm:$0xff]  }
 0x54a   : > { %v2532_v1 = vrot.slane %v2531_v62, 1 }
 0x54c   : > { %v2533_v6 = vadd.f32 %v2532_v1, %v2531_v62  ;;  %v14565_v62 = vld [vmem:[%s17905_s3 + $0xb0] sm:$0xff]   ;;  %v14566_v1 = vld [vmem:[%s17905_s3 + $0xb8] sm:$0xff]  }
 0x54e   : > { %v15619_v5 = vand.u32 4294901760, %v2533_v6 }
 0x550   : > { %v2616_v7 = vsub.f32 %v2533_v6, %v15619_v5 }
 0x552   : > { %v2617_v8 = vand.u32 4294901760, %v2616_v7 }
 0x554   : > { %v2618_v12 = vsub.f32 %v2616_v7, %v2617_v8 }
 0x556   : > { %v2619_v9 = vand.u32 4294901760, %v2618_v12  ;;  %v14569_v12 = vld [vmem:[%s17905_s3 + $0xd0] sm:$0xff]  }
 0x558   : > { %12122 = vmatmul.mubr.f32.vlgmr.msra.gmra.mrb[6].mxu1 %v2619_v9  ;;  %v14570_v9 = vld [vmem:[%s17905_s3 + $0xd8] sm:$0xff]  }
 0x559   : > { %13161 = vmatpush3.bf16.msra.mxu1 %v15384_v61  ;;  %12156 = vmatprep.mubr.msk.f32.mxu1 %vm14735_vm0, %v15003_v59  ;;  %v15780_v61 = vld [vmem:[%s17910_s8 + $0x8] sm:$0xff] }
 0x55a   : > { %13162 = vmatprep.subr.bf16.mxu1 %v17929_v2 }
 0x55d   : > { %13164 = vmatpush3.bf16.msra.mxu1 %v15393_v15 }
 0x55e   : > { %13165 = vmatprep.subr.bf16.mxu1 %v17929_v2 }
 0x561   : > { %13167 = vmatpush3.bf16.msra.mxu1 %v15399_v23  ;;  %v15785_v23 = vld [vmem:[%s17910_s8 + $0x10] sm:$0xff] }
 0x562   : > { %13168 = vmatprep.subr.bf16.mxu1 %v17929_v2 }
 0x565   : > { %13170 = vmatpush3.bf16.msra.mxu1 %v15261_v49 }
 0x566   : > { %13171 = vmatprep.subr.bf16.mxu1 %v17929_v2 }
 0x569   : > { %13173 = vmatpush3.bf16.msra.mxu1 %v15265_v54 }
 0x56a   : > { %13174 = vmatprep.subr.bf16.mxu1 %v17929_v2 }
 0x56d   : > { %13176 = vmatpush3.bf16.msra.mxu1 %v15279_v18  ;;  %v14543_v18 = vld [vmem:[%s17905_s3 + $0x40] sm:$0xff]  }
 0x56e   : > { %13177 = vmatprep.subr.bf16.mxu1 %v17929_v2 }
 0x571   : > { %13179 = vmatpush3.bf16.msra.mxu1 %v15299_v29  ;;  %v14544_v29 = vld [vmem:[%s17905_s3 + $0x48] sm:$0xff]  }
 0x572   : > { %13180 = vmatprep.subr.bf16.mxu1 %v17929_v2 }
 0x575   : > { %13182 = vmatpush3.bf16.msra.mxu1 %v15301_v41  ;;  %v14545_v41 = vld [vmem:[%s17905_s3 + $0x50] sm:$0xff]  }
 0x576   : > { %13183 = vmatprep.subr.bf16.mxu1 %v17929_v2 }
 0x578   : > { %12157 = vmatmul.mubr.f32.vlgmr.msra.gmra.mrb[6].mxu1 %v15619_v5 }
 0x579   : > { %13185 = vmatpush3.bf16.msra.mxu1 %v15415_v52  ;;  %12191 = vmatprep.mubr.msk.f32.mxu1 %vm14735_vm0, %v15003_v59  ;;  %v4110_v52 = vand.u32 4294901760, %v15775_v55 }
 0x57a   : > { %13186 = vmatprep.subr.bf16.mxu1 %v17929_v2 }
 0x57d   : > { %13188 = vmatpush3.bf16.msra.mxu1 %v15422_v53  ;;  %v4113_v53 = vand.u32 4294901760, %v15780_v61 }
 0x57e   : > { %13189 = vmatprep.subr.bf16.mxu1 %v17929_v2 }
 0x581   : > { %13191 = vmatpush3.bf16.msra.mxu1 %v15430_v16  ;;  %v15792_v16 = vld [vmem:[%s17910_s8 + $0x18] sm:$0xff] }
 0x582   : > { %13192 = vmatprep.subr.bf16.mxu1 %v17929_v2 }
 0x585   : > { %13194 = vmatpush3.bf16.msra.mxu1 %v15305_v44  ;;  %v14546_v44 = vld [vmem:[%s17905_s3 + $0x58] sm:$0xff]  }
 0x586   : > { %13195 = vmatprep.subr.bf16.mxu1 %v17929_v2 }
 0x589   : > { %13197 = vmatpush3.bf16.msra.mxu1 %v15309_v45  ;;  %v14547_v45 = vld [vmem:[%s17905_s3 + $0x60] sm:$0xff]  }
 0x58a   : > { %13198 = vmatprep.subr.bf16.mxu1 %v17929_v2 }
 0x58d   : > { %13200 = vmatpush3.bf16.msra.mxu1 %v15313_v46  ;;  %v14548_v46 = vld [vmem:[%s17905_s3 + $0x68] sm:$0xff]  }
 0x58e   : > { %13201 = vmatprep.subr.bf16.mxu1 %v17929_v2 }
 0x591   : > { %13203 = vmatpush3.bf16.msra.mxu1 %v15317_v50  ;;  %v14549_v50 = vld [vmem:[%s17905_s3 + $0x70] sm:$0xff]  }
 0x592   : > { %13204 = vmatprep.subr.bf16.mxu1 %v17929_v2 }
 0x595   : > { %13206 = vmatpush3.bf16.msra.mxu1 %v15321_v51  ;;  %v14550_v51 = vld [vmem:[%s17905_s3 + $0x78] sm:$0xff]  }
 0x596   : > { %13207 = vmatprep.subr.bf16.mxu1 %v17929_v2 }
 0x598   : > { %12192 = vmatmul.mubr.f32.vlgmr.msra.gmra.mrb[6].mxu1 %v2616_v7 }
 0x599   : > { %13209 = vmatpush3.bf16.msra.mxu1 %v15057_v10  ;;  %12226 = vmatprep.mubr.msk.f32.mxu1 %vm14735_vm0, %v15003_v59 }
 0x59a   : > { %13210 = vmatprep.subr.bf16.mxu1 %v17929_v2 }
 0x59d   : > { %13212 = vmatpush3.bf16.msra.mxu1 %v15064_v11 }
 0x59e   : > { %13213 = vmatprep.subr.bf16.mxu1 %v17929_v2 }
 0x5a1   : > { %13215 = vmatpush3.bf16.msra.mxu1 %v15074_v14 }
 0x5a2   : > { %13216 = vmatprep.subr.bf16.mxu1 %v17929_v2 }
 0x5a5   : > { %13218 = vmatpush3.bf16.msra.mxu1 %v15189_v60 }
 0x5a6   : > { %13219 = vmatprep.subr.bf16.mxu1 %v17929_v2 }
 0x5a9   : > { %13221 = vmatpush3.bf16.msra.mxu1 %v15199_v17 }
 0x5aa   : > { %13222 = vmatprep.subr.bf16.mxu1 %v17929_v2 }
 0x5ad   : > { %13224 = vmatpush3.bf16.msra.mxu1 %v15209_v22 }
 0x5ae   : > { %13225 = vmatprep.subr.bf16.mxu1 %v17929_v2 }
 0x5b1   : > { %13227 = vmatpush3.bf16.msra.mxu1 %v15219_v27 }
 0x5b2   : > { %13228 = vmatprep.subr.bf16.mxu1 %v17929_v2 }
 0x5b5   : > { %13230 = vmatpush3.bf16.msra.mxu1 %v15229_v32 }
 0x5b6   : > { %13231 = vmatprep.subr.bf16.mxu1 %v17929_v2 }
 0x5b8   : > { %12227 = vmatmul.mubr.f32.vlgmr.msra.gmra.mrb[6].mxu1 %v2617_v8  ;;  %v14568_v8 = vld [vmem:[%s17905_s3 + $0xc8] sm:$0xff]  }
 0x5b9   : > { %13233 = vmatpush3.bf16.msra.mxu1 %v15467_v25  ;;  %12261 = vmatprep.mubr.msk.f32.mxu1 %vm14735_vm0, %v15003_v59  ;;  %v4116_v25 = vand.u32 4294901760, %v15785_v23 }
 0x5ba   : > { %13234 = vmatprep.subr.bf16.mxu1 %v17929_v2 }
 0x5bd   : > { %13236 = vmatpush3.bf16.msra.mxu1 %v15477_v26  ;;  %v4119_v26 = vand.u32 4294901760, %v15792_v16 }
 0x5be   : > { %13237 = vmatprep.subr.bf16.mxu1 %v17929_v2 }
 0x5c1   : > { %13239 = vmatpush3.bf16.msra.mxu1 %v15487_v24  ;;  %v15800_v24 = vpack.c.bf16 %v4113_v53, %v4110_v52 }
 0x5c2   : > { %13240 = vmatprep.subr.bf16.mxu1 %v17929_v2 }
 0x5c5   : > { %13242 = vmatpush3.bf16.msra.mxu1 %v15495_v37  ;;  %v15807_v37 = vpack.c.bf16 %v4119_v26, %v4116_v25 }
 0x5c6   : > { %13243 = vmatprep.subr.bf16.mxu1 %v17929_v2 }
 0x5c9   : > { %13245 = vmatpush3.bf16.msra.mxu1 %v15503_v30 }
 0x5ca   : > { %13246 = vmatprep.subr.bf16.mxu1 %v17929_v2 }
 0x5cd   : > { %13248 = vmatpush3.bf16.msra.mxu1 %v15511_v35 }
 0x5ce   : > { %13249 = vmatprep.subr.bf16.mxu1 %v17929_v2 }
 0x5d1   : > { %13251 = vmatpush3.bf16.msra.mxu1 %v15519_v39 }
 0x5d2   : > { %13252 = vmatprep.subr.bf16.mxu1 %v17929_v2 }
 0x5d5   : > { %13254 = vmatpush3.bf16.msra.mxu1 %v15527_v47 }
 0x5d6   : > { %13255 = vmatprep.subr.bf16.mxu1 %v17929_v2 }
 0x5d8   : > { %12262 = vmatmul.mubr.f32.vlgmr.msra.gmra.mrb[6].mxu1 %v15619_v5 }
 0x5d9   : > { %13257 = vmatpush3.bf16.msra.mxu1 %v15057_v10  ;;  %12296 = vmatprep.mubr.msk.f32.mxu1 %vm14735_vm0, %v15003_v59 }
 0x5da   : > { %13258 = vmatprep.subr.bf16.mxu1 %v17929_v2 }
 0x5dd   : > { %13260 = vmatpush3.bf16.msra.mxu1 %v15064_v11 }
 0x5de   : > { %13261 = vmatprep.subr.bf16.mxu1 %v17929_v2 }
 0x5e1   : > { %13263 = vmatpush3.bf16.msra.mxu1 %v15074_v14 }
 0x5e2   : > { %13264 = vmatprep.subr.bf16.mxu1 %v17929_v2 }
 0x5e5   : > { %13266 = vmatpush3.bf16.msra.mxu1 %v15189_v60 }
 0x5e6   : > { %13267 = vmatprep.subr.bf16.mxu1 %v17929_v2 }
 0x5e9   : > { %13269 = vmatpush3.bf16.msra.mxu1 %v15199_v17 }
 0x5ea   : > { %13270 = vmatprep.subr.bf16.mxu1 %v17929_v2 }
 0x5ed   : > { %13272 = vmatpush3.bf16.msra.mxu1 %v15209_v22 }
 0x5ee   : > { %13273 = vmatprep.subr.bf16.mxu1 %v17929_v2 }
 0x5f1   : > { %13275 = vmatpush3.bf16.msra.mxu1 %v15219_v27 }
 0x5f2   : > { %13276 = vmatprep.subr.bf16.mxu1 %v17929_v2 }
 0x5f5   : > { %13278 = vmatpush3.bf16.msra.mxu1 %v15229_v32 }
 0x5f6   : > { %13297 = vmatprep.subr.bf16.mxu1 %v17929_v2 }
 0x5f8   : > { %12297 = vmatmul.mubr.f32.vlgmr.msra.gmra.mrb[6].mxu1 %v15619_v5  ;;  %v14567_v5 = vld [vmem:[%s17905_s3 + $0xc0] sm:$0xff]  }
 0x5f9   : > { %12453 = vmatprep.mubr.msk.f32.mxu1 %vm14735_vm0, %v15003_v59  ;;  %13299 = vmatpush3.bf16.msra.mxu1 %v15800_v24 }
 0x5fa   : > { %13300 = vmatprep.subr.bf16.mxu1 %v17929_v2 }
 0x5fd   : > { %13302 = vmatpush3.bf16.msra.mxu1 %v15807_v37 }
 0x5fe   : > { %13303 = vmatprep.subr.bf16.mxu1 %v17929_v2 }
 0x6cb   : > { %v3171_v10 = vpop.f32.mrb[6].mxu1 }
 0x6cc   : > { %v3175_v11 = vmul.f32 0.015625, %v3171_v10  ;;  %v12298_v14 = vpop.f32.mrb[7].mxu1  ;;  %v14571_v10 = vld [vmem:[%s17905_s3 + $0xe0] sm:$0xff]  }
 0x6cd   : > { %v14573_v14 = vld [vmem:[%s17905_s3 + $0xf0] sm:$0xff]  }
 0x6ce   : > { %v3176_v60 = vadd.f32 1e-05, %v3175_v11  ;;  %v14572_v11 = vld [vmem:[%s17905_s3 + $0xe8] sm:$0xff]  }
 0x6d0   : > { %14719 = vrsqrt.f32 %v3176_v60  ;;  %v14574_v60 = vld [vmem:[%s17905_s3 + $0xf8] sm:$0xff]  }
 0x6da   : > { %v14720_v17 = vpop.eup %14719 }
 0x6db   : > { %v3179_v22 = vsel %vm2059_vm2, %v14720_v17, 0 }
 0x6dc   : > { %v3248_v27 = vand.u32 4294901760, %v3179_v22 }
 0x6de   : > { %v3249_v49 = vsub.f32 %v3179_v22, %v3248_v27 }
 0x6e0   : > { %v3250_v54 = vand.u32 4294901760, %v3249_v49 }
 0x6e2   : > { %v3251_v15 = vsub.f32 %v3249_v49, %v3250_v54 }
 0x6e4   : > { %v3252_v32 = vand.u32 4294901760, %v3251_v15 }
 0x6e6   : > { %12304 = vmatmul.mubr.f32.vlgmr.msra.gmra.mrb[6].mxu0 %v3252_v32 }
 0x6e7   : > { %13284 = vmatpush3.bf16.msra.mxu0 %v15566_v19  ;;  %12310 = vmatprep.mubr.msk.f32.mxu0 %vm14735_vm0, %v15003_v59 }
 0x6e8   : > { %13285 = vmatprep.subr.bf16.mxu0 %v17929_v2 }
 0x6ee   : > { %12311 = vmatmul.mubr.f32.vlgmr.msra.gmra.mrb[6].mxu0 %v3248_v27 }
 0x6ef   : > { %13287 = vmatpush3.bf16.msra.mxu0 %v15568_v40  ;;  %12317 = vmatprep.mubr.msk.f32.mxu0 %vm14735_vm0, %v15003_v59 }
 0x6f0   : > { %13288 = vmatprep.subr.bf16.mxu0 %v17929_v2 }
 0x6f6   : > { %12318 = vmatmul.mubr.f32.vlgmr.msra.gmra.mrb[6].mxu0 %v3249_v49  ;;  %v4098_v49 = vld [vmem:[%s17910_s8 + $0x28] sm:$0xff] }
 0x6f7   : > { %13290 = vmatpush3.bf16.msra.mxu0 %v15560_v21  ;;  %12324 = vmatprep.mubr.msk.f32.mxu0 %vm14735_vm0, %v15003_v59  ;;  %v4125_v15 = vand.u32 4294901760, %v4098_v49 }
 0x6f8   : > { %13291 = vmatprep.subr.bf16.mxu0 %v17929_v2 }
 0x6fe   : > { %12325 = vmatmul.mubr.f32.vlgmr.msra.gmra.mrb[6].mxu0 %v3250_v54 }
 0x6ff   : > { %13293 = vmatpush3.bf16.msra.mxu0 %v15570_v28  ;;  %12331 = vmatprep.mubr.msk.f32.mxu0 %vm14735_vm0, %v15003_v59  ;;  %v14551_v28 = vld [vmem:[%s17905_s3] sm:$0xff]  }
 0x700   : > { %13294 = vmatprep.subr.bf16.mxu0 %v17929_v2 }
 0x706   : > { %12332 = vmatmul.mubr.f32.vlgmr.msra.gmra.mrb[6].mxu0 %v3248_v27 }
 0x707   : > { %13296 = vmatpush3.bf16.msra.mxu0 %v15560_v21  ;;  %12338 = vmatprep.mubr.msk.f32.mxu0 %vm14735_vm0, %v15003_v59 }
 0x708   : > { %12341 = vmatprep.subr.bf16.mxu0 %v15003_v59 }
 0x70e   : > { %12339 = vmatmul.mubr.f32.vlgmr.msra.gmra.mrb[6].mxu0 %v3248_v27  ;;  %v4097_v27 = vld [vmem:[%s17910_s8 + $0x20] sm:$0xff] }
 0x70f   : > { %12342 = vmatpush3.bf16.msra.mxu0 %v14543_v18  ;;  %12357 = vmatprep.mubr.msk.bf16.mxu0 %vm14735_vm0, %v15003_v59  ;;  %v4122_v54 = vand.u32 4294901760, %v4097_v27  ;;  %v4099_v18 = vld [vmem:[%s17910_s8 + $0x30] sm:$0xff] }
 0x710   : > { %12343 = vmatprep.subr.bf16.mxu0 %v15003_v59 }
 0x711   : > { %v15924_v32 = vpack.c.bf16 %v4125_v15, %v4122_v54 }
 0x713   : > { %12344 = vmatpush3.bf16.msra.mxu0 %v14544_v29  ;;  %v4100_v29 = vld [vmem:[%s17910_s8 + $0x38] sm:$0xff]  ;;  %13305 = vmatpush3.bf16.msra.mxu1 %v15924_v32 }
 0x714   : > { %12345 = vmatprep.subr.bf16.mxu0 %v15003_v59  ;;  %13306 = vmatprep.subr.bf16.mxu1 %v17929_v2 }
 0x717   : > { %12346 = vmatpush3.bf16.msra.mxu0 %v14545_v41  ;;  %v4128_v41 = vand.u32 4294901760, %v4099_v18 }
 0x718   : > { %12347 = vmatprep.subr.bf16.mxu0 %v15003_v59 }
 0x71b   : > { %12348 = vmatpush3.bf16.msra.mxu0 %v14546_v44  ;;  %v4131_v44 = vand.u32 4294901760, %v4100_v29 }
 0x71c   : > { %12349 = vmatprep.subr.bf16.mxu0 %v15003_v59 }
 0x71f   : > { %12350 = vmatpush3.bf16.msra.mxu0 %v14547_v45  ;;  %v15934_v45 = vpack.c.bf16 %v4131_v44, %v4128_v41 }
 0x720   : > { %12351 = vmatprep.subr.bf16.mxu0 %v15003_v59 }
 0x721   : > { %13308 = vmatpush3.bf16.msra.mxu1 %v15934_v45 }
 0x722   : > { %13309 = vmatprep.subr.bf16.mxu1 %v17929_v2 }
 0x723   : > { %12352 = vmatpush3.bf16.msra.mxu0 %v14548_v46  ;;  %v4101_v46 = vld [vmem:[%s17910_s8 + $0x40] sm:$0xff] }
 0x724   : > { %12353 = vmatprep.subr.bf16.mxu0 %v15003_v59 }
 0x727   : > { %12354 = vmatpush3.bf16.msra.mxu0 %v14549_v50  ;;  %v4102_v50 = vld [vmem:[%s17910_s8 + $0x48] sm:$0xff] }
 0x728   : > { %12355 = vmatprep.subr.bf16.mxu0 %v15003_v59 }
 0x72b   : > { %12356 = vmatpush3.bf16.msra.mxu0 %v14550_v51  ;;  %v4134_v51 = vand.u32 4294901760, %v4101_v46 }
 0x72c   : > { %12361 = vmatprep.subr.bf16.mxu0 %v15003_v59 }
 0x7e1   : > { %v3636_v30 = vpop.f32.mrb[6].mxu0 }
 0x7e2   : > { %v3643_v35 = vrot.slane %v3636_v30, %v15611_v42  ;;  %v12340_v39 = vpop.f32.mrb[7].mxu0  ;;  %v4137_v30 = vand.u32 4294901760, %v4102_v50 }
 0x7e3   : > { %v4103_v39 = vld [vmem:[%s17910_s8 + $0x50] sm:$0xff] }
 0x7e4   : > { %v3644_v47 = vmul.f32 %v3643_v35, %v15615_v58  ;;  %v14560_v58 = vld [vmem:[%s17905_s3 + $0x88] sm:$0xff]   ;;  %v15944_v35 = vpack.c.bf16 %v4137_v30, %v4134_v51 }
 0x7e6   : > { %v3645_v21 = vmul.f32 0.2, %v3644_v47  ;;  %13311 = vmatpush3.bf16.msra.mxu1 %v15944_v35 }
 0x7e7   : > { %13312 = vmatprep.subr.bf16.mxu1 %v17929_v2 }
 0x7e8   : > { %v3646_v19 = vmax.f32 %v3644_v47, %v3645_v21  ;;  %v4104_v47 = vld [vmem:[%s17910_s8 + $0x58] sm:$0xff]  ;;  %v4140_v21 = vand.u32 4294901760, %v4103_v39 }
 0x7ea   : > { %3648 = vst [vmem:[#allocation3 + $0x8] ss:$-6 sps:$4 sm:$0x21] %v3646_v19   ;;  %3649 = vst [vmem:[#allocation3] ss:$10 sps:$4 sm:$0x12] %v3646_v19  }
 0x7eb   : > { %3650 = vst [vmem:[#allocation3 + $0x7] ss:$-6 sps:$4 sm:$0x84] %v3646_v19   ;;  %3651 = vst [vmem:[#allocation3 - $0x1] ss:$10 sps:$4 sm:$0x48] %v3646_v19  }
 0x7ec   : > { %v4143_v19 = vand.u32 4294901760, %v4104_v47 }
 0x7f2   : > { %v3674_v40 = vld [vmem:[#allocation3 + $0x8] sm:$0xf]  ;;  %v3656_v43 = vld [vmem:[#allocation3] sm:$0xf] }
 0x7f3   : > { %v3675_v13 = vpack.c.bf16 %v3674_v40, %v3674_v40  ;;  %v3657_v57 = vpack.c.bf16 %v3656_v43, %v3656_v43  ;;  %v3869_v6 = vld [vmem:[#allocation3 + $0x1] sm:$0xf]  ;;  %v3977_v17 = vld [vmem:[#allocation3 + $0x9] sm:$0xf]  ;;  %v15954_v40 = vpack.c.bf16 %v4143_v19, %v4140_v21 }
 0x7f4   : > { %v3870_v7 = vpack.c.bf16 %v3869_v6, %v3869_v6  ;;  %v3978_v22 = vpack.c.bf16 %v3977_v17, %v3977_v17 }
 0x7f5   : > { %12358 = vmatmul.mubr.bf16.vlgmr.msra.gmra.mrb[8].mxu0 %v3675_v13  ;;  %v4106_v13 = vld [vmem:[%s17910_s8 + $0x68] sm:$0xff]  ;;  %13314 = vmatpush3.bf16.msra.mxu1 %v15954_v40 }
 0x7f6   : > { %12362 = vmatpush3.bf16.msra.mxu0 %v14551_v28  ;;  %12377 = vmatprep.mubr.msk.bf16.mxu0 %vm14735_vm0, %v15003_v59  ;;  %v4105_v28 = vld [vmem:[%s17910_s8 + $0x60] sm:$0xff] }
 0x7f7   : > { %12363 = vmatprep.subr.bf16.mxu0 %v15003_v59  ;;  %13315 = vmatprep.subr.bf16.mxu1 %v17929_v2 }
 0x7fa   : > { %12364 = vmatpush3.bf16.msra.mxu0 %v14552_v3  ;;  %v4146_v3 = vand.u32 4294901760, %v4105_v28 }
 0x7fb   : > { %12365 = vmatprep.subr.bf16.mxu0 %v15003_v59 }
 0x7fe   : > { %12366 = vmatpush3.bf16.msra.mxu0 %v14553_v0  ;;  %v4149_v0 = vand.u32 4294901760, %v4106_v13 }
 0x7ff   : > { %12367 = vmatprep.subr.bf16.mxu0 %v15003_v59 }
 0x802   : > { %12368 = vmatpush3.bf16.msra.mxu0 %v14554_v4  ;;  %v15964_v4 = vpack.c.bf16 %v4149_v0, %v4146_v3 }
 0x803   : > { %12369 = vmatprep.subr.bf16.mxu0 %v15003_v59 }
 0x804   : > { %13317 = vmatpush3.bf16.msra.mxu1 %v15964_v4 }
 0x805   : > { %13318 = vmatprep.subr.bf16.mxu1 %v17929_v2 }
 0x806   : > { %12370 = vmatpush3.bf16.msra.mxu0 %v14555_v33  ;;  %v4107_v33 = vld [vmem:[%s17910_s8 + $0x70] sm:$0xff] }
 0x807   : > { %12371 = vmatprep.subr.bf16.mxu0 %v15003_v59 }
 0x80a   : > { %12372 = vmatpush3.bf16.msra.mxu0 %v14556_v34  ;;  %v4108_v34 = vld [vmem:[%s17910_s8 + $0x78] sm:$0xff] }
 0x80b   : > { %12373 = vmatprep.subr.bf16.mxu0 %v15003_v59 }
 0x80e   : > { %12374 = vmatpush3.bf16.msra.mxu0 %v14557_v36  ;;  %v4152_v36 = vand.u32 4294901760, %v4107_v33 }
 0x80f   : > { %12375 = vmatprep.subr.bf16.mxu0 %v15003_v59 }
 0x812   : > { %12376 = vmatpush3.bf16.msra.mxu0 %v14558_v38  ;;  %v4155_v38 = vand.u32 4294901760, %v4108_v34 }
 0x813   : > { %12381 = vmatprep.subr.bf16.mxu0 %v15003_v59 }
 0x814   : > { %v15974_v43 = vpack.c.bf16 %v4155_v38, %v4152_v36 }
 0x815   : > { %12378 = vmatmul.mubr.bf16.vlgmr.msra.gmra.mrb[8].mxu0 %v3657_v57  ;;  %v15980_v57 = vsub.f32 %v4098_v49, %v4125_v15  ;;  %v16018_v15 = vsub.f32 %v4104_v47, %v4143_v19  ;;  %v16034_v47 = vsub.f32 %v4106_v13, %v4149_v0 }
 0x816   : > { %12382 = vmatpush3.bf16.msra.mxu0 %v14559_v48  ;;  %12397 = vmatprep.mubr.msk.bf16.mxu0 %vm14735_vm0, %v15003_v59  ;;  %v15978_v48 = vsub.f32 %v4097_v27, %v4122_v54  ;;  %v16016_v54 = vsub.f32 %v4103_v39, %v4140_v21  ;;  %v16032_v39 = vsub.f32 %v4105_v28, %v4146_v3 }
 0x817   : > { %12383 = vmatprep.subr.bf16.mxu0 %v15003_v59  ;;  %13320 = vmatpush3.bf16.msra.mxu1 %v15974_v43 }
 0x818   : > { %13321 = vmatprep.subr.bf16.mxu1 %v17929_v2 }
 0x81a   : > { %12384 = vmatpush3.bf16.msra.mxu0 %v14560_v58  ;;  %v4231_v58 = vand.u32 4294901760, %v15978_v48 }
 0x81b   : > { %12385 = vmatprep.subr.bf16.mxu0 %v15003_v59 }
 0x81e   : > { %12386 = vmatpush3.bf16.msra.mxu0 %v14561_v20  ;;  %v4238_v20 = vand.u32 4294901760, %v15980_v57 }
 0x81f   : > { %12387 = vmatprep.subr.bf16.mxu0 %v15003_v59 }
 0x822   : > { %12388 = vmatpush3.bf16.msra.mxu0 %v14562_v31  ;;  %v4232_v31 = vsub.f32 %v15978_v48, %v4231_v58 }
 0x823   : > { %12389 = vmatprep.subr.bf16.mxu0 %v15003_v59 }
 0x826   : > { %12390 = vmatpush3.bf16.msra.mxu0 %v14563_v56  ;;  %v4239_v56 = vsub.f32 %v15980_v57, %v4238_v20 }
 0x827   : > { %12391 = vmatprep.subr.bf16.mxu0 %v15003_v59 }
 0x828   : > { %v4240_v6 = vand.u32 4294901760, %v4239_v56  ;;  %v17924_v56 = vand.u32 4294901760, %v16034_v47 }
 0x82a   : > { %12392 = vmatpush3.bf16.msra.mxu0 %v14564_v63  ;;  %v15990_v63 = vsub.f32 %v4099_v18, %v4128_v41  ;;  %v4295_v28 = vsub.f32 %v16034_v47, %v17924_v56 }
 0x82b   : > { %12393 = vmatprep.subr.bf16.mxu0 %v15003_v59 }
 0x82e   : > { %12394 = vmatpush3.bf16.msra.mxu0 %v14565_v62  ;;  %v15992_v62 = vsub.f32 %v4100_v29, %v4131_v44  ;;  %v4273_v44 = vand.u32 4294901760, %v16016_v54 }
 0x82f   : > { %12395 = vmatprep.subr.bf16.mxu0 %v15003_v59 }
 0x832   : > { %12396 = vmatpush3.bf16.msra.mxu0 %v14566_v1  ;;  %v4233_v1 = vand.u32 4294901760, %v4232_v31  ;;  %v17925_v31 = vand.u32 4294901760, %v16032_v39 }
 0x833   : > { %12401 = vmatprep.subr.bf16.mxu0 %v15003_v59 }
 0x835   : > { %12398 = vmatmul.mubr.bf16.vlgmr.msra.gmra.mrb[8].mxu0 %v3870_v7  ;;  %v4252_v7 = vand.u32 4294901760, %v15992_v62 }
 0x836   : > { %12402 = vmatpush3.bf16.msra.mxu0 %v14567_v5  ;;  %12417 = vmatprep.mubr.msk.bf16.mxu0 %vm14735_vm0, %v15003_v59  ;;  %v4245_v5 = vand.u32 4294901760, %v15990_v63 }
 0x837   : > { %12403 = vmatprep.subr.bf16.mxu0 %v15003_v59 }
 0x83a   : > { %12404 = vmatpush3.bf16.msra.mxu0 %v14568_v8  ;;  %v15996_v8 = vpack.c.bf16 %v4240_v6, %v4233_v1  ;;  %v4288_v6 = vsub.f32 %v16032_v39, %v17925_v31 }
 0x83b   : > { %12405 = vmatprep.subr.bf16.mxu0 %v15003_v59 }
 0x83c   : > { %v4289_v13 = vand.u32 4294901760, %v4288_v6 }
 0x83e   : > { %12406 = vmatpush3.bf16.msra.mxu0 %v14569_v12  ;;  %v4246_v12 = vsub.f32 %v15990_v63, %v4245_v5 }
 0x83f   : > { %12407 = vmatprep.subr.bf16.mxu0 %v15003_v59 }
 0x842   : > { %12408 = vmatpush3.bf16.msra.mxu0 %v14570_v9  ;;  %v16001_v9 = vsub.f32 %v4101_v46, %v4134_v51  ;;  %v17926_v46 = vand.u32 4294901760, %v16018_v15  ;;  %v4274_v51 = vsub.f32 %v16016_v54, %v4273_v44 }
 0x843   : > { %12409 = vmatprep.subr.bf16.mxu0 %v15003_v59 }
 0x844   : > { %v4275_v21 = vand.u32 4294901760, %v4274_v51  ;;  %v16076_v51 = vpack.c.bf16 %v16018_v15, %v16016_v54 }
 0x846   : > { %12410 = vmatpush3.bf16.msra.mxu0 %v14571_v10  ;;  %v16003_v10 = vsub.f32 %v4102_v50, %v4137_v30  ;;  %v4281_v30 = vsub.f32 %v16018_v15, %v17926_v46 }
 0x847   : > { %12411 = vmatprep.subr.bf16.mxu0 %v15003_v59 }
 0x848   : > { %v4266_v17 = vand.u32 4294901760, %v16003_v10  ;;  %v4282_v19 = vand.u32 4294901760, %v4281_v30  ;;  %v16080_v30 = vpack.c.bf16 %v16034_v47, %v16032_v39 }
 0x84a   : > { %12412 = vmatpush3.bf16.msra.mxu0 %v14572_v11  ;;  %v4253_v11 = vsub.f32 %v15992_v62, %v4252_v7  ;;  %v4267_v49 = vsub.f32 %v16003_v10, %v4266_v17  ;;  %v16038_v1 = vpack.c.bf16 %v4282_v19, %v4275_v21 }
 0x84b   : > { %12413 = vmatprep.subr.bf16.mxu0 %v15003_v59 }
 0x84c   : > { %v4268_v41 = vand.u32 4294901760, %v4267_v49  ;;  %v16064_v49 = vpack.c.bf16 %v15980_v57, %v15978_v48  ;;  %v18007_v57 = vand.u32 4294901760, %v16018_v15 }
 0x84e   : > { %12414 = vmatpush3.bf16.msra.mxu0 %v14573_v14  ;;  %v4247_v14 = vand.u32 4294901760, %v4246_v12  ;;  %v16043_v12 = vsub.f32 %v4107_v33, %v4152_v36 }
 0x84f   : > { %12415 = vmatprep.subr.bf16.mxu0 %v15003_v59 }
 0x850   : > { %v17923_v3 = vand.u32 4294901760, %v16043_v12 }
 0x852   : > { %12416 = vmatpush3.bf16.msra.mxu0 %v14574_v60  ;;  %v4259_v60 = vand.u32 4294901760, %v16001_v9 }
 0x853   : > { %13441 = vmatprep.subr.bf16.mxu0 %v17929_v2 }
 0x854   : > { %v4260_v27 = vsub.f32 %v16001_v9, %v4259_v60  ;;  %v16242_v48 = vpack.c.bf16 %v4266_v17, %v4259_v60  ;;  %v4752_v60 = vld [vmem:[%s17911_s9 + $0x8] sm:$0xff] }
 0x855   : > { %12418 = vmatmul.mubr.bf16.vlgmr.msra.gmra.mrb[8].mxu0 %v3978_v22  ;;  %v4254_v22 = vand.u32 4294901760, %v4253_v11  ;;  %v16045_v11 = vsub.f32 %v4108_v34, %v4155_v38  ;;  %v4763_v54 = vand.u32 4294901760, %v4752_v60 }
 0x856   : > { %12639 = vmatprep.mubr.msk.f32.mxu0 %vm14735_vm0, %v15003_v59  ;;  %v4261_v29 = vand.u32 4294901760, %v4260_v27 }
 0x857   : > { %v16020_v18 = vpack.c.bf16 %v4254_v22, %v4247_v14  ;;  %v17922_v0 = vand.u32 4294901760, %v16045_v11  ;;  %v4296_v14 = vand.u32 4294901760, %v4295_v28  ;;  %v4302_v22 = vsub.f32 %v16043_v12, %v17923_v3 }
 0x858   : > { %v16024_v50 = vpack.c.bf16 %v4268_v41, %v4261_v29  ;;  %v16068_v29 = vpack.c.bf16 %v15992_v62, %v15990_v63  ;;  %v16072_v41 = vpack.c.bf16 %v16003_v10, %v16001_v9  ;;  %v16084_v21 = vpack.c.bf16 %v16045_v11, %v16043_v12  ;;  %v4751_v10 = vld [vmem:[%s17911_s9] sm:$0xff] }
 0x859   : > { %v4309_v33 = vsub.f32 %v16045_v11, %v17922_v0  ;;  %v16058_v34 = vpack.c.bf16 %v4296_v14, %v4289_v13  ;;  %v4303_v36 = vand.u32 4294901760, %v4302_v22  ;;  %v18009_v63 = vand.u32 4294901760, %v16034_v47  ;;  %v4753_v47 = vld [vmem:[%s17911_s9 + $0x10] sm:$0xff] }
 0x85a   : > { %v4760_v17 = vand.u32 4294901760, %v4751_v10 }
 0x85b   : > { %v4310_v38 = vand.u32 4294901760, %v4309_v33 }
 0x85c   : > { %v16299_v15 = vpack.c.bf16 %v4763_v54, %v4760_v17 }
 0x85d   : > { %v16060_v27 = vpack.c.bf16 %v4310_v38, %v4303_v36  ;;  %v16093_v36 = vsub.f32 %v15775_v55, %v4110_v52  ;;  %v16098_v38 = vsub.f32 %v15780_v61, %v4113_v53  ;;  %v16110_v55 = vsub.f32 %v15792_v16, %v4119_v26 }
 0x85e   : > { %13443 = vmatpush3.bf16.msra.mxu0 %v16299_v15 }
 0x85f   : > { %v4203_v56 = vand.u32 4294901760, %v16093_v36  ;;  %13444 = vmatprep.subr.bf16.mxu0 %v17929_v2 }
 0x861   : > { %v4204_v61 = vsub.f32 %v16093_v36, %v4203_v56 }
 0x863   : > { %v4205_v16 = vand.u32 4294901760, %v4204_v61 }
 0x928   : > { %v16086_v19 = vpop.f32.mrb[8].mxu0 }
 0x929   : > { %v4086_v6 = vsel %vm4085_vm3, %v16086_v19, 0.0  ;;  %v12419_v28 = vpop.f32.mrb[9].mxu0 }
 0x92a   : > { %v4087_v13 = vrot.slane %v4086_v6, 4  ;;  %v4081_v14 = vpop.f32.mrb[10].mxu0  ;;  %v4210_v28 = vand.u32 4294901760, %v16098_v38 }
 0x92b   : > { %v12420_v22 = vpop.f32.mrb[11].mxu0 }
 0x92c   : > { %v4088_v33 = vadd.f32 %v4087_v13, %v4086_v6  ;;  %v16105_v6 = vsub.f32 %v15785_v23, %v4116_v25  ;;  %v4211_v53 = vsub.f32 %v16098_v38, %v4210_v28  ;;  %v4224_v23 = vand.u32 4294901760, %v16110_v55 }
 0x92e   : > { %v4089_v0 = vrot.slane %v4088_v33, 2  ;;  %v4212_v26 = vand.u32 4294901760, %v4211_v53  ;;  %v4225_v22 = vsub.f32 %v16110_v55, %v4224_v23 }
 0x930   : > { %v4090_v3 = vadd.f32 %v4089_v0, %v4088_v33  ;;  %v4217_v0 = vand.u32 4294901760, %v16105_v6  ;;  %v16135_v31 = vpack.c.bf16 %v4212_v26, %v4205_v16  ;;  %v4226_v46 = vand.u32 4294901760, %v4225_v22 }
 0x931   : > { %v16165_v16 = vpack.c.bf16 %v16110_v55, %v16105_v6  ;;  %v16206_v26 = vpack.c.bf16 %v4210_v28, %v4203_v56  ;;  %v16226_v56 = vpack.c.bf16 %v4238_v20, %v4231_v58  ;;  %v16250_v58 = vpack.c.bf16 %v18007_v57, %v4273_v44 }
 0x932   : > { %v4091_v52 = vrot.slane %v4090_v3, 1  ;;  %v18008_v20 = vand.u32 4294901760, %v16032_v39  ;;  %v4840_v44 = vsub.f32 %v4751_v10, %v4760_v17  ;;  %v4847_v39 = vsub.f32 %v4752_v60, %v4763_v54 }
 0x934   : > { %v4092_v13 = vadd.f32 %v4091_v52, %v4090_v3  ;;  %v4218_v3 = vsub.f32 %v16105_v6, %v4217_v0  ;;  %v16258_v62 = vpack.c.bf16 %v18009_v63, %v18008_v20  ;;  %v4841_v28 = vand.u32 4294901760, %v4840_v44 }
 0x935   : > { %v4848_v6 = vand.u32 4294901760, %v4847_v39  ;;  %v16321_v10 = vpack.c.bf16 %v4847_v39, %v4840_v44 }
 0x936   : > { %v16120_v25 = vand.u32 4294901760, %v4092_v13 }
 0x937   : > { %v16325_v17 = vpack.c.bf16 %v4848_v6, %v4841_v28 }
 0x938   : > { %v16123_v14 = vsub.f32 %v4092_v13, %v16120_v25  ;;  %v4219_v13 = vand.u32 4294901760, %v4218_v3  ;;  %v16216_v3 = vpack.c.bf16 %v4224_v23, %v4217_v0  ;;  %v4842_v0 = vsub.f32 %v4840_v44, %v4841_v28 }
 0x939   : > { %v4849_v23 = vsub.f32 %v4847_v39, %v4848_v6 }
 0x93a   : > { %v4192_v33 = vand.u32 4294901760, %v16123_v14  ;;  %v16138_v53 = vpack.c.bf16 %v4226_v46, %v4219_v13  ;;  %v16158_v46 = vpack.c.bf16 %v16098_v38, %v16093_v36  ;;  %v16234_v36 = vpack.c.bf16 %v4252_v7, %v4245_v5 }
 0x93b   : > { %v18010_v5 = vand.u32 4294901760, %v16043_v12  ;;  %v18011_v7 = vand.u32 4294901760, %v16045_v11  ;;  %v4754_v12 = vld [vmem:[%s17911_s9 + $0x18] sm:$0xff]  ;;  %v4766_v11 = vand.u32 4294901760, %v4753_v47  ;;  %v4843_v22 = vand.u32 4294901760, %v4842_v0 }
 0x93c   : > { %v4193_v52 = vsub.f32 %v16123_v14, %v4192_v33  ;;  %v4769_v38 = vand.u32 4294901760, %v4754_v12 }
 0x93d   : > { %v16266_v9 = vpack.c.bf16 %v18011_v7, %v18010_v5 }
 0x93e   : > { %v4194_v61 = vand.u32 4294901760, %v4193_v52  ;;  %v16311_v55 = vpack.c.bf16 %v4769_v38, %v4766_v11 }
 0x940   : > { %12454 = vmatmul.mubr.f32.vlgmr.msra.gmra.mrb[8].mxu1 %v4194_v61  ;;  %13446 = vmatpush3.bf16.msra.mxu0 %v16311_v55 }
 0x941   : > { %13323 = vmatpush3.bf16.msra.mxu1 %v16135_v31  ;;  %12488 = vmatprep.mubr.msk.f32.mxu1 %vm14735_vm0, %v15003_v59 }
 0x942   : > { %13324 = vmatprep.subr.bf16.mxu1 %v17929_v2  ;;  %13447 = vmatprep.subr.bf16.mxu0 %v17929_v2 }
 0x945   : > { %13326 = vmatpush3.bf16.msra.mxu1 %v16138_v53 }
 0x946   : > { %13327 = vmatprep.subr.bf16.mxu1 %v17929_v2 }
 0x949   : > { %13329 = vmatpush3.bf16.msra.mxu1 %v15996_v8 }
 0x94a   : > { %13330 = vmatprep.subr.bf16.mxu1 %v17929_v2 }
 0x94d   : > { %13332 = vmatpush3.bf16.msra.mxu1 %v16020_v18 }
 0x94e   : > { %13333 = vmatprep.subr.bf16.mxu1 %v17929_v2 }
 0x951   : > { %13335 = vmatpush3.bf16.msra.mxu1 %v16024_v50 }
 0x952   : > { %13336 = vmatprep.subr.bf16.mxu1 %v17929_v2 }
 0x955   : > { %13338 = vmatpush3.bf16.msra.mxu1 %v16038_v1 }
 0x956   : > { %13339 = vmatprep.subr.bf16.mxu1 %v17929_v2 }
 0x959   : > { %13341 = vmatpush3.bf16.msra.mxu1 %v16058_v34 }
 0x95a   : > { %13342 = vmatprep.subr.bf16.mxu1 %v17929_v2 }
 0x95d   : > { %13344 = vmatpush3.bf16.msra.mxu1 %v16060_v27 }
 0x95e   : > { %13345 = vmatprep.subr.bf16.mxu1 %v17929_v2 }
 0x960   : > { %12489 = vmatmul.mubr.f32.vlgmr.msra.gmra.mrb[8].mxu1 %v16120_v25 }
 0x961   : > { %13347 = vmatpush3.bf16.msra.mxu1 %v16158_v46  ;;  %12523 = vmatprep.mubr.msk.f32.mxu1 %vm14735_vm0, %v15003_v59 }
 0x962   : > { %13348 = vmatprep.subr.bf16.mxu1 %v17929_v2 }
 0x965   : > { %13350 = vmatpush3.bf16.msra.mxu1 %v16165_v16 }
 0x966   : > { %13351 = vmatprep.subr.bf16.mxu1 %v17929_v2 }
 0x969   : > { %13353 = vmatpush3.bf16.msra.mxu1 %v16064_v49 }
 0x96a   : > { %13354 = vmatprep.subr.bf16.mxu1 %v17929_v2 }
 0x96d   : > { %13356 = vmatpush3.bf16.msra.mxu1 %v16068_v29 }
 0x96e   : > { %13357 = vmatprep.subr.bf16.mxu1 %v17929_v2 }
 0x971   : > { %13359 = vmatpush3.bf16.msra.mxu1 %v16072_v41 }
 0x972   : > { %13360 = vmatprep.subr.bf16.mxu1 %v17929_v2 }
 0x975   : > { %13362 = vmatpush3.bf16.msra.mxu1 %v16076_v51 }
 0x976   : > { %13363 = vmatprep.subr.bf16.mxu1 %v17929_v2 }
 0x979   : > { %13365 = vmatpush3.bf16.msra.mxu1 %v16080_v30 }
 0x97a   : > { %13366 = vmatprep.subr.bf16.mxu1 %v17929_v2 }
 0x97d   : > { %13368 = vmatpush3.bf16.msra.mxu1 %v16084_v21 }
 0x97e   : > { %13369 = vmatprep.subr.bf16.mxu1 %v17929_v2 }
 0x980   : > { %12524 = vmatmul.mubr.f32.vlgmr.msra.gmra.mrb[8].mxu1 %v16123_v14  ;;  %v4861_v14 = vsub.f32 %v4754_v12, %v4769_v38 }
 0x981   : > { %13371 = vmatpush3.bf16.msra.mxu1 %v15800_v24  ;;  %12558 = vmatprep.mubr.msk.f32.mxu1 %vm14735_vm0, %v15003_v59 }
 0x982   : > { %13372 = vmatprep.subr.bf16.mxu1 %v17929_v2  ;;  %v4862_v13 = vand.u32 4294901760, %v4861_v14 }
 0x984   : > { %v4863_v20 = vsub.f32 %v4861_v14, %v4862_v13 }
 0x985   : > { %13374 = vmatpush3.bf16.msra.mxu1 %v15807_v37 }
 0x986   : > { %13375 = vmatprep.subr.bf16.mxu1 %v17929_v2  ;;  %v4864_v5 = vand.u32 4294901760, %v4863_v20 }
 0x989   : > { %13377 = vmatpush3.bf16.msra.mxu1 %v15924_v32 }
 0x98a   : > { %13378 = vmatprep.subr.bf16.mxu1 %v17929_v2 }
 0x98d   : > { %13380 = vmatpush3.bf16.msra.mxu1 %v15934_v45 }
 0x98e   : > { %13381 = vmatprep.subr.bf16.mxu1 %v17929_v2 }
 0x991   : > { %13383 = vmatpush3.bf16.msra.mxu1 %v15944_v35 }
 0x992   : > { %13384 = vmatprep.subr.bf16.mxu1 %v17929_v2 }
 0x995   : > { %13386 = vmatpush3.bf16.msra.mxu1 %v15954_v40 }
 0x996   : > { %13387 = vmatprep.subr.bf16.mxu1 %v17929_v2 }
 0x999   : > { %13389 = vmatpush3.bf16.msra.mxu1 %v15964_v4 }
 0x99a   : > { %13390 = vmatprep.subr.bf16.mxu1 %v17929_v2 }
 0x99d   : > { %13392 = vmatpush3.bf16.msra.mxu1 %v15974_v43 }
 0x99e   : > { %13393 = vmatprep.subr.bf16.mxu1 %v17929_v2 }
 0x9a0   : > { %12559 = vmatmul.mubr.f32.vlgmr.msra.gmra.mrb[8].mxu1 %v4192_v33  ;;  %v4850_v33 = vand.u32 4294901760, %v4849_v23 }
 0x9a1   : > { %13395 = vmatpush3.bf16.msra.mxu1 %v16206_v26  ;;  %12593 = vmatprep.mubr.msk.f32.mxu1 %vm14735_vm0, %v15003_v59 }
 0x9a2   : > { %13396 = vmatprep.subr.bf16.mxu1 %v17929_v2  ;;  %v16317_v61 = vpack.c.bf16 %v4850_v33, %v4843_v22 }
 0x9a5   : > { %13398 = vmatpush3.bf16.msra.mxu1 %v16216_v3 }
 0x9a6   : > { %13399 = vmatprep.subr.bf16.mxu1 %v17929_v2 }
 0x9a9   : > { %13401 = vmatpush3.bf16.msra.mxu1 %v16226_v56 }
 0x9aa   : > { %13402 = vmatprep.subr.bf16.mxu1 %v17929_v2 }
 0x9ad   : > { %13404 = vmatpush3.bf16.msra.mxu1 %v16234_v36 }
 0x9ae   : > { %13405 = vmatprep.subr.bf16.mxu1 %v17929_v2 }
 0x9b1   : > { %13407 = vmatpush3.bf16.msra.mxu1 %v16242_v48 }
 0x9b2   : > { %13408 = vmatprep.subr.bf16.mxu1 %v17929_v2 }
 0x9b5   : > { %13410 = vmatpush3.bf16.msra.mxu1 %v16250_v58 }
 0x9b6   : > { %13411 = vmatprep.subr.bf16.mxu1 %v17929_v2 }
 0x9b9   : > { %13413 = vmatpush3.bf16.msra.mxu1 %v16258_v62 }
 0x9ba   : > { %13414 = vmatprep.subr.bf16.mxu1 %v17929_v2 }
 0x9bd   : > { %13416 = vmatpush3.bf16.msra.mxu1 %v16266_v9 }
 0x9be   : > { %13417 = vmatprep.subr.bf16.mxu1 %v17929_v2 }
 0x9c0   : > { %12594 = vmatmul.mubr.f32.vlgmr.msra.gmra.mrb[8].mxu1 %v16120_v25 }
 0x9c1   : > { %13419 = vmatpush3.bf16.msra.mxu1 %v15800_v24  ;;  %12628 = vmatprep.mubr.msk.f32.mxu1 %vm14735_vm0, %v15003_v59 }
 0x9c2   : > { %13420 = vmatprep.subr.bf16.mxu1 %v17929_v2 }
 0x9c5   : > { %13422 = vmatpush3.bf16.msra.mxu1 %v15807_v37 }
 0x9c6   : > { %13423 = vmatprep.subr.bf16.mxu1 %v17929_v2 }
 0x9c9   : > { %13425 = vmatpush3.bf16.msra.mxu1 %v15924_v32 }
 0x9ca   : > { %13426 = vmatprep.subr.bf16.mxu1 %v17929_v2 }
 0x9cd   : > { %13428 = vmatpush3.bf16.msra.mxu1 %v15934_v45 }
 0x9ce   : > { %13429 = vmatprep.subr.bf16.mxu1 %v17929_v2 }
 0x9d1   : > { %13431 = vmatpush3.bf16.msra.mxu1 %v15944_v35 }
 0x9d2   : > { %13432 = vmatprep.subr.bf16.mxu1 %v17929_v2 }
 0x9d5   : > { %13434 = vmatpush3.bf16.msra.mxu1 %v15954_v40 }
 0x9d6   : > { %13435 = vmatprep.subr.bf16.mxu1 %v17929_v2 }
 0x9d9   : > { %13437 = vmatpush3.bf16.msra.mxu1 %v15964_v4 }
 0x9da   : > { %13438 = vmatprep.subr.bf16.mxu1 %v17929_v2 }
 0x9dd   : > { %13440 = vmatpush3.bf16.msra.mxu1 %v15974_v43 }
 0x9de   : > { %13621 = vmatprep.subr.bf16.mxu1 %v17929_v2 }
 0x9e0   : > { %12629 = vmatmul.mubr.f32.vlgmr.msra.gmra.mrb[8].mxu1 %v16120_v25  ;;  %v4854_v25 = vsub.f32 %v4753_v47, %v4766_v11 }
 0x9e1   : > { %12915 = vmatprep.mubr.msk.f32.mxu1 %vm14735_vm0, %v15003_v59  ;;  %13623 = vmatpush3.bf16.msra.mxu1 %v16299_v15 }
 0x9e2   : > { %13624 = vmatprep.subr.bf16.mxu1 %v17929_v2  ;;  %v4855_v52 = vand.u32 4294901760, %v4854_v25  ;;  %v16323_v60 = vpack.c.bf16 %v4861_v14, %v4854_v25 }
 0x9e4   : > { %v4856_v57 = vsub.f32 %v4854_v25, %v4855_v52  ;;  %v16327_v54 = vpack.c.bf16 %v4862_v13, %v4855_v52 }
 0x9e5   : > { %13626 = vmatpush3.bf16.msra.mxu1 %v16311_v55 }
 0x9e6   : > { %13627 = vmatprep.subr.bf16.mxu1 %v17929_v2  ;;  %v4857_v63 = vand.u32 4294901760, %v4856_v57 }
 0x9e8   : > { %v16319_v7 = vpack.c.bf16 %v4864_v5, %v4857_v63 }
 0xab3   : > { %v4746_v47 = vpop.f32.mrb[8].mxu1 }
 0xab4   : > { %v4750_v12 = vmul.f32 0.0625, %v4746_v47  ;;  %v12630_v11 = vpop.f32.mrb[9].mxu1 }
 0xab6   : > { %v4757_v38 = vsel %vm4755_vm4, %v4750_v12, 0 }
 0xab7   : > { %v4828_v0 = vand.u32 4294901760, %v4757_v38 }
 0xab9   : > { %v4829_v23 = vsub.f32 %v4757_v38, %v4828_v0 }
 0xabb   : > { %v4830_v22 = vand.u32 4294901760, %v4829_v23 }
 0xabd   : > { %v4831_v33 = vsub.f32 %v4829_v23, %v4830_v22 }
 0xabf   : > { %v4832_v57 = vand.u32 4294901760, %v4831_v33 }
 0xac1   : > { %12640 = vmatmul.mubr.f32.vlgmr.msra.gmra.mrb[12].mxu0 %v4832_v57 }
 0xac2   : > { %13449 = vmatpush3.bf16.msra.mxu0 %v16317_v61  ;;  %12650 = vmatprep.mubr.msk.f32.mxu0 %vm14735_vm0, %v15003_v59 }
 0xac3   : > { %13450 = vmatprep.subr.bf16.mxu0 %v17929_v2 }
 0xac6   : > { %13452 = vmatpush3.bf16.msra.mxu0 %v16319_v7 }
 0xac7   : > { %13453 = vmatprep.subr.bf16.mxu0 %v17929_v2 }
 0xac9   : > { %12651 = vmatmul.mubr.f32.vlgmr.msra.gmra.mrb[12].mxu0 %v4828_v0 }
 0xaca   : > { %13455 = vmatpush3.bf16.msra.mxu0 %v16321_v10  ;;  %12661 = vmatprep.mubr.msk.f32.mxu0 %vm14735_vm0, %v15003_v59 }
 0xacb   : > { %13456 = vmatprep.subr.bf16.mxu0 %v17929_v2 }
 0xace   : > { %13458 = vmatpush3.bf16.msra.mxu0 %v16323_v60 }
 0xacf   : > { %13459 = vmatprep.subr.bf16.mxu0 %v17929_v2 }
 0xad1   : > { %12662 = vmatmul.mubr.f32.vlgmr.msra.gmra.mrb[12].mxu0 %v4829_v23 }
 0xad2   : > { %13461 = vmatpush3.bf16.msra.mxu0 %v16299_v15  ;;  %12672 = vmatprep.mubr.msk.f32.mxu0 %vm14735_vm0, %v15003_v59 }
 0xad3   : > { %13462 = vmatprep.subr.bf16.mxu0 %v17929_v2 }
 0xad6   : > { %13464 = vmatpush3.bf16.msra.mxu0 %v16311_v55 }
 0xad7   : > { %13465 = vmatprep.subr.bf16.mxu0 %v17929_v2 }
 0xad9   : > { %12673 = vmatmul.mubr.f32.vlgmr.msra.gmra.mrb[12].mxu0 %v4830_v22 }
 0xada   : > { %13467 = vmatpush3.bf16.msra.mxu0 %v16325_v17  ;;  %12683 = vmatprep.mubr.msk.f32.mxu0 %vm14735_vm0, %v15003_v59 }
 0xadb   : > { %13468 = vmatprep.subr.bf16.mxu0 %v17929_v2 }
 0xade   : > { %13470 = vmatpush3.bf16.msra.mxu0 %v16327_v54 }
 0xadf   : > { %13471 = vmatprep.subr.bf16.mxu0 %v17929_v2 }
 0xae1   : > { %12684 = vmatmul.mubr.f32.vlgmr.msra.gmra.mrb[12].mxu0 %v4828_v0 }
 0xae2   : > { %13473 = vmatpush3.bf16.msra.mxu0 %v16299_v15  ;;  %12694 = vmatprep.mubr.msk.f32.mxu0 %vm14735_vm0, %v15003_v59 }
 0xae3   : > { %13474 = vmatprep.subr.bf16.mxu0 %v17929_v2 }
 0xae6   : > { %13476 = vmatpush3.bf16.msra.mxu0 %v16311_v55 }
 0xae7   : > { %13477 = vmatprep.subr.bf16.mxu0 %v17929_v2 }
 0xae9   : > { %12695 = vmatmul.mubr.f32.vlgmr.msra.gmra.mrb[12].mxu0 %v4828_v0 }
 0xaea   : > { %13479 = vmatpush3.bf16.msra.mxu0 %v15800_v24  ;;  %12729 = vmatprep.mubr.msk.f32.mxu0 %vm14735_vm0, %v15003_v59 }
 0xaeb   : > { %13480 = vmatprep.subr.bf16.mxu0 %v17929_v2 }
 0xaee   : > { %13482 = vmatpush3.bf16.msra.mxu0 %v15807_v37 }
 0xaef   : > { %13483 = vmatprep.subr.bf16.mxu0 %v17929_v2 }
 0xaf2   : > { %13485 = vmatpush3.bf16.msra.mxu0 %v15924_v32 }
 0xaf3   : > { %13486 = vmatprep.subr.bf16.mxu0 %v17929_v2 }
 0xaf6   : > { %13488 = vmatpush3.bf16.msra.mxu0 %v15934_v45 }
 0xaf7   : > { %13489 = vmatprep.subr.bf16.mxu0 %v17929_v2 }
 0xafa   : > { %13491 = vmatpush3.bf16.msra.mxu0 %v15944_v35 }
 0xafb   : > { %13492 = vmatprep.subr.bf16.mxu0 %v17929_v2 }
 0xafe   : > { %13494 = vmatpush3.bf16.msra.mxu0 %v15954_v40 }
 0xaff   : > { %13495 = vmatprep.subr.bf16.mxu0 %v17929_v2 }
 0xb02   : > { %13497 = vmatpush3.bf16.msra.mxu0 %v15964_v4 }
 0xb03   : > { %13498 = vmatprep.subr.bf16.mxu0 %v17929_v2 }
 0xb06   : > { %13500 = vmatpush3.bf16.msra.mxu0 %v15974_v43 }
 0xb07   : > { %13501 = vmatprep.subr.bf16.mxu0 %v17929_v2 }
 0xbbc   : > { %v5240_v44 = vpop.f32.mrb[12].mxu0 }
 0xbbd   : > { %v5247_v39 = vrot.slane %v5240_v44, %v15611_v42  ;;  %v12696_v28 = vpop.f32.mrb[13].mxu0 }
 0xbbf   : > { %v16380_v6 = vsub.f32 %v16086_v19, %v5247_v39  ;;  %v14592_v19 = vld [vmem:[%s17906_s4 + $0xd4] ss:$8 sps:$4 sm:$0xff]  }
 0xbc1   : > { %v5249_v25 = vmul.f32 %v16380_v6, %v16380_v6 }
 0xbc3   : > { %v5250_v14 = vsel %vm4085_vm3, %v5249_v25, 0.0 }
 0xbc4   : > { %v5251_v52 = vrot.slane %v5250_v14, 4 }
 0xbc6   : > { %v5252_v13 = vadd.f32 %v5251_v52, %v5250_v14  ;;  %v6982_v52 = vld [vmem:[%s17912_s10 + $0x30] sm:$0xff] }
 0xbc8   : > { %v5253_v20 = vrot.slane %v5252_v13, 2 }
 0xbca   : > { %v5254_v63 = vadd.f32 %v5253_v20, %v5252_v13  ;;  %v6983_v13 = vld [vmem:[%s17912_s10 + $0x38] sm:$0xff]  ;;  %v7023_v20 = vand.u32 4294901760, %v6982_v52 }
 0xbcc   : > { %v5255_v5 = vrot.slane %v5254_v63, 1 }
 0xbce   : > { %v5256_v47 = vadd.f32 %v5255_v5, %v5254_v63  ;;  %v7026_v63 = vand.u32 4294901760, %v6983_v13 }
 0xbd0   : > { %v16385_v12 = vand.u32 4294901760, %v5256_v47 }
 0xbd2   : > { %v5339_v11 = vsub.f32 %v5256_v47, %v16385_v12 }
 0xbd4   : > { %v5340_v38 = vand.u32 4294901760, %v5339_v11 }
 0xbd6   : > { %v5341_v0 = vsub.f32 %v5339_v11, %v5340_v38 }
 0xbd8   : > { %v5342_v23 = vand.u32 4294901760, %v5341_v0  ;;  %v6985_v0 = vld [vmem:[%s17912_s10 + $0x48] sm:$0xff] }
 0xbda   : > { %12730 = vmatmul.mubr.f32.vlgmr.msra.gmra.mrb[14].mxu0 %v5342_v23 }
 0xbdb   : > { %13503 = vmatpush3.bf16.msra.mxu0 %v16135_v31  ;;  %12764 = vmatprep.mubr.msk.f32.mxu0 %vm14735_vm0, %v15003_v59 }
 0xbdc   : > { %13504 = vmatprep.subr.bf16.mxu0 %v17929_v2 }
 0xbdf   : > { %13506 = vmatpush3.bf16.msra.mxu0 %v16138_v53  ;;  %v14590_v53 = vld [vmem:[%s17906_s4 + $0xd0] ss:$8 sps:$4 sm:$0xff]  }
 0xbe0   : > { %13507 = vmatprep.subr.bf16.mxu0 %v17929_v2 }
 0xbe3   : > { %13509 = vmatpush3.bf16.msra.mxu0 %v15996_v8 }
 0xbe4   : > { %13510 = vmatprep.subr.bf16.mxu0 %v17929_v2 }
 0xbe7   : > { %13512 = vmatpush3.bf16.msra.mxu0 %v16020_v18 }
 0xbe8   : > { %13513 = vmatprep.subr.bf16.mxu0 %v17929_v2 }
 0xbeb   : > { %13515 = vmatpush3.bf16.msra.mxu0 %v16024_v50 }
 0xbec   : > { %13516 = vmatprep.subr.bf16.mxu0 %v17929_v2 }
 0xbef   : > { %13518 = vmatpush3.bf16.msra.mxu0 %v16038_v1  ;;  %v14575_v1 = vld [vmem:[%s17906_s4 + $0x80] ss:$8 sps:$4 sm:$0xff]  }
 0xbf0   : > { %13519 = vmatprep.subr.bf16.mxu0 %v17929_v2 }
 0xbf3   : > { %13521 = vmatpush3.bf16.msra.mxu0 %v16058_v34  ;;  %v14580_v34 = vld [vmem:[%s17906_s4 + $0x94] ss:$8 sps:$4 sm:$0xff]  }
 0xbf4   : > { %13522 = vmatprep.subr.bf16.mxu0 %v17929_v2 }
 0xbf7   : > { %13524 = vmatpush3.bf16.msra.mxu0 %v16060_v27  ;;  %v14578_v27 = vld [vmem:[%s17906_s4 + $0x90] ss:$8 sps:$4 sm:$0xff]  }
 0xbf8   : > { %13525 = vmatprep.subr.bf16.mxu0 %v17929_v2 }
 0xbfa   : > { %12765 = vmatmul.mubr.f32.vlgmr.msra.gmra.mrb[14].mxu0 %v16385_v12 }
 0xbfb   : > { %13527 = vmatpush3.bf16.msra.mxu0 %v16158_v46  ;;  %12799 = vmatprep.mubr.msk.f32.mxu0 %vm14735_vm0, %v15003_v59  ;;  %v14595_v46 = vld [vmem:[%s17906_s4 + $0xe4] ss:$8 sps:$4 sm:$0xff]  }
 0xbfc   : > { %13528 = vmatprep.subr.bf16.mxu0 %v17929_v2 }
 0xbff   : > { %13530 = vmatpush3.bf16.msra.mxu0 %v16165_v16  ;;  %v14593_v16 = vld [vmem:[%s17906_s4 + $0xe0] ss:$8 sps:$4 sm:$0xff]  }
 0xc00   : > { %13531 = vmatprep.subr.bf16.mxu0 %v17929_v2 }
 0xc03   : > { %13533 = vmatpush3.bf16.msra.mxu0 %v16064_v49  ;;  %v14583_v49 = vld [vmem:[%s17906_s4 + $0xa4] ss:$8 sps:$4 sm:$0xff]  }
 0xc04   : > { %13534 = vmatprep.subr.bf16.mxu0 %v17929_v2 }
 0xc07   : > { %13536 = vmatpush3.bf16.msra.mxu0 %v16068_v29  ;;  %v14581_v29 = vld [vmem:[%s17906_s4 + $0xa0] ss:$8 sps:$4 sm:$0xff]  }
 0xc08   : > { %13537 = vmatprep.subr.bf16.mxu0 %v17929_v2 }
 0xc0b   : > { %13539 = vmatpush3.bf16.msra.mxu0 %v16072_v41  ;;  %v14586_v41 = vld [vmem:[%s17906_s4 + $0xb4] ss:$8 sps:$4 sm:$0xff]  }
 0xc0c   : > { %13540 = vmatprep.subr.bf16.mxu0 %v17929_v2 }
 0xc0f   : > { %13542 = vmatpush3.bf16.msra.mxu0 %v16076_v51  ;;  %v14584_v51 = vld [vmem:[%s17906_s4 + $0xb0] ss:$8 sps:$4 sm:$0xff]  }
 0xc10   : > { %13543 = vmatprep.subr.bf16.mxu0 %v17929_v2 }
 0xc13   : > { %13545 = vmatpush3.bf16.msra.mxu0 %v16080_v30  ;;  %v14589_v30 = vld [vmem:[%s17906_s4 + $0xc4] ss:$8 sps:$4 sm:$0xff]  }
 0xc14   : > { %13546 = vmatprep.subr.bf16.mxu0 %v17929_v2 }
 0xc17   : > { %13548 = vmatpush3.bf16.msra.mxu0 %v16084_v21  ;;  %v14587_v21 = vld [vmem:[%s17906_s4 + $0xc0] ss:$8 sps:$4 sm:$0xff]  }
 0xc18   : > { %13549 = vmatprep.subr.bf16.mxu0 %v17929_v2 }
 0xc1a   : > { %12800 = vmatmul.mubr.f32.vlgmr.msra.gmra.mrb[14].mxu0 %v5339_v11  ;;  %v16615_v11 = vpack.c.bf16 %v7026_v63, %v7023_v20 }
 0xc1b   : > { %13551 = vmatpush3.bf16.msra.mxu0 %v15800_v24  ;;  %12834 = vmatprep.mubr.msk.f32.mxu0 %vm14735_vm0, %v15003_v59 }
 0xc1c   : > { %13552 = vmatprep.subr.bf16.mxu0 %v17929_v2 }
 0xc1f   : > { %13554 = vmatpush3.bf16.msra.mxu0 %v15807_v37 }
 0xc20   : > { %13555 = vmatprep.subr.bf16.mxu0 %v17929_v2 }
 0xc23   : > { %13557 = vmatpush3.bf16.msra.mxu0 %v15924_v32 }
 0xc24   : > { %13558 = vmatprep.subr.bf16.mxu0 %v17929_v2 }
 0xc27   : > { %13560 = vmatpush3.bf16.msra.mxu0 %v15934_v45 }
 0xc28   : > { %13561 = vmatprep.subr.bf16.mxu0 %v17929_v2 }
 0xc2b   : > { %13563 = vmatpush3.bf16.msra.mxu0 %v15944_v35 }
 0xc2c   : > { %13564 = vmatprep.subr.bf16.mxu0 %v17929_v2 }
 0xc2f   : > { %13566 = vmatpush3.bf16.msra.mxu0 %v15954_v40 }
 0xc30   : > { %13567 = vmatprep.subr.bf16.mxu0 %v17929_v2 }
 0xc33   : > { %13569 = vmatpush3.bf16.msra.mxu0 %v15964_v4 }
 0xc34   : > { %13570 = vmatprep.subr.bf16.mxu0 %v17929_v2 }
 0xc37   : > { %13572 = vmatpush3.bf16.msra.mxu0 %v15974_v43 }
 0xc38   : > { %13573 = vmatprep.subr.bf16.mxu0 %v17929_v2 }
 0xc3a   : > { %12835 = vmatmul.mubr.f32.vlgmr.msra.gmra.mrb[14].mxu0 %v5340_v38  ;;  %v6984_v38 = vld [vmem:[%s17912_s10 + $0x40] sm:$0xff] }
 0xc3b   : > { %13575 = vmatpush3.bf16.msra.mxu0 %v16206_v26  ;;  %12869 = vmatprep.mubr.msk.f32.mxu0 %vm14735_vm0, %v15003_v59  ;;  %v14598_v26 = vld [vmem:[%s17906_s4 + $0xf4] ss:$8 sps:$4 sm:$0xff]   ;;  %v7029_v23 = vand.u32 4294901760, %v6984_v38 }
 0xc3c   : > { %13576 = vmatprep.subr.bf16.mxu0 %v17929_v2 }
 0xc3f   : > { %13578 = vmatpush3.bf16.msra.mxu0 %v16216_v3  ;;  %v14596_v3 = vld [vmem:[%s17906_s4 + $0xf0] ss:$8 sps:$4 sm:$0xff]  }
 0xc40   : > { %13579 = vmatprep.subr.bf16.mxu0 %v17929_v2 }
 0xc43   : > { %13581 = vmatpush3.bf16.msra.mxu0 %v16226_v56  ;;  %v17927_v56 = vmov 0  }
 0xc44   : > { %13582 = vmatprep.subr.bf16.mxu0 %v17929_v2 }
 0xc47   : > { %13584 = vmatpush3.bf16.msra.mxu0 %v16234_v36  ;;  %v14601_v36 = vld [vmem:[%s17906_s4 + $0x4] ss:$8 sps:$4 sm:$0xff]  }
 0xc48   : > { %13585 = vmatprep.subr.bf16.mxu0 %v17929_v2 }
 0xc4b   : > { %13587 = vmatpush3.bf16.msra.mxu0 %v16242_v48  ;;  %v6976_v48 = vld [vmem:[%s17912_s10] sm:$0xff] }
 0xc4c   : > { %13588 = vmatprep.subr.bf16.mxu0 %v17929_v2 }
 0xc4f   : > { %13590 = vmatpush3.bf16.msra.mxu0 %v16250_v58  ;;  %v6977_v58 = vld [vmem:[%s17912_s10 + $0x8] sm:$0xff] }
 0xc50   : > { %13591 = vmatprep.subr.bf16.mxu0 %v17929_v2 }
 0xc53   : > { %13593 = vmatpush3.bf16.msra.mxu0 %v16258_v62  ;;  %v6978_v62 = vld [vmem:[%s17912_s10 + $0x10] sm:$0xff] }
 0xc54   : > { %13594 = vmatprep.subr.bf16.mxu0 %v17929_v2 }
 0xc57   : > { %13596 = vmatpush3.bf16.msra.mxu0 %v16266_v9  ;;  %v7005_v9 = vand.u32 4294901760, %v6976_v48 }
 0xc58   : > { %13597 = vmatprep.subr.bf16.mxu0 %v17929_v2 }
 0xc59   : > { %v16583_v33 = vsub.f32 %v6976_v48, %v7005_v9 }
 0xc5a   : > { %12870 = vmatmul.mubr.f32.vlgmr.msra.gmra.mrb[14].mxu0 %v16385_v12 }
 0xc5b   : > { %13599 = vmatpush3.bf16.msra.mxu0 %v15800_v24  ;;  %12904 = vmatprep.mubr.msk.f32.mxu0 %vm14735_vm0, %v15003_v59 }
 0xc5c   : > { %13600 = vmatprep.subr.bf16.mxu0 %v17929_v2 }
 0xc5f   : > { %13602 = vmatpush3.bf16.msra.mxu0 %v15807_v37 }
 0xc60   : > { %13603 = vmatprep.subr.bf16.mxu0 %v17929_v2 }
 0xc63   : > { %13605 = vmatpush3.bf16.msra.mxu0 %v15924_v32 }
 0xc64   : > { %13606 = vmatprep.subr.bf16.mxu0 %v17929_v2 }
 0xc67   : > { %13608 = vmatpush3.bf16.msra.mxu0 %v15934_v45 }
 0xc68   : > { %13609 = vmatprep.subr.bf16.mxu0 %v17929_v2 }
 0xc6b   : > { %13611 = vmatpush3.bf16.msra.mxu0 %v15944_v35 }
 0xc6c   : > { %13612 = vmatprep.subr.bf16.mxu0 %v17929_v2 }
 0xc6f   : > { %13614 = vmatpush3.bf16.msra.mxu0 %v15954_v40 }
 0xc70   : > { %13615 = vmatprep.subr.bf16.mxu0 %v17929_v2 }
 0xc73   : > { %13617 = vmatpush3.bf16.msra.mxu0 %v15964_v4 }
 0xc74   : > { %13618 = vmatprep.subr.bf16.mxu0 %v17929_v2 }
 0xc77   : > { %13620 = vmatpush3.bf16.msra.mxu0 %v15974_v43  ;;  %v14577_v43 = vld [vmem:[%s17906_s4 + $0x84] ss:$8 sps:$4 sm:$0xff]  }
 0xc78   : > { %13729 = vmatprep.subr.bf16.mxu0 %v17929_v2 }
 0xc7a   : > { %12905 = vmatmul.mubr.f32.vlgmr.msra.gmra.mrb[14].mxu0 %v16385_v12 }
 0xd4d   : > { %v5894_v24 = vpop.f32.mrb[14].mxu0 }
 0xd4e   : > { %v5898_v37 = vmul.f32 0.0625, %v5894_v24  ;;  %v12906_v32 = vpop.f32.mrb[15].mxu0  ;;  %v7032_v24 = vand.u32 4294901760, %v6985_v0 }
 0xd4f   : > { %v16628_v32 = vsub.f32 %v6982_v52, %v7023_v20  ;;  %v14611_v52 = vld [vmem:[%s17906_s4 + $0x40] ss:$8 sps:$4 sm:$0xff]   ;;  %v14614_v20 = vld [vmem:[%s17906_s4 + $0x50] ss:$8 sps:$4 sm:$0xff]  }
 0xd50   : > { %v5899_v45 = vadd.f32 1e-05, %v5898_v37 }
 0xd52   : > { %14721 = vrsqrt.f32 %v5899_v45  ;;  %v16630_v45 = vsub.f32 %v6983_v13, %v7026_v63  ;;  %v14616_v13 = vld [vmem:[%s17906_s4 + $0x54] ss:$8 sps:$4 sm:$0xff]   ;;  %v14619_v63 = vld [vmem:[%s17906_s4 + $0x64] ss:$8 sps:$4 sm:$0xff]  }
 0xd5c   : > { %v14722_v35 = vpop.eup %14721 }
 0xd5d   : > { %v5902_v40 = vsel %vm4755_vm4, %v14722_v35, 0  ;;  %v16633_v35 = vpack.c.bf16 %v7032_v24, %v7029_v23 }
 0xd5e   : > { %v5973_v8 = vand.u32 4294901760, %v5902_v40 }
 0xd60   : > { %v5974_v18 = vsub.f32 %v5902_v40, %v5973_v8 }
 0xd62   : > { %v5975_v50 = vand.u32 4294901760, %v5974_v18 }
 0xd64   : > { %v5976_v4 = vsub.f32 %v5974_v18, %v5975_v50 }
 0xd66   : > { %v5977_v31 = vand.u32 4294901760, %v5976_v4 }
 0xd68   : > { %12916 = vmatmul.mubr.f32.vlgmr.msra.gmra.mrb[10].mxu1 %v5977_v31 }
 0xd69   : > { %13629 = vmatpush3.bf16.msra.mxu1 %v16317_v61  ;;  %12926 = vmatprep.mubr.msk.f32.mxu1 %vm14735_vm0, %v15003_v59  ;;  %v7011_v61 = vand.u32 4294901760, %v6978_v62 }
 0xd6a   : > { %13630 = vmatprep.subr.bf16.mxu1 %v17929_v2 }
 0xd6b   : > { %v16587_v44 = vsub.f32 %v6978_v62, %v7011_v61  ;;  %v14599_v62 = vld [vmem:[%s17906_s4] ss:$8 sps:$4 sm:$0xff]  }
 0xd6d   : > { %13632 = vmatpush3.bf16.msra.mxu1 %v16319_v7  ;;  %v6980_v7 = vld [vmem:[%s17912_s10 + $0x20] sm:$0xff] }
 0xd6e   : > { %13633 = vmatprep.subr.bf16.mxu1 %v17929_v2 }
 0xd70   : > { %12927 = vmatmul.mubr.f32.vlgmr.msra.gmra.mrb[10].mxu1 %v5973_v8 }
 0xd71   : > { %13635 = vmatpush3.bf16.msra.mxu1 %v16321_v10  ;;  %12937 = vmatprep.mubr.msk.f32.mxu1 %vm14735_vm0, %v15003_v59  ;;  %v6981_v10 = vld [vmem:[%s17912_s10 + $0x28] sm:$0xff] }
 0xd72   : > { %13636 = vmatprep.subr.bf16.mxu1 %v17929_v2 }
 0xd75   : > { %13638 = vmatpush3.bf16.msra.mxu1 %v16323_v60 }
 0xd76   : > { %13639 = vmatprep.subr.bf16.mxu1 %v17929_v2 }
 0xd78   : > { %12938 = vmatmul.mubr.f32.vlgmr.msra.gmra.mrb[10].mxu1 %v5974_v18  ;;  %v6987_v18 = vld [vmem:[%s17912_s10 + $0x58] sm:$0xff] }
 0xd79   : > { %13641 = vmatpush3.bf16.msra.mxu1 %v16299_v15  ;;  %12948 = vmatprep.mubr.msk.f32.mxu1 %vm14735_vm0, %v15003_v59 }
 0xd7a   : > { %13642 = vmatprep.subr.bf16.mxu1 %v17929_v2 }
 0xd7d   : > { %13644 = vmatpush3.bf16.msra.mxu1 %v16311_v55 }
 0xd7e   : > { %13645 = vmatprep.subr.bf16.mxu1 %v17929_v2 }
 0xd80   : > { %12949 = vmatmul.mubr.f32.vlgmr.msra.gmra.mrb[10].mxu1 %v5975_v50 }
 0xd81   : > { %13647 = vmatpush3.bf16.msra.mxu1 %v16325_v17  ;;  %12959 = vmatprep.mubr.msk.f32.mxu1 %vm14735_vm0, %v15003_v59  ;;  %v7017_v17 = vand.u32 4294901760, %v6980_v7 }
 0xd82   : > { %13648 = vmatprep.subr.bf16.mxu1 %v17929_v2 }
 0xd83   : > { %v16610_v47 = vsub.f32 %v6980_v7, %v7017_v17  ;;  %v14607_v7 = vld [vmem:[%s17906_s4 + $0x24] ss:$8 sps:$4 sm:$0xff]  }
 0xd85   : > { %13650 = vmatpush3.bf16.msra.mxu1 %v16327_v54  ;;  %v7020_v54 = vand.u32 4294901760, %v6981_v10 }
 0xd86   : > { %13651 = vmatprep.subr.bf16.mxu1 %v17929_v2 }
 0xd87   : > { %v16593_v25 = vpack.c.bf16 %v7020_v54, %v7017_v17  ;;  %v16612_v12 = vsub.f32 %v6981_v10, %v7020_v54  ;;  %v14605_v10 = vld [vmem:[%s17906_s4 + $0x20] ss:$8 sps:$4 sm:$0xff]   ;;  %v14608_v17 = vld [vmem:[%s17906_s4 + $0x30] ss:$8 sps:$4 sm:$0xff]   ;;  %v14613_v54 = vld [vmem:[%s17906_s4 + $0x44] ss:$8 sps:$4 sm:$0xff]  }
 0xd88   : > { %12960 = vmatmul.mubr.f32.vlgmr.msra.gmra.mrb[10].mxu1 %v5973_v8 }
 0xd89   : > { %13653 = vmatpush3.bf16.msra.mxu1 %v16299_v15  ;;  %12970 = vmatprep.mubr.msk.f32.mxu1 %vm14735_vm0, %v15003_v59  ;;  %v7008_v15 = vand.u32 4294901760, %v6977_v58  ;;  %v16626_v37 = vpack.c.bf16 %v16612_v12, %v16610_v47 }
 0xd8a   : > { %13654 = vmatprep.subr.bf16.mxu1 %v17929_v2 }
 0xd8b   : > { %v16581_v22 = vpack.c.bf16 %v7008_v15, %v7005_v9  ;;  %v16585_v57 = vsub.f32 %v6977_v58, %v7008_v15  ;;  %18014 = vst [vmem:[#allocation10_spill] sm:$0xff] %v16626_v37 }
 0xd8d   : > { %13656 = vmatpush3.bf16.msra.mxu1 %v16311_v55  ;;  %v6979_v55 = vld [vmem:[%s17912_s10 + $0x18] sm:$0xff]  ;;  %v16597_v14 = vpack.c.bf16 %v16585_v57, %v16583_v33 }
 0xd8e   : > { %6514 = vmatprep.subr.bf16.mxu1 %v14577_v43  ;;  %v7014_v60 = vand.u32 4294901760, %v6979_v55  ;;  %v7038_v43 = vand.u32 4294901760, %v6987_v18 }
 0xd8f   : > { %18012 = vst [vmem:[#allocation8_spill] sm:$0xff] %v16597_v14  ;;  %13731 = vmatpush1.bf16.msra.mxu0 %v16597_v14 }
 0xd90   : > { %12971 = vmatmul.mubr.f32.vlgmr.msra.gmra.mrb[10].mxu1 %v5973_v8  ;;  %v16589_v39 = vpack.c.bf16 %v7014_v60, %v7011_v61  ;;  %v16591_v28 = vsub.f32 %v6979_v55, %v7014_v60  ;;  %13732 = vmatprep.subr.bf16.mxu0 %v17929_v2  ;;  %v6986_v8 = vld [vmem:[%s17912_s10 + $0x50] sm:$0xff] }
 0xd91   : > { %6515 = vmatpush1.bf16.msra.mxu1 %v14575_v1  ;;  %6546 = vmatprep.mubr.bf16.mxu1 %v17927_v56  ;;  %v7035_v31 = vand.u32 4294901760, %v6986_v8  ;;  %v16645_v1 = vpack.c.bf16 %v16630_v45, %v16628_v32  ;;  %v14604_v55 = vld [vmem:[%s17906_s4 + $0x14] ss:$8 sps:$4 sm:$0xff]   ;;  %v14602_v61 = vld [vmem:[%s17906_s4 + $0x10] ss:$8 sps:$4 sm:$0xff]  }
 0xd92   : > { %6516 = vmatprep.subr.bf16.mxu1 %v14580_v34  ;;  %v16608_v5 = vpack.c.bf16 %v16591_v28, %v16587_v44  ;;  %v16647_v34 = vsub.f32 %v6984_v38, %v7029_v23  ;;  %v14610_v60 = vld [vmem:[%s17906_s4 + $0x34] ss:$8 sps:$4 sm:$0xff]   ;;  %v14617_v38 = vld [vmem:[%s17906_s4 + $0x60] ss:$8 sps:$4 sm:$0xff]   ;;  %v14620_v23 = vld [vmem:[%s17906_s4 + $0x70] ss:$8 sps:$4 sm:$0xff]  }
 0xd93   : > { %18015 = vst [vmem:[#allocation11_spill] sm:$0xff] %v16645_v1 }
 0xd94   : > { %18013 = vst [vmem:[#allocation9_spill] sm:$0xff] %v16608_v5  ;;  %13734 = vmatpush1.bf16.msra.mxu0 %v16608_v5  ;;  %v17284_v5 = vld [vmem:[%s17913_s11 + $0x78] sm:$0xff] }
 0xd95   : > { %6517 = vmatpush1.bf16.msra.mxu1 %v14578_v27  ;;  %13735 = vmatprep.subr.bf16.mxu0 %v17929_v2  ;;  %v16649_v27 = vsub.f32 %v6985_v0, %v7032_v24  ;;  %v14622_v0 = vld [vmem:[%s17906_s4 + $0x74] ss:$8 sps:$4 sm:$0xff]   ;;  %v14625_v24 = vld [vmem:[%s17906_s4 + $0x104] ss:$8 sps:$4 sm:$0xff]  }
 0xd96   : > { %6518 = vmatprep.subr.bf16.mxu1 %v14583_v49 }
 0xd98   : > { %13737 = vmatpush1.bf16.msra.mxu0 %v16626_v37 }
 0xd99   : > { %6519 = vmatpush1.bf16.msra.mxu1 %v14581_v29  ;;  %13738 = vmatprep.subr.bf16.mxu0 %v17929_v2  ;;  %v16653_v29 = vpack.c.bf16 %v7038_v43, %v7035_v31 }
 0xd9a   : > { %6520 = vmatprep.subr.bf16.mxu1 %v14586_v41  ;;  %v6988_v41 = vld [vmem:[%s17912_s10 + $0x60] sm:$0xff] }
 0xd9c   : > { %13740 = vmatpush1.bf16.msra.mxu0 %v16645_v1 }
 0xd9d   : > { %6521 = vmatpush1.bf16.msra.mxu1 %v14584_v51  ;;  %v6989_v51 = vld [vmem:[%s17912_s10 + $0x68] sm:$0xff]  ;;  %13741 = vmatprep.subr.bf16.mxu0 %v17929_v2 }
 0xd9e   : > { %6522 = vmatprep.subr.bf16.mxu1 %v14589_v30 }
 0xda1   : > { %6523 = vmatpush1.bf16.msra.mxu1 %v14587_v21  ;;  %v7041_v21 = vand.u32 4294901760, %v6988_v41 }
 0xda2   : > { %6524 = vmatprep.subr.bf16.mxu1 %v14592_v19  ;;  %v7044_v19 = vand.u32 4294901760, %v6989_v51 }
 0xda4   : > { %v16680_v48 = vsub.f32 %v6989_v51, %v7044_v19  ;;  %v14637_v51 = vld [vmem:[%s17906_s4 + $0x144] ss:$8 sps:$4 sm:$0xff]  }
 0xda5   : > { %6525 = vmatpush1.bf16.msra.mxu1 %v14590_v53  ;;  %v16666_v53 = vsub.f32 %v6986_v8, %v7035_v31  ;;  %v14623_v8 = vld [vmem:[%s17906_s4 + $0x100] ss:$8 sps:$4 sm:$0xff]   ;;  %v14631_v31 = vld [vmem:[%s17906_s4 + $0x124] ss:$8 sps:$4 sm:$0xff]  }
 0xda6   : > { %6526 = vmatprep.subr.bf16.mxu1 %v14595_v46  ;;  %v16668_v46 = vsub.f32 %v6987_v18, %v7038_v43  ;;  %v14629_v43 = vld [vmem:[%s17906_s4 + $0x120] ss:$8 sps:$4 sm:$0xff]  }
 0xda9   : > { %6527 = vmatpush1.bf16.msra.mxu1 %v14593_v16 }
 0xdaa   : > { %6528 = vmatprep.subr.bf16.mxu1 %v14598_v26  ;;  %v16671_v26 = vpack.c.bf16 %v7044_v19, %v7041_v21  ;;  %v14638_v19 = vld [vmem:[%s17906_s4 + $0x150] ss:$8 sps:$4 sm:$0xff]  }
 0xdac   : > { %18017 = vst [vmem:[#allocation13_spill] sm:$0xff] %v16671_v26 }
 0xdad   : > { %6529 = vmatpush1.bf16.msra.mxu1 %v14596_v3  ;;  %v16676_v3 = vpack.c.bf16 %v16668_v46, %v16666_v53 }
 0xdae   : > { %6635 = vmatprep.subr.bf16.mxu1 %v14601_v36  ;;  %v16678_v36 = vsub.f32 %v6988_v41, %v7041_v21  ;;  %v14632_v41 = vld [vmem:[%s17906_s4 + $0x130] ss:$8 sps:$4 sm:$0xff]   ;;  %v14640_v21 = vld [vmem:[%s17906_s4 + $0x154] ss:$8 sps:$4 sm:$0xff]  }
 0xdaf   : > { %18018 = vst [vmem:[#allocation14_spill] sm:$0xff] %v16676_v3 }
 0xdb0   : > { %v16686_v58 = vpack.c.bf16 %v16680_v48, %v16678_v36 }
 0xdb2   : > { %18019 = vst [vmem:[#allocation15_spill] sm:$0xff] %v16686_v58 }
 0xe63   : > { %v6385_v40 = vpop.f32.mrb[10].mxu1 }
 0xe64   : > { %v6392_v50 = vrot.slane %v6385_v40, %v15611_v42  ;;  %v12972_v4 = vpop.f32.mrb[11].mxu1 }
 0xe65   : > { %v14626_v4 = vld [vmem:[%s17906_s4 + $0x110] ss:$8 sps:$4 sm:$0xff]  }
 0xe66   : > { %v6393_v49 = vmul.f32 %v6392_v50, %v16380_v6  ;;  %v16664_v6 = vpack.c.bf16 %v16649_v27, %v16647_v34  ;;  %v14628_v50 = vld [vmem:[%s17906_s4 + $0x114] ss:$8 sps:$4 sm:$0xff]  }
 0xe68   : > { %v6394_v30 = vmul.f32 0.2, %v6393_v49  ;;  %18016 = vst [vmem:[#allocation12_spill] sm:$0xff] %v16664_v6  ;;  %13743 = vmatpush1.bf16.msra.mxu0 %v16664_v6  ;;  %v18044_v6 = vand.u32 4294901760, %v16610_v47 }
 0xe69   : > { %13744 = vmatprep.subr.bf16.mxu0 %v17929_v2 }
 0xe6a   : > { %v6395_v16 = vmax.f32 %v6393_v49, %v6394_v30  ;;  %v14634_v49 = vld [vmem:[%s17906_s4 + $0x134] ss:$8 sps:$4 sm:$0xff]   ;;  %v14635_v30 = vld [vmem:[%s17906_s4 + $0x140] ss:$8 sps:$4 sm:$0xff]   ;;  %v7140_v1 = vsub.f32 %v16610_v47, %v18044_v6  ;;  %v17947_v6 = vand.u32 4294901760, %v16647_v34 }
 0xe6c   : > { %6396 = vst [vmem:[#allocation4 + $0x1] sm:$0xf] %v6395_v16  ;;  %13746 = vmatpush1.bf16.msra.mxu0 %v16676_v3  ;;  %v14643_v16 = vld [vmem:[%s17906_s4 + $0x164] ss:$8 sps:$4 sm:$0xff]  }
 0xe6d   : > { %13747 = vmatprep.subr.bf16.mxu0 %v17929_v2 }
 0xe70   : > { %13749 = vmatpush1.bf16.msra.mxu0 %v16686_v58 }
 0xe71   : > { %13750 = vmatprep.subr.bf16.mxu0 %v17929_v2 }
 0xe73   : > { %v6415_v9 = vld [vmem:[#allocation4 + $0x1] sm:$0x7] }
 0xe74   : > { %v6416_v15 = vpack.c.bf16 %v6415_v9, %v6415_v9  ;;  %v6397_v40 = vld [vmem:[#allocation4] sm:$0x7]  ;;  %v14646_v9 = vld [vmem:[%s17906_s4 + $0x174] ss:$8 sps:$4 sm:$0xff]  }
 0xe75   : > { %v6398_v18 = vpack.c.bf16 %v6397_v40, %v6397_v40  ;;  %v14665_v40 = vld [vmem:[%s17906_s4 + $0x1e0] ss:$8 sps:$4 sm:$0xff]  }
 0xe76   : > { %6547 = vmatmul.mubr.bf16.vlgmr.msra.gmra.mrb[12].mxu1 %v6416_v15  ;;  %v14644_v15 = vld [vmem:[%s17906_s4 + $0x170] ss:$8 sps:$4 sm:$0xff]  }
 0xe77   : > { %6636 = vmatpush1.bf16.msra.mxu1 %v14599_v62  ;;  %6667 = vmatprep.mubr.bf16.mxu1 %v17927_v56  ;;  %v14641_v62 = vld [vmem:[%s17906_s4 + $0x160] ss:$8 sps:$4 sm:$0xff]  }
 0xe78   : > { %6637 = vmatprep.subr.bf16.mxu1 %v14604_v55  ;;  %v14649_v55 = vld [vmem:[%s17906_s4 + $0x184] ss:$8 sps:$4 sm:$0xff]  }
 0xe7b   : > { %6638 = vmatpush1.bf16.msra.mxu1 %v14602_v61  ;;  %v6676_v61 = vld [vmem:[#allocation4 + $0x2] sm:$0x7] }
 0xe7c   : > { %6639 = vmatprep.subr.bf16.mxu1 %v14607_v7  ;;  %v14647_v7 = vld [vmem:[%s17906_s4 + $0x180] ss:$8 sps:$4 sm:$0xff]  }
 0xe7f   : > { %6640 = vmatpush1.bf16.msra.mxu1 %v14605_v10  ;;  %v6677_v10 = vpack.c.bf16 %v6676_v61, %v6676_v61  ;;  %v6994_v61 = vld [vmem:[%s17912_s10 + $0x90] sm:$0xff] }
 0xe80   : > { %6641 = vmatprep.subr.bf16.mxu1 %v14610_v60  ;;  %v14652_v60 = vld [vmem:[%s17906_s4 + $0x194] ss:$8 sps:$4 sm:$0xff]  }
 0xe83   : > { %6642 = vmatpush1.bf16.msra.mxu1 %v14608_v17  ;;  %v14650_v17 = vld [vmem:[%s17906_s4 + $0x190] ss:$8 sps:$4 sm:$0xff]  }
 0xe84   : > { %6643 = vmatprep.subr.bf16.mxu1 %v14613_v54  ;;  %v14655_v54 = vld [vmem:[%s17906_s4 + $0x1a4] ss:$8 sps:$4 sm:$0xff]  }
 0xe87   : > { %6644 = vmatpush1.bf16.msra.mxu1 %v14611_v52  ;;  %v14653_v52 = vld [vmem:[%s17906_s4 + $0x1a0] ss:$8 sps:$4 sm:$0xff]  }
 0xe88   : > { %6645 = vmatprep.subr.bf16.mxu1 %v14616_v13  ;;  %v14658_v13 = vld [vmem:[%s17906_s4 + $0x1b4] ss:$8 sps:$4 sm:$0xff]  }
 0xe8b   : > { %6646 = vmatpush1.bf16.msra.mxu1 %v14614_v20  ;;  %v14656_v20 = vld [vmem:[%s17906_s4 + $0x1b0] ss:$8 sps:$4 sm:$0xff]  }
 0xe8c   : > { %6647 = vmatprep.subr.bf16.mxu1 %v14619_v63  ;;  %v14661_v63 = vld [vmem:[%s17906_s4 + $0x1c4] ss:$8 sps:$4 sm:$0xff]  }
 0xe8f   : > { %6648 = vmatpush1.bf16.msra.mxu1 %v14617_v38  ;;  %v14659_v38 = vld [vmem:[%s17906_s4 + $0x1c0] ss:$8 sps:$4 sm:$0xff]  }
 0xe90   : > { %6649 = vmatprep.subr.bf16.mxu1 %v14622_v0  ;;  %v14664_v0 = vld [vmem:[%s17906_s4 + $0x1d4] ss:$8 sps:$4 sm:$0xff]  }
 0xe93   : > { %6650 = vmatpush1.bf16.msra.mxu1 %v14620_v23  ;;  %v14662_v23 = vld [vmem:[%s17906_s4 + $0x1d0] ss:$8 sps:$4 sm:$0xff]  }
 0xe94   : > { %6775 = vmatprep.subr.bf16.mxu1 %v14625_v24  ;;  %v14667_v24 = vld [vmem:[%s17906_s4 + $0x1e4] ss:$8 sps:$4 sm:$0xff]  }
 0xe96   : > { %6668 = vmatmul.mubr.bf16.vlgmr.msra.gmra.mrb[12].mxu1 %v6398_v18  ;;  %v14668_v18 = vld [vmem:[%s17906_s4 + $0x1f0] ss:$8 sps:$4 sm:$0xff]  }
 0xe97   : > { %6776 = vmatpush1.bf16.msra.mxu1 %v14623_v8  ;;  %6807 = vmatprep.mubr.bf16.mxu1 %v17927_v56  ;;  %v14670_v8 = vld [vmem:[%s17906_s4 + $0x1f4] ss:$8 sps:$4 sm:$0xff]  }
 0xe98   : > { %6777 = vmatprep.subr.bf16.mxu1 %v14628_v50  ;;  %v6818_v50 = vld [vmem:[#allocation4 + $0x3] sm:$0x7] }
 0xe9b   : > { %6778 = vmatpush1.bf16.msra.mxu1 %v14626_v4  ;;  %v6819_v4 = vpack.c.bf16 %v6818_v50, %v6818_v50  ;;  %v6999_v50 = vld [vmem:[%s17912_s10 + $0xb8] sm:$0xff] }
 0xe9c   : > { %6779 = vmatprep.subr.bf16.mxu1 %v14631_v31  ;;  %v6990_v31 = vld [vmem:[%s17912_s10 + $0x70] sm:$0xff] }
 0xe9f   : > { %6780 = vmatpush1.bf16.msra.mxu1 %v14629_v43  ;;  %v6991_v43 = vld [vmem:[%s17912_s10 + $0x78] sm:$0xff] }
 0xea0   : > { %6781 = vmatprep.subr.bf16.mxu1 %v14634_v49  ;;  %v7047_v49 = vand.u32 4294901760, %v6990_v31 }
 0xea3   : > { %6782 = vmatpush1.bf16.msra.mxu1 %v14632_v41  ;;  %v7050_v41 = vand.u32 4294901760, %v6991_v43 }
 0xea4   : > { %6783 = vmatprep.subr.bf16.mxu1 %v14637_v51  ;;  %v16856_v51 = vsub.f32 %v6990_v31, %v7047_v49 }
 0xea7   : > { %6784 = vmatpush1.bf16.msra.mxu1 %v14635_v30  ;;  %v16858_v30 = vsub.f32 %v6991_v43, %v7050_v41  ;;  %v7074_v43 = vand.u32 4294901760, %v6999_v50 }
 0xea8   : > { %6785 = vmatprep.subr.bf16.mxu1 %v14640_v21  ;;  %v6992_v21 = vld [vmem:[%s17912_s10 + $0x80] sm:$0xff] }
 0xeab   : > { %6786 = vmatpush1.bf16.msra.mxu1 %v14638_v19  ;;  %v6993_v19 = vld [vmem:[%s17912_s10 + $0x88] sm:$0xff] }
 0xeac   : > { %6787 = vmatprep.subr.bf16.mxu1 %v14643_v16  ;;  %v16868_v16 = vpack.c.bf16 %v16858_v30, %v16856_v51 }
 0xeae   : > { %18020 = vst [vmem:[#allocation16_spill] sm:$0xff] %v16868_v16  ;;  %13752 = vmatpush1.bf16.msra.mxu0 %v16868_v16 }
 0xeaf   : > { %6788 = vmatpush1.bf16.msra.mxu1 %v14641_v62  ;;  %v7053_v62 = vand.u32 4294901760, %v6992_v21  ;;  %13753 = vmatprep.subr.bf16.mxu0 %v17929_v2 }
 0xeb0   : > { %6789 = vmatprep.subr.bf16.mxu1 %v14646_v9  ;;  %v7056_v9 = vand.u32 4294901760, %v6993_v19 }
 0xeb3   : > { %6790 = vmatpush1.bf16.msra.mxu1 %v14644_v15  ;;  %v16871_v15 = vsub.f32 %v6992_v21, %v7053_v62  ;;  %v7271_v21 = vsub.f32 %v6999_v50, %v7074_v43 }
 0xeb4   : > { %6917 = vmatprep.subr.bf16.mxu1 %v14649_v55  ;;  %v16873_v55 = vsub.f32 %v6993_v19, %v7056_v9 }
 0xeb6   : > { %6808 = vmatmul.mubr.bf16.vlgmr.msra.gmra.mrb[12].mxu1 %v6677_v10  ;;  %v16884_v10 = vpack.c.bf16 %v16873_v55, %v16871_v15 }
 0xeb7   : > { %6918 = vmatpush1.bf16.msra.mxu1 %v14647_v7  ;;  %6949 = vmatprep.mubr.bf16.mxu1 %v17927_v56  ;;  %v6995_v7 = vld [vmem:[%s17912_s10 + $0x98] sm:$0xff] }
 0xeb8   : > { %6919 = vmatprep.subr.bf16.mxu1 %v14652_v60  ;;  %18021 = vst [vmem:[#allocation17_spill] sm:$0xff] %v16884_v10  ;;  %v7059_v60 = vand.u32 4294901760, %v6994_v61  ;;  %13755 = vmatpush1.bf16.msra.mxu0 %v16884_v10 }
 0xeb9   : > { %13756 = vmatprep.subr.bf16.mxu0 %v17929_v2 }
 0xebb   : > { %6920 = vmatpush1.bf16.msra.mxu1 %v14650_v17  ;;  %v7062_v17 = vand.u32 4294901760, %v6995_v7 }
 0xebc   : > { %6921 = vmatprep.subr.bf16.mxu1 %v14655_v54  ;;  %v16886_v54 = vpack.c.bf16 %v7050_v41, %v7047_v49 }
 0xebd   : > { %v16926_v49 = vpack.c.bf16 %v7062_v17, %v7059_v60 }
 0xebe   : > { %18022 = vst [vmem:[#allocation18_spill] sm:$0xff] %v16886_v54 }
 0xebf   : > { %6922 = vmatpush1.bf16.msra.mxu1 %v14653_v52  ;;  %v16889_v52 = vsub.f32 %v6994_v61, %v7059_v60  ;;  %18026 = vst [vmem:[#allocation22_spill] sm:$0xff] %v16926_v49  ;;  %v7209_v61 = vand.u32 4294901760, %v16856_v51 }
 0xec0   : > { %6923 = vmatprep.subr.bf16.mxu1 %v14658_v13  ;;  %v16891_v13 = vsub.f32 %v6995_v7, %v7062_v17  ;;  %v7216_v7 = vand.u32 4294901760, %v16858_v30 }
 0xec1   : > { %v7210_v60 = vsub.f32 %v16856_v51, %v7209_v61 }
 0xec2   : > { %v7217_v17 = vsub.f32 %v16858_v30, %v7216_v7  ;;  %v7244_v51 = vand.u32 4294901760, %v16891_v13  ;;  %v16970_v58 = vpack.c.bf16 %v7216_v7, %v7209_v61 }
 0xec3   : > { %6924 = vmatpush1.bf16.msra.mxu1 %v14656_v20  ;;  %v6996_v20 = vld [vmem:[%s17912_s10 + $0xa0] sm:$0xff] }
 0xec4   : > { %6925 = vmatprep.subr.bf16.mxu1 %v14661_v63  ;;  %v6997_v63 = vld [vmem:[%s17912_s10 + $0xa8] sm:$0xff]  ;;  %18035 = vst [vmem:[#allocation31_spill] sm:$0xff] %v16970_v58 }
 0xec7   : > { %6926 = vmatpush1.bf16.msra.mxu1 %v14659_v38  ;;  %v16903_v38 = vpack.c.bf16 %v16891_v13, %v16889_v52 }
 0xec8   : > { %6927 = vmatprep.subr.bf16.mxu1 %v14664_v0  ;;  %v7065_v0 = vand.u32 4294901760, %v6996_v20 }
 0xec9   : > { %18023 = vst [vmem:[#allocation19_spill] sm:$0xff] %v16903_v38  ;;  %13758 = vmatpush1.bf16.msra.mxu0 %v16903_v38 }
 0xeca   : > { %13759 = vmatprep.subr.bf16.mxu0 %v17929_v2 }
 0xecb   : > { %6928 = vmatpush1.bf16.msra.mxu1 %v14662_v23  ;;  %v7068_v23 = vand.u32 4294901760, %v6997_v63 }
 0xecc   : > { %6929 = vmatprep.subr.bf16.mxu1 %v14667_v24  ;;  %v16906_v24 = vpack.c.bf16 %v7056_v9, %v7053_v62 }
 0xecd   : > { %v16930_v19 = vpack.c.bf16 %v7068_v23, %v7065_v0 }
 0xece   : > { %18024 = vst [vmem:[#allocation20_spill] sm:$0xff] %v16906_v24 }
 0xecf   : > { %6930 = vmatpush1.bf16.msra.mxu1 %v14665_v40  ;;  %v16909_v40 = vsub.f32 %v6996_v20, %v7065_v0  ;;  %18027 = vst [vmem:[#allocation23_spill] sm:$0xff] %v16930_v19  ;;  %v7211_v20 = vand.u32 4294901760, %v7210_v60  ;;  %v7223_v0 = vand.u32 4294901760, %v16871_v15  ;;  %v7245_v60 = vsub.f32 %v16891_v13, %v7244_v51 }
 0xed0   : > { %6931 = vmatprep.subr.bf16.mxu1 %v14670_v8  ;;  %v16911_v8 = vsub.f32 %v6997_v63, %v7068_v23  ;;  %v7218_v63 = vand.u32 4294901760, %v7217_v17  ;;  %v7230_v23 = vand.u32 4294901760, %v16873_v55 }
 0xed1   : > { %v7224_v50 = vsub.f32 %v16871_v15, %v7223_v0 }
 0xed2   : > { %v7258_v15 = vand.u32 4294901760, %v16911_v8 }
 0xed3   : > { %6932 = vmatpush1.bf16.msra.mxu1 %v14668_v18  ;;  %v6998_v18 = vld [vmem:[%s17912_s10 + $0xb0] sm:$0xff] }
 0xed4   : > { %13657 = vmatprep.subr.bf16.mxu1 %v17929_v2  ;;  %v7071_v31 = vand.u32 4294901760, %v6998_v18 }
 0xed6   : > { %6950 = vmatmul.mubr.bf16.vlgmr.msra.gmra.mrb[12].mxu1 %v6819_v4  ;;  %v16923_v4 = vpack.c.bf16 %v16911_v8, %v16909_v40  ;;  %v7264_v41 = vsub.f32 %v6998_v18, %v7071_v31  ;;  %v16938_v9 = vpack.c.bf16 %v7074_v43, %v7071_v31  ;;  %v16950_v18 = vpack.c.bf16 %v7218_v63, %v7211_v20 }
 0xed7   : > { %13659 = vmatpush1.bf16.msra.mxu1 %v16581_v22  ;;  %v7231_v31 = vsub.f32 %v16873_v55, %v7230_v23  ;;  %v7225_v43 = vand.u32 4294901760, %v7224_v50  ;;  %v7251_v20 = vand.u32 4294901760, %v16909_v40  ;;  %v7259_v50 = vsub.f32 %v16911_v8, %v7258_v15 }
 0xed8   : > { %13660 = vmatprep.subr.bf16.mxu1 %v17929_v2  ;;  %18025 = vst [vmem:[#allocation21_spill] sm:$0xff] %v16923_v4  ;;  %13761 = vmatpush1.bf16.msra.mxu0 %v16923_v4  ;;  %v16933_v62 = vpack.c.bf16 %v7271_v21, %v7264_v41  ;;  %18029 = vst [vmem:[#allocation25_spill] sm:$0xff] %v16938_v9  ;;  %v7246_v4 = vand.u32 4294901760, %v7245_v60 }
 0xed9   : > { %13762 = vmatprep.subr.bf16.mxu0 %v17929_v2  ;;  %18030 = vst [vmem:[#allocation26_spill] sm:$0xff] %v16950_v18  ;;  %v7232_v56 = vand.u32 4294901760, %v7231_v31  ;;  %v7252_v55 = vsub.f32 %v16909_v40, %v7251_v20  ;;  %v7260_v38 = vand.u32 4294901760, %v7259_v50  ;;  %v16976_v40 = vpack.c.bf16 %v7258_v15, %v7251_v20 }
 0xeda   : > { %18028 = vst [vmem:[#allocation24_spill] sm:$0xff] %v16933_v62 }
 0xedb   : > { %13662 = vmatpush1.bf16.msra.mxu1 %v16589_v39  ;;  %v7253_v31 = vand.u32 4294901760, %v7252_v55  ;;  %18038 = vst [vmem:[#allocation34_spill] sm:$0xff] %v16976_v40 }
 0xedc   : > { %13663 = vmatprep.subr.bf16.mxu1 %v17929_v2  ;;  %13764 = vmatpush1.bf16.msra.mxu0 %v16933_v62  ;;  %v16956_v62 = vpack.c.bf16 %v7232_v56, %v7225_v43  ;;  %v7265_v56 = vand.u32 4294901760, %v7264_v41  ;;  %v7272_v43 = vand.u32 4294901760, %v7271_v21 }
 0xedd   : > { %13765 = vmatprep.subr.bf16.mxu0 %v17929_v2  ;;  %v16966_v10 = vpack.c.bf16 %v7260_v38, %v7253_v31 }
 0xede   : > { %18031 = vst [vmem:[#allocation27_spill] sm:$0xff] %v16956_v62  ;;  %v7273_v13 = vsub.f32 %v7271_v21, %v7272_v43  ;;  %v16978_v8 = vpack.c.bf16 %v7272_v43, %v7265_v56 }
 0xedf   : > { %13665 = vmatpush1.bf16.msra.mxu1 %v16593_v25  ;;  %18033 = vst [vmem:[#allocation29_spill] sm:$0xff] %v16966_v10 }
 0xee0   : > { %13666 = vmatprep.subr.bf16.mxu1 %v17929_v2  ;;  %v7274_v60 = vand.u32 4294901760, %v7273_v13  ;;  %18039 = vst [vmem:[#allocation35_spill] sm:$0xff] %v16978_v8  ;;  %v17939_v13 = vand.u32 4294901760, %v16585_v57 }
 0xee3   : > { %13668 = vmatpush1.bf16.msra.mxu1 %v16615_v11 }
 0xee4   : > { %13669 = vmatprep.subr.bf16.mxu1 %v17929_v2 }
 0xee7   : > { %13671 = vmatpush1.bf16.msra.mxu1 %v16633_v35 }
 0xee8   : > { %13672 = vmatprep.subr.bf16.mxu1 %v17929_v2 }
 0xeeb   : > { %13674 = vmatpush1.bf16.msra.mxu1 %v16653_v29 }
 0xeec   : > { %13675 = vmatprep.subr.bf16.mxu1 %v17929_v2 }
 0xeef   : > { %13677 = vmatpush1.bf16.msra.mxu1 %v16671_v26 }
 0xef0   : > { %13678 = vmatprep.subr.bf16.mxu1 %v17929_v2 }
 0xef3   : > { %13680 = vmatpush1.bf16.msra.mxu1 %v16886_v54 }
 0xef4   : > { %13681 = vmatprep.subr.bf16.mxu1 %v17929_v2 }
 0xef7   : > { %13683 = vmatpush1.bf16.msra.mxu1 %v16906_v24 }
 0xef8   : > { %13684 = vmatprep.subr.bf16.mxu1 %v17929_v2 }
 0xefb   : > { %13686 = vmatpush1.bf16.msra.mxu1 %v16926_v49 }
 0xefc   : > { %13687 = vmatprep.subr.bf16.mxu1 %v17929_v2 }
 0xeff   : > { %13689 = vmatpush1.bf16.msra.mxu1 %v16930_v19 }
 0xf00   : > { %13690 = vmatprep.subr.bf16.mxu1 %v17929_v2 }
 0xf03   : > { %13692 = vmatpush1.bf16.msra.mxu1 %v16938_v9 }
 0xf04   : > { %13693 = vmatprep.subr.bf16.mxu1 %v17929_v2  ;;  %v7237_v2 = vand.u32 4294901760, %v16889_v52 }
 0xf06   : > { %v7238_v30 = vsub.f32 %v16889_v52, %v7237_v2  ;;  %v7266_v52 = vsub.f32 %v7264_v41, %v7265_v56 }
 0xf08   : > { %v7239_v17 = vand.u32 4294901760, %v7238_v30  ;;  %v7267_v30 = vand.u32 4294901760, %v7266_v52  ;;  %v17941_v52 = vand.u32 4294901760, %v16583_v33 }
 0xf0a   : > { %v16962_v63 = vpack.c.bf16 %v7246_v4, %v7239_v17  ;;  %v16968_v16 = vpack.c.bf16 %v7274_v60, %v7267_v30  ;;  %v16972_v4 = vpack.c.bf16 %v7230_v23, %v7223_v0  ;;  %v16974_v17 = vpack.c.bf16 %v7244_v51, %v7237_v2 }
 0xf0c   : > { %18032 = vst [vmem:[#allocation28_spill] sm:$0xff] %v16962_v63  ;;  %18034 = vst [vmem:[#allocation30_spill] sm:$0xff] %v16968_v16 }
 0xf0d   : > { %18036 = vst [vmem:[#allocation32_spill] sm:$0xff] %v16972_v4  ;;  %18037 = vst [vmem:[#allocation33_spill] sm:$0xff] %v16974_v17 }
 0xfa9   : > { %v16980_v38 = vpop.f32.mrb[12].mxu1 }
 0xfaa   : > { %18040 = vst [vmem:[#allocation36_spill] sm:$0xff] %v16980_v38  ;;  %v6961_v41 = vsel %vm6960_vm5, %v16980_v38, 0.0  ;;  %v16984_v21 = vpop.f32.mrb[13].mxu1 }
 0xfab   : > { %18041 = vst [vmem:[#allocation37_spill] sm:$0xff] %v16984_v21  ;;  %v6962_v55 = vrot.slane %v6961_v41, 4  ;;  %v6969_v61 = vsel %vm6968_vm6, %v16984_v21, 0.0  ;;  %v6955_v7 = vpop.f32.mrb[14].mxu1 }
 0xfac   : > { %v6970_v2 = vrot.slane %v6969_v61, 4  ;;  %v6956_v0 = vpop.f32.mrb[15].mxu1 }
 0xfad   : > { %v6963_v23 = vadd.f32 %v6962_v55, %v6961_v41  ;;  %v7112_v41 = vsub.f32 %v16583_v33, %v17941_v52  ;;  %v7119_v55 = vsub.f32 %v16585_v57, %v17939_v13  ;;  %v7160_v52 = vand.u32 4294901760, %v16630_v45 }
 0xfae   : > { %v6971_v51 = vadd.f32 %v6970_v2, %v6969_v61  ;;  %v17938_v61 = vand.u32 4294901760, %v16587_v44 }
 0xfaf   : > { %v6964_v20 = vrot.slane %v6963_v23, 2 }
 0xfb0   : > { %v6972_v15 = vrot.slane %v6971_v51, 2 }
 0xfb1   : > { %v6965_v50 = vadd.f32 %v6964_v20, %v6963_v23  ;;  %v17940_v23 = vand.u32 4294901760, %v16591_v28 }
 0xfb2   : > { %v6973_v31 = vadd.f32 %v6972_v15, %v6971_v51  ;;  %v7113_v15 = vand.u32 4294901760, %v7112_v41 }
 0xfb3   : > { %v6966_v56 = vrot.slane %v6965_v50, 1 }
 0xfb4   : > { %v6974_v43 = vrot.slane %v6973_v31, 1 }
 0xfb5   : > { %v6967_v30 = vadd.f32 %v6966_v56, %v6965_v50  ;;  %v7120_v50 = vand.u32 4294901760, %v7119_v55  ;;  %v18042_v55 = vmov 0.0|0.0  }
 0xfb6   : > { %v6975_v60 = vadd.f32 %v6974_v43, %v6973_v31  ;;  %v7126_v31 = vsub.f32 %v16587_v44, %v17938_v61  ;;  %v7133_v43 = vsub.f32 %v16591_v28, %v17940_v23  ;;  %v7153_v23 = vand.u32 4294901760, %v16628_v32 }
 0xfb7   : > { %v16990_v3 = vand.u32 4294901760, %v6967_v30  ;;  %v17022_v61 = vpack.c.bf16 %v7120_v50, %v7113_v15  ;;  %v7161_v50 = vsub.f32 %v16630_v45, %v7160_v52 }
 0xfb8   : > { %v7002_v7 = vsel %vm7000_vm7, %v6975_v60, 0  ;;  %v7127_v13 = vand.u32 4294901760, %v7126_v31  ;;  %v7154_v15 = vsub.f32 %v16628_v32, %v7153_v23  ;;  %v17946_v31 = vand.u32 4294901760, %v16649_v27 }
 0xfb9   : > { %v17000_v2 = vand.u32 4294901760, %v7002_v7  ;;  %v17003_v0 = vsub.f32 %v6967_v30, %v16990_v3  ;;  %18043 = vst [vmem:[#allocation38_spill] sm:$0xff] %v17022_v61  ;;  %v7134_v30 = vand.u32 4294901760, %v7133_v43  ;;  %v18066_v32 = vand.u32 4294901760, %v16668_v46 }
 0xfbb   : > { %v7093_v51 = vsub.f32 %v7002_v7, %v17000_v2  ;;  %v17944_v20 = vand.u32 4294901760, %v17003_v0 }
 0xfbd   : > { %7414 = vmatprep.mubr.f32.mxu0 %v7093_v51  ;;  %v7094_v56 = vand.u32 4294901760, %v7093_v51  ;;  %v7101_v7 = vsub.f32 %v17003_v0, %v17944_v20  ;;  %v18045_v20 = vand.u32 4294901760, %v16612_v12 }
 0xfbe   : > { %7417 = vmatmul.mubr.f32.vlgmr.msra.gmra.mrb[16].mxu0 %v17003_v0 }
 0xfbf   : > { %13767 = vmatpush1.bf16.msra.mxu0 %v16581_v22  ;;  %7513 = vmatprep.mubr.f32.mxu0 %v7094_v56  ;;  %v7095_v41 = vsub.f32 %v7093_v51, %v7094_v56  ;;  %v7147_v37 = vsub.f32 %v16612_v12, %v18045_v20  ;;  %v7102_v51 = vand.u32 4294901760, %v7101_v7  ;;  %v17044_v20 = vpack.c.bf16 %v7134_v30, %v7127_v13 }
 0xfc0   : > { %13768 = vmatprep.subr.bf16.mxu0 %v18042_v55  ;;  %v7141_v56 = vand.u32 4294901760, %v7140_v1  ;;  %v7162_v7 = vand.u32 4294901760, %v7161_v50  ;;  %v17948_v13 = vand.u32 4294901760, %v16668_v46 }
 0xfc1   : > { %v7096_v60 = vand.u32 4294901760, %v7095_v41  ;;  %18046 = vst [vmem:[#allocation39_spill] sm:$0xff] %v17044_v20  ;;  %v7148_v43 = vand.u32 4294901760, %v7147_v37  ;;  %v7168_v41 = vsub.f32 %v16647_v34, %v17947_v6  ;;  %v7181_v37 = vand.u32 4294901760, %v16666_v53 }
 0xfc2   : > { %v7202_v6 = vand.u32 4294901760, %v16680_v48 }
 0xfc3   : > { %13770 = vmatpush1.bf16.msra.mxu0 %v16589_v39  ;;  %7097 = vmatprep.mubr.f32.mxu1 %v7096_v60  ;;  %v7155_v60 = vand.u32 4294901760, %v7154_v15  ;;  %v17056_v1 = vpack.c.bf16 %v7148_v43, %v7141_v56  ;;  %v7169_v15 = vand.u32 4294901760, %v7168_v41  ;;  %v7182_v56 = vsub.f32 %v16666_v53, %v7181_v37  ;;  %v7766_v53 = vld [vmem:[%s17913_s11 + $0x18] sm:$0xff] }
 0xfc4   : > { %7103 = vmatmul.mubr.f32.vlgmr.msra.gmra.mrb[16].mxu1 %v7102_v51  ;;  %13771 = vmatprep.subr.bf16.mxu0 %v18042_v55  ;;  %v7175_v51 = vsub.f32 %v16649_v27, %v17946_v31  ;;  %v7189_v43 = vsub.f32 %v16668_v46, %v17948_v13  ;;  %v7195_v31 = vand.u32 4294901760, %v16678_v36  ;;  %v7203_v13 = vsub.f32 %v16680_v48, %v7202_v6 }
 0xfc5   : > { %13695 = vmatpush1.bf16.msra.mxu1 %v17022_v61  ;;  %7293 = vmatprep.mubr.f32.mxu1 %v17000_v2  ;;  %18047 = vst [vmem:[#allocation40_spill] sm:$0xff] %v17056_v1  ;;  %v17063_v30 = vpack.c.bf16 %v7162_v7, %v7155_v60  ;;  %v7183_v7 = vand.u32 4294901760, %v7182_v56  ;;  %v17168_v45 = vpack.c.bf16 %v18066_v32, %v7181_v37  ;;  %v7768_v37 = vld [vmem:[%s17913_s11 + $0x28] sm:$0xff] }
 0xfc6   : > { %13696 = vmatprep.subr.bf16.mxu1 %v18042_v55  ;;  %v7176_v50 = vand.u32 4294901760, %v7175_v51  ;;  %v7190_v41 = vand.u32 4294901760, %v7189_v43  ;;  %v7196_v51 = vsub.f32 %v16678_v36, %v7195_v31  ;;  %v7204_v56 = vand.u32 4294901760, %v7203_v13  ;;  %v7772_v32 = vld [vmem:[%s17913_s11 + $0x48] sm:$0xff] }
 0xfc7   : > { %13773 = vmatpush1.bf16.msra.mxu0 %v16593_v25  ;;  %18048 = vst [vmem:[#allocation41_spill] sm:$0xff] %v17063_v30  ;;  %v18052_v13 = vand.u32 4294901760, %v16583_v33  ;;  %v18057_v33 = vand.u32 4294901760, %v16591_v28  ;;  %v18063_v28 = vand.u32 4294901760, %v16647_v34  ;;  %18067 = vst [vmem:[#allocation50_spill] sm:$0xff] %v17168_v45  ;;  %v17176_v34 = vpack.c.bf16 %v7202_v6, %v7195_v31 }
 0xfc8   : > { %13774 = vmatprep.subr.bf16.mxu0 %v18042_v55  ;;  %v17077_v60 = vpack.c.bf16 %v7176_v50, %v7169_v15  ;;  %v17090_v15 = vpack.c.bf16 %v7190_v41, %v7183_v7  ;;  %v7197_v50 = vand.u32 4294901760, %v7196_v51  ;;  %v18053_v7 = vand.u32 4294901760, %v16585_v57 }
 0xfc9   : > { %13698 = vmatpush1.bf16.msra.mxu1 %v17044_v20  ;;  %v18055_v51 = vand.u32 4294901760, %v17003_v0  ;;  %v18059_v0 = vand.u32 4294901760, %v16610_v47  ;;  %v18064_v47 = vand.u32 4294901760, %v16649_v27  ;;  %18068 = vst [vmem:[#allocation51_spill] sm:$0xff] %v17176_v34  ;;  %v7764_v27 = vld [vmem:[%s17913_s11 + $0x8] sm:$0xff]  ;;  %v7786_v36 = vand.u32 4294901760, %v7766_v53 }
 0xfca   : > { %13699 = vmatprep.subr.bf16.mxu1 %v18042_v55  ;;  %18049 = vst [vmem:[#allocation42_spill] sm:$0xff] %v17077_v60  ;;  %18050 = vst [vmem:[#allocation43_spill] sm:$0xff] %v17090_v15  ;;  %v17096_v43 = vpack.c.bf16 %v7204_v56, %v7197_v50  ;;  %v17120_v41 = vpack.c.bf16 %v18053_v7, %v18052_v13  ;;  %v18056_v50 = vand.u32 4294901760, %v16587_v44  ;;  %v18060_v56 = vand.u32 4294901760, %v16612_v12 }
 0xfcb   : > { %13776 = vmatpush1.bf16.msra.mxu0 %v16615_v11  ;;  %v17152_v44 = vpack.c.bf16 %v7160_v52, %v7153_v23  ;;  %v17160_v12 = vpack.c.bf16 %v18064_v47, %v18063_v28  ;;  %v7782_v46 = vand.u32 4294901760, %v7764_v27  ;;  %v7763_v52 = vld [vmem:[%s17913_s11] sm:$0xff]  ;;  %v7790_v7 = vand.u32 4294901760, %v7768_v37 }
 0xfcc   : > { %13777 = vmatprep.subr.bf16.mxu0 %v18042_v55  ;;  %18051 = vst [vmem:[#allocation44_spill] sm:$0xff] %v17096_v43  ;;  %18054 = vst [vmem:[#allocation45_spill] sm:$0xff] %v17120_v41  ;;  %v17133_v57 = vpack.c.bf16 %v18057_v33, %v18056_v50  ;;  %v17142_v13 = vpack.c.bf16 %v18060_v56, %v18059_v0  ;;  %v7784_v23 = vand.u32 4294901760, %v7763_v52  ;;  %v7767_v50 = vld [vmem:[%s17913_s11 + $0x20] sm:$0xff]  ;;  %v7769_v33 = vld [vmem:[%s17913_s11 + $0x30] sm:$0xff] }
 0xfcd   : > { %13701 = vmatpush1.bf16.msra.mxu1 %v17056_v1  ;;  %18062 = vst [vmem:[#allocation48_spill] sm:$0xff] %v17152_v44  ;;  %18065 = vst [vmem:[#allocation49_spill] sm:$0xff] %v17160_v12  ;;  %v17222_v48 = vpack.c.bf16 %v7786_v36, %v7782_v46  ;;  %v7792_v0 = vand.u32 4294901760, %v7767_v50  ;;  %v7796_v56 = vand.u32 4294901760, %v7769_v33  ;;  %v17327_v1 = vsub.f32 %v7768_v37, %v7790_v7 }
 0xfce   : > { %13702 = vmatprep.subr.bf16.mxu1 %v18042_v55  ;;  %18058 = vst [vmem:[#allocation46_spill] sm:$0xff] %v17133_v57  ;;  %18061 = vst [vmem:[#allocation47_spill] sm:$0xff] %v17142_v13  ;;  %v17286_v14 = vsub.f32 %v7763_v52, %v7784_v23 }
 0xfcf   : > { %13779 = vmatpush1.bf16.msra.mxu0 %v16633_v35  ;;  %v17252_v47 = vpack.c.bf16 %v7796_v56, %v7792_v0  ;;  %v17332_v21 = vsub.f32 %v7767_v50, %v7792_v0  ;;  %v17981_v38 = vand.u32 4294901760, %v17327_v1  ;;  %v17337_v42 = vsub.f32 %v7769_v33, %v7796_v56 }
 0xfd0   : > { %13780 = vmatprep.subr.bf16.mxu0 %v18042_v55 }
 0xfd1   : > { %13704 = vmatpush1.bf16.msra.mxu1 %v17063_v30 }
 0xfd2   : > { %13705 = vmatprep.subr.bf16.mxu1 %v18042_v55 }
 0xfd3   : > { %13782 = vmatpush1.bf16.msra.mxu0 %v16653_v29 }
 0xfd4   : > { %13783 = vmatprep.subr.bf16.mxu0 %v18042_v55 }
 0xfd5   : > { %13707 = vmatpush1.bf16.msra.mxu1 %v17077_v60 }
 0xfd6   : > { %13708 = vmatprep.subr.bf16.mxu1 %v18042_v55 }
 0xfd7   : > { %13785 = vmatpush1.bf16.msra.mxu0 %v16671_v26 }
 0xfd8   : > { %13786 = vmatprep.subr.bf16.mxu0 %v18042_v55 }
 0xfd9   : > { %13710 = vmatpush1.bf16.msra.mxu1 %v17090_v15 }
 0xfda   : > { %13711 = vmatprep.subr.bf16.mxu1 %v18042_v55 }
 0xfdb   : > { %13788 = vmatpush1.bf16.msra.mxu0 %v16886_v54 }
 0xfdc   : > { %13789 = vmatprep.subr.bf16.mxu0 %v18042_v55 }
 0xfdd   : > { %13713 = vmatpush1.bf16.msra.mxu1 %v17096_v43 }
 0xfde   : > { %13714 = vmatprep.subr.bf16.mxu1 %v18042_v55 }
 0xfdf   : > { %13791 = vmatpush1.bf16.msra.mxu0 %v16906_v24 }
 0xfe0   : > { %13792 = vmatprep.subr.bf16.mxu0 %v18042_v55 }
 0xfe1   : > { %13716 = vmatpush1.bf16.msra.mxu1 %v16950_v18 }
 0xfe2   : > { %13717 = vmatprep.subr.bf16.mxu1 %v18042_v55 }
 0xfe3   : > { %13794 = vmatpush1.bf16.msra.mxu0 %v16926_v49 }
 0xfe4   : > { %13795 = vmatprep.subr.bf16.mxu0 %v18042_v55 }
 0xfe5   : > { %13719 = vmatpush1.bf16.msra.mxu1 %v16956_v62 }
 0xfe6   : > { %13720 = vmatprep.subr.bf16.mxu1 %v18042_v55 }
 0xfe7   : > { %13797 = vmatpush1.bf16.msra.mxu0 %v16930_v19 }
 0xfe8   : > { %13798 = vmatprep.subr.bf16.mxu0 %v18042_v55 }
 0xfe9   : > { %13722 = vmatpush1.bf16.msra.mxu1 %v16962_v63 }
 0xfea   : > { %13723 = vmatprep.subr.bf16.mxu1 %v18042_v55 }
 0xfeb   : > { %13800 = vmatpush1.bf16.msra.mxu0 %v16938_v9 }
 0xfec   : > { %13801 = vmatprep.subr.bf16.mxu0 %v18042_v55 }
 0xfed   : > { %13725 = vmatpush1.bf16.msra.mxu1 %v16966_v10  ;;  %v17977_v10 = vand.u32 4294901760, %v17286_v14 }
 0xfee   : > { %7517 = vmatmul.mubr.f32.vlgmr.msra.gmra.mrb[16].mxu0 %v18055_v51  ;;  %13726 = vmatprep.subr.bf16.mxu1 %v18042_v55 }
 0xfef   : > { %13803 = vmatpush1.bf16.msra.mxu0 %v17120_v41  ;;  %7659 = vmatprep.mubr.f32.mxu0 %v17000_v2  ;;  %v7776_v41 = vld [vmem:[%s17913_s11 + $0x68] sm:$0xff]  ;;  %v7883_v60 = vsub.f32 %v17286_v14, %v17977_v10 }
 0xff0   : > { %13804 = vmatprep.subr.bf16.mxu0 %v18042_v55 }
 0xff1   : > { %13728 = vmatpush1.bf16.msra.mxu1 %v16968_v16 }
 0xff2   : > { %13874 = vmatprep.subr.bf16.mxu1 %v17222_v48 }
 0xff3   : > { %13806 = vmatpush1.bf16.msra.mxu0 %v17133_v57 }
 0xff4   : > { %7295 = vmatmul.mubr.f32.vlgmr.msra.gmra.mrb[16].mxu1 %v16990_v3  ;;  %13807 = vmatprep.subr.bf16.mxu0 %v18042_v55 }
 0xff5   : > { %7862 = vmatprep.mubr.f32.mxu1 %v15003_v59 }
 0xff7   : > { %13809 = vmatpush1.bf16.msra.mxu0 %v17142_v13  ;;  %v17274_v13 = vsub.f32 %v7766_v53, %v7786_v36  ;;  %v7810_v53 = vand.u32 4294901760, %v17284_v5  ;;  %v17300_v36 = vld [vmem:[%s17913_s11 + $0x70] sm:$0xff] }
 0xff8   : > { %13810 = vmatprep.subr.bf16.mxu0 %v18042_v55 }
 0xff9   : > { %v18069_v18 = vand.u32 4294901760, %v17274_v13 }
 0xffb   : > { %13812 = vmatpush1.bf16.msra.mxu0 %v17152_v44  ;;  %v17272_v44 = vsub.f32 %v7764_v27, %v7782_v46  ;;  %v7806_v27 = vand.u32 4294901760, %v7776_v41  ;;  %v17295_v46 = vld [vmem:[%s17913_s11 + $0x60] sm:$0xff]  ;;  %v7889_v43 = vsub.f32 %v17274_v13, %v18069_v18  ;;  %v7884_v18 = vand.u32 4294901760, %v7883_v60 }
 0xffc   : > { %13813 = vmatprep.subr.bf16.mxu0 %v18042_v55  ;;  %v7918_v60 = vand.u32 4294901760, %v17337_v42 }
 0xffd   : > { %v17974_v52 = vand.u32 4294901760, %v17272_v44  ;;  %v17311_v62 = vpack.c.bf16 %v7810_v53, %v7806_v27 }
 0xffe   : > { %v7919_v56 = vsub.f32 %v17337_v42, %v7918_v60 }
 0xfff   : > { %13815 = vmatpush1.bf16.msra.mxu0 %v17160_v12 }
0x1000   : > { %13816 = vmatprep.subr.bf16.mxu0 %v18042_v55 }
0x1003   : > { %13818 = vmatpush1.bf16.msra.mxu0 %v17168_v45 }
0x1004   : > { %13819 = vmatprep.subr.bf16.mxu0 %v18042_v55 }
0x1007   : > { %13821 = vmatpush1.bf16.msra.mxu0 %v17176_v34 }
0x1008   : > { %13822 = vmatprep.subr.bf16.mxu0 %v18042_v55 }
0x100b   : > { %13824 = vmatpush1.bf16.msra.mxu0 %v16970_v58  ;;  %v7773_v58 = vld [vmem:[%s17913_s11 + $0x50] sm:$0xff] }
0x100c   : > { %13825 = vmatprep.subr.bf16.mxu0 %v18042_v55  ;;  %v7804_v45 = vand.u32 4294901760, %v7773_v58 }
0x100f   : > { %13827 = vmatpush1.bf16.msra.mxu0 %v16972_v4  ;;  %v7771_v4 = vld [vmem:[%s17913_s11 + $0x40] sm:$0xff] }
0x1010   : > { %13828 = vmatprep.subr.bf16.mxu0 %v18042_v55  ;;  %v7800_v34 = vand.u32 4294901760, %v7771_v4 }
0x1012   : > { %v17276_v57 = vpack.c.bf16 %v7804_v45, %v7800_v34  ;;  %v7929_v0 = vsub.f32 %v7771_v4, %v7800_v34  ;;  %v7959_v4 = vsub.f32 %v17284_v5, %v7810_v53 }
0x1013   : > { %13830 = vmatpush1.bf16.msra.mxu0 %v16974_v17 }
0x1014   : > { %13831 = vmatprep.subr.bf16.mxu0 %v18042_v55 }
0x1017   : > { %13833 = vmatpush1.bf16.msra.mxu0 %v16976_v40  ;;  %v7798_v40 = vand.u32 4294901760, %v7772_v32 }
0x1018   : > { %13834 = vmatprep.subr.bf16.mxu0 %v18042_v55 }
0x101b   : > { %13836 = vmatpush1.bf16.msra.mxu0 %v16978_v8  ;;  %v7774_v8 = vld [vmem:[%s17913_s11 + $0x58] sm:$0xff] }
0x101c   : > { %13837 = vmatprep.subr.bf16.mxu0 %v18042_v55  ;;  %v7802_v17 = vand.u32 4294901760, %v7774_v8 }
0x101e   : > { %7661 = vmatmul.mubr.f32.vlgmr.msra.gmra.mrb[16].mxu0 %v16990_v3  ;;  %v17270_v12 = vpack.c.bf16 %v7802_v17, %v7798_v40  ;;  %v7935_v33 = vsub.f32 %v7774_v8, %v7802_v17 }
0x101f   : > { %13839 = vmatpush1.bf16.msra.mxu0 %v16581_v22  ;;  %7755 = vmatprep.mubr.f32.mxu0 %v17000_v2  ;;  %v7765_v2 = vld [vmem:[%s17913_s11 + $0x10] sm:$0xff] }
0x1020   : > { %13840 = vmatprep.subr.bf16.mxu0 %v18042_v55  ;;  %v7788_v6 = vand.u32 4294901760, %v7765_v2 }
0x1022   : > { %v17234_v31 = vpack.c.bf16 %v7788_v6, %v7784_v23  ;;  %v17288_v16 = vsub.f32 %v7765_v2, %v7788_v6  ;;  %v7808_v23 = vand.u32 4294901760, %v17295_v46  ;;  %v7812_v6 = vand.u32 4294901760, %v17300_v36 }
0x1023   : > { %13842 = vmatpush1.bf16.msra.mxu0 %v16589_v39  ;;  %v7877_v2 = vsub.f32 %v17272_v44, %v17974_v52  ;;  %v7890_v52 = vand.u32 4294901760, %v7889_v43  ;;  %v17992_v43 = vand.u32 4294901760, %v17332_v21 }
0x1024   : > { %13843 = vmatprep.subr.bf16.mxu0 %v18042_v55  ;;  %13876 = vmatpush1.bf16.msra.mxu1 %v17234_v31  ;;  %v17982_v63 = vand.u32 4294901760, %v17288_v16  ;;  %v17319_v15 = vpack.c.bf16 %v7812_v6, %v7808_v23 }
0x1025   : > { %v7878_v20 = vand.u32 4294901760, %v7877_v2  ;;  %v7941_v2 = vsub.f32 %v7773_v58, %v7804_v45 }
0x1026   : > { %v7895_v30 = vsub.f32 %v17288_v16, %v17982_v63  ;;  %v7920_v63 = vand.u32 4294901760, %v7919_v56 }
0x1027   : > { %13845 = vmatpush1.bf16.msra.mxu0 %v16593_v25  ;;  %v13889_v37 = vpack.c.bf16 %v7890_v52, %v7878_v20  ;;  %v7907_v20 = vsub.f32 %v17332_v21, %v17992_v43 }
0x1028   : > { %13846 = vmatprep.subr.bf16.mxu0 %v18042_v55  ;;  %v7896_v10 = vand.u32 4294901760, %v7895_v30  ;;  %v7923_v30 = vsub.f32 %v7772_v32, %v7798_v40  ;;  %v7936_v40 = vand.u32 4294901760, %v7935_v33  ;;  %v7930_v32 = vand.u32 4294901760, %v7929_v0 }
0x102a   : > { %v7924_v52 = vand.u32 4294901760, %v7923_v30  ;;  %v7931_v43 = vsub.f32 %v7929_v0, %v7930_v32 }
0x102b   : > { %13848 = vmatpush1.bf16.msra.mxu0 %v16615_v11 }
0x102c   : > { %13849 = vmatprep.subr.bf16.mxu0 %v18042_v55 }
0x102f   : > { %13851 = vmatpush1.bf16.msra.mxu0 %v16633_v35 }
0x1030   : > { %13852 = vmatprep.subr.bf16.mxu0 %v18042_v55 }
0x1033   : > { %13854 = vmatpush1.bf16.msra.mxu0 %v16653_v29 }
0x1034   : > { %13855 = vmatprep.subr.bf16.mxu0 %v18042_v55 }
0x1037   : > { %13857 = vmatpush1.bf16.msra.mxu0 %v16671_v26 }
0x1038   : > { %13858 = vmatprep.subr.bf16.mxu0 %v18042_v55 }
0x103b   : > { %13860 = vmatpush1.bf16.msra.mxu0 %v16886_v54 }
0x103c   : > { %13861 = vmatprep.subr.bf16.mxu0 %v18042_v55 }
0x103f   : > { %13863 = vmatpush1.bf16.msra.mxu0 %v16906_v24  ;;  %v7937_v24 = vsub.f32 %v7935_v33, %v7936_v40 }
0x1040   : > { %13864 = vmatprep.subr.bf16.mxu0 %v18042_v55 }
0x1041   : > { %v7938_v45 = vand.u32 4294901760, %v7937_v24 }
0x1043   : > { %13866 = vmatpush1.bf16.msra.mxu0 %v16926_v49 }
0x1044   : > { %13867 = vmatprep.subr.bf16.mxu0 %v18042_v55 }
0x1047   : > { %13869 = vmatpush1.bf16.msra.mxu0 %v16930_v19  ;;  %v7942_v19 = vand.u32 4294901760, %v7941_v2 }
0x1048   : > { %13870 = vmatprep.subr.bf16.mxu0 %v18042_v55 }
0x1049   : > { %v7943_v34 = vsub.f32 %v7941_v2, %v7942_v19 }
0x104b   : > { %13872 = vmatpush1.bf16.msra.mxu0 %v16938_v9  ;;  %v7925_v9 = vsub.f32 %v7923_v30, %v7924_v52 }
0x104c   : > { %14186 = vmatprep.subr.bf16.mxu0 %v17222_v48 }
0x104d   : > { %v7926_v8 = vand.u32 4294901760, %v7925_v9 }
0x104e   : > { %7757 = vmatmul.mubr.f32.vlgmr.msra.gmra.mrb[16].mxu0 %v16990_v3  ;;  %v7770_v3 = vld [vmem:[%s17913_s11 + $0x38] sm:$0xff] }
0x104f   : > { %9302 = vmatprep.mubr.f32.mxu0 %v15003_v59  ;;  %v7794_v51 = vand.u32 4294901760, %v7770_v3  ;;  %14188 = vmatpush1.bf16.msra.mxu0 %v17234_v31 }
0x1051   : > { %v17250_v28 = vpack.c.bf16 %v7794_v51, %v7790_v7  ;;  %v17330_v61 = vsub.f32 %v7770_v3, %v7794_v51  ;;  %v17342_v3 = vpack.c.bf16 %v7896_v10, %v7884_v18  ;;  %v7901_v51 = vsub.f32 %v17327_v1, %v17981_v38 }
0x1052   : > { %v7908_v38 = vand.u32 4294901760, %v7907_v20  ;;  %v7944_v20 = vand.u32 4294901760, %v7943_v34  ;;  %v17386_v34 = vpack.c.bf16 %v7935_v33, %v7923_v30  ;;  %v18074_v33 = vand.u32 4294901760, %v17327_v1 }
0x1053   : > { %13878 = vmatprep.subr.bf16.mxu1 %v17250_v28  ;;  %14190 = vmatprep.subr.bf16.mxu0 %v17250_v28  ;;  %v17987_v7 = vand.u32 4294901760, %v17330_v61  ;;  %v7902_v10 = vand.u32 4294901760, %v7901_v51  ;;  %v7960_v51 = vand.u32 4294901760, %v7959_v4 }
0x1054   : > { %13880 = vmatpush1.bf16.msra.mxu1 %v17252_v47  ;;  %14192 = vmatpush1.bf16.msra.mxu0 %v17252_v47  ;;  %v17358_v17 = vpack.c.bf16 %v7920_v63, %v7908_v38 }
0x1055   : > { %13882 = vmatprep.subr.bf16.mxu1 %v17270_v12  ;;  %14194 = vmatprep.subr.bf16.mxu0 %v17270_v12  ;;  %v7913_v50 = vsub.f32 %v17330_v61, %v17987_v7  ;;  %v7947_v7 = vsub.f32 %v7776_v41, %v7806_v27  ;;  %v7965_v41 = vsub.f32 %v17300_v36, %v7812_v6 }
0x1056   : > { %v17362_v27 = vpack.c.bf16 %v7938_v45, %v7926_v8  ;;  %v17372_v36 = vpack.c.bf16 %v17274_v13, %v17272_v44  ;;  %v17380_v6 = vpack.c.bf16 %v17330_v61, %v17327_v1  ;;  %v17384_v8 = vpack.c.bf16 %v17337_v42, %v17332_v21 }
0x1057   : > { %v7914_v18 = vand.u32 4294901760, %v7913_v50  ;;  %v7948_v58 = vand.u32 4294901760, %v7947_v7  ;;  %v7953_v50 = vsub.f32 %v17295_v46, %v7808_v23  ;;  %v7966_v63 = vand.u32 4294901760, %v7965_v41 }
0x1058   : > { %13884 = vmatpush1.bf16.msra.mxu1 %v17276_v57  ;;  %14196 = vmatpush1.bf16.msra.mxu0 %v17276_v57  ;;  %v17376_v23 = vpack.c.bf16 %v17288_v16, %v17286_v14  ;;  %v17388_v45 = vpack.c.bf16 %v7941_v2, %v7929_v0  ;;  %v18073_v42 = vand.u32 4294901760, %v17288_v16  ;;  %v18075_v0 = vand.u32 4294901760, %v17330_v61 }
0x1059   : > { %13886 = vmatprep.subr.bf16.mxu1 %v17311_v62  ;;  %14198 = vmatprep.subr.bf16.mxu0 %v17311_v62  ;;  %v17355_v49 = vpack.c.bf16 %v7914_v18, %v7902_v10  ;;  %v7949_v56 = vsub.f32 %v7947_v7, %v7948_v58  ;;  %v7961_v10 = vsub.f32 %v7959_v4, %v7960_v51  ;;  %v7954_v18 = vand.u32 4294901760, %v7953_v50 }
0x105a   : > { %v7967_v53 = vsub.f32 %v7965_v41, %v7966_v63  ;;  %v18076_v2 = vand.u32 4294901760, %v17332_v21 }
0x105b   : > { %v7950_v5 = vand.u32 4294901760, %v7949_v56  ;;  %v7962_v9 = vand.u32 4294901760, %v7961_v10  ;;  %v7955_v38 = vsub.f32 %v7953_v50, %v7954_v18  ;;  %v17392_v56 = vpack.c.bf16 %v7965_v41, %v7953_v50 }
0x105c   : > { %13888 = vmatpush1.bf16.msra.mxu1 %v17319_v15  ;;  %14200 = vmatpush1.bf16.msra.mxu0 %v17319_v15  ;;  %v7968_v26 = vand.u32 4294901760, %v7967_v53  ;;  %v18070_v10 = vand.u32 4294901760, %v17272_v44  ;;  %v17416_v44 = vpack.c.bf16 %v7936_v40, %v7924_v52  ;;  %v17420_v50 = vpack.c.bf16 %v7960_v51, %v7948_v58  ;;  %v18078_v52 = vld [vmem:[#allocation18_spill] sm:$0xff]  ;;  %v18079_v40 = vld [vmem:[#allocation20_spill] sm:$0xff]  ;;  %v18081_v58 = vld [vmem:[#allocation23_spill] sm:$0xff] }
0x105d   : > { %13890 = vmatprep.subr.bf16.mxu1 %v13889_v37  ;;  %14202 = vmatprep.subr.bf16.mxu0 %v13889_v37  ;;  %v7932_v37 = vand.u32 4294901760, %v7931_v43  ;;  %v17366_v24 = vpack.c.bf16 %v7962_v9, %v7950_v5  ;;  %v7956_v43 = vand.u32 4294901760, %v7955_v38  ;;  %v18071_v5 = vand.u32 4294901760, %v17274_v13  ;;  %v18082_v51 = vld [vmem:[#allocation25_spill] sm:$0xff] }
0x105e   : > { %v18072_v38 = vand.u32 4294901760, %v17286_v14  ;;  %v17418_v13 = vpack.c.bf16 %v7942_v19, %v7930_v32  ;;  %v17422_v14 = vpack.c.bf16 %v7966_v63, %v7954_v18  ;;  %v18077_v19 = vld [vmem:[#allocation13_spill] sm:$0xff]  ;;  %v18080_v32 = vld [vmem:[#allocation22_spill] sm:$0xff]  ;;  %v18083_v63 = vld [vmem:[#allocation7_spill] sm:$0xff] }
0x105f   : > { %v17364_v54 = vpack.c.bf16 %v7944_v20, %v7932_v37  ;;  %v17368_v46 = vpack.c.bf16 %v7968_v26, %v7956_v43  ;;  %v17390_v20 = vpack.c.bf16 %v7959_v4, %v7947_v7  ;;  %v17398_v9 = vpack.c.bf16 %v18071_v5, %v18070_v10 }
0x1060   : > { %v17404_v30 = vpack.c.bf16 %v18073_v42, %v18072_v38  ;;  %v17410_v7 = vpack.c.bf16 %v18075_v0, %v18074_v33  ;;  %v17414_v4 = vpack.c.bf16 %v7918_v60, %v18076_v2  ;;  %v18084_v42 = vld [vmem:[#allocation36_spill] sm:$0xff]  ;;  %v18086_v0 = vld [vmem:[#allocation37_spill] sm:$0xff] }
0x10c7   : > { %v7296_v26 = vpop.f32.mrb[16].mxu1 }
0x10c8   : > { %v7298_v37 = vpop.f32.mrb[17].mxu1 }
0x1121   : > { %v7758_v16 = vpop.f32.mrb[16].mxu0 }
0x1122   : > { %v14281_v41 = vadd.f32 %v7758_v16, %v7296_v26  ;;  %v7760_v53 = vpop.f32.mrb[17].mxu0 }
0x1124   : > { %v7762_v1 = vmul.f32 0.11111111, %v14281_v41 }
0x1126   : > { %v7780_v61 = vsel %vm7000_vm7, %v7762_v1, 0 }
0x1127   : > { %v7863_v43 = vand.u32 4294901760, %v7780_v61 }
0x1129   : > { %v7864_v37 = vsub.f32 %v7780_v61, %v7863_v43 }
0x112b   : > { %v7865_v10 = vand.u32 4294901760, %v7864_v37 }
0x112d   : > { %v7866_v21 = vsub.f32 %v7864_v37, %v7865_v10 }
0x112f   : > { %v7867_v60 = vand.u32 4294901760, %v7866_v21 }
0x1131   : > { %7868 = vmatmul.mubr.f32.vlgmr.msra.gmra.mrb[18].mxu1 %v7867_v60 }
0x1132   : > { %13892 = vmatpush1.bf16.msra.mxu1 %v17342_v3  ;;  %8018 = vmatprep.mubr.f32.mxu1 %v15003_v59 }
0x1133   : > { %13894 = vmatprep.subr.bf16.mxu1 %v17355_v49 }
0x1136   : > { %13896 = vmatpush1.bf16.msra.mxu1 %v17358_v17 }
0x1137   : > { %13898 = vmatprep.subr.bf16.mxu1 %v17362_v27 }
0x113a   : > { %13900 = vmatpush1.bf16.msra.mxu1 %v17364_v54 }
0x113b   : > { %13902 = vmatprep.subr.bf16.mxu1 %v17366_v24 }
0x113e   : > { %13904 = vmatpush1.bf16.msra.mxu1 %v17368_v46 }
0x113f   : > { %13906 = vmatprep.subr.bf16.mxu1 %v17372_v36 }
0x1141   : > { %8020 = vmatmul.mubr.f32.vlgmr.msra.gmra.mrb[18].mxu1 %v7863_v43 }
0x1142   : > { %13908 = vmatpush1.bf16.msra.mxu1 %v17376_v23  ;;  %8122 = vmatprep.mubr.f32.mxu1 %v15003_v59 }
0x1143   : > { %13910 = vmatprep.subr.bf16.mxu1 %v17380_v6 }
0x1146   : > { %13912 = vmatpush1.bf16.msra.mxu1 %v17384_v8 }
0x1147   : > { %13914 = vmatprep.subr.bf16.mxu1 %v17386_v34 }
0x114a   : > { %13916 = vmatpush1.bf16.msra.mxu1 %v17388_v45 }
0x114b   : > { %13918 = vmatprep.subr.bf16.mxu1 %v17390_v20 }
0x114e   : > { %13920 = vmatpush1.bf16.msra.mxu1 %v17392_v56 }
0x114f   : > { %13922 = vmatprep.subr.bf16.mxu1 %v17222_v48 }
0x1151   : > { %8125 = vmatmul.mubr.f32.vlgmr.msra.gmra.mrb[18].mxu1 %v7864_v37 }
0x1152   : > { %13924 = vmatpush1.bf16.msra.mxu1 %v17234_v31  ;;  %8211 = vmatprep.mubr.f32.mxu1 %v15003_v59 }
0x1153   : > { %13926 = vmatprep.subr.bf16.mxu1 %v17250_v28 }
0x1156   : > { %13928 = vmatpush1.bf16.msra.mxu1 %v17252_v47 }
0x1157   : > { %13930 = vmatprep.subr.bf16.mxu1 %v17270_v12 }
0x115a   : > { %13932 = vmatpush1.bf16.msra.mxu1 %v17276_v57 }
0x115b   : > { %13934 = vmatprep.subr.bf16.mxu1 %v17311_v62 }
0x115e   : > { %13936 = vmatpush1.bf16.msra.mxu1 %v17319_v15 }
0x115f   : > { %13938 = vmatprep.subr.bf16.mxu1 %v17398_v9 }
0x1161   : > { %8215 = vmatmul.mubr.f32.vlgmr.msra.gmra.mrb[18].mxu1 %v7865_v10 }
0x1162   : > { %13940 = vmatpush1.bf16.msra.mxu1 %v17404_v30  ;;  %8333 = vmatprep.mubr.f32.mxu1 %v15003_v59 }
0x1163   : > { %13942 = vmatprep.subr.bf16.mxu1 %v17410_v7 }
0x1166   : > { %13944 = vmatpush1.bf16.msra.mxu1 %v17414_v4 }
0x1167   : > { %13946 = vmatprep.subr.bf16.mxu1 %v17416_v44 }
0x116a   : > { %13948 = vmatpush1.bf16.msra.mxu1 %v17418_v13 }
0x116b   : > { %13950 = vmatprep.subr.bf16.mxu1 %v17420_v50 }
0x116e   : > { %13952 = vmatpush1.bf16.msra.mxu1 %v17422_v14 }
0x116f   : > { %13954 = vmatprep.subr.bf16.mxu1 %v17222_v48 }
0x1171   : > { %8335 = vmatmul.mubr.f32.vlgmr.msra.gmra.mrb[18].mxu1 %v7863_v43 }
0x1172   : > { %13956 = vmatpush1.bf16.msra.mxu1 %v17234_v31  ;;  %8421 = vmatprep.mubr.f32.mxu1 %v15003_v59 }
0x1173   : > { %13958 = vmatprep.subr.bf16.mxu1 %v17250_v28 }
0x1176   : > { %13960 = vmatpush1.bf16.msra.mxu1 %v17252_v47 }
0x1177   : > { %13962 = vmatprep.subr.bf16.mxu1 %v17270_v12 }
0x117a   : > { %13964 = vmatpush1.bf16.msra.mxu1 %v17276_v57 }
0x117b   : > { %13966 = vmatprep.subr.bf16.mxu1 %v17311_v62 }
0x117e   : > { %13968 = vmatpush1.bf16.msra.mxu1 %v17319_v15 }
0x117f   : > { %13969 = vmatprep.subr.bf16.mxu1 %v18042_v55 }
0x1181   : > { %8423 = vmatmul.mubr.f32.vlgmr.msra.gmra.mrb[18].mxu1 %v7863_v43 }
0x1182   : > { %13971 = vmatpush1.bf16.msra.mxu1 %v16581_v22 }
0x1183   : > { %13972 = vmatprep.subr.bf16.mxu1 %v18042_v55 }
0x1186   : > { %13974 = vmatpush1.bf16.msra.mxu1 %v16589_v39 }
0x1187   : > { %13975 = vmatprep.subr.bf16.mxu1 %v18042_v55 }
0x118a   : > { %13977 = vmatpush1.bf16.msra.mxu1 %v16593_v25 }
0x118b   : > { %13978 = vmatprep.subr.bf16.mxu1 %v18042_v55 }
0x118e   : > { %13980 = vmatpush1.bf16.msra.mxu1 %v16615_v11 }
0x118f   : > { %13981 = vmatprep.subr.bf16.mxu1 %v18042_v55 }
0x1192   : > { %13983 = vmatpush1.bf16.msra.mxu1 %v16633_v35 }
0x1193   : > { %13984 = vmatprep.subr.bf16.mxu1 %v18042_v55 }
0x1196   : > { %13986 = vmatpush1.bf16.msra.mxu1 %v16653_v29 }
0x1197   : > { %13987 = vmatprep.subr.bf16.mxu1 %v18042_v55 }
0x119a   : > { %13989 = vmatpush1.bf16.msra.mxu1 %v18077_v19 }
0x119b   : > { %13990 = vmatprep.subr.bf16.mxu1 %v18042_v55 }
0x119e   : > { %13992 = vmatpush1.bf16.msra.mxu1 %v18078_v52 }
0x119f   : > { %13993 = vmatprep.subr.bf16.mxu1 %v18042_v55 }
0x11a2   : > { %13995 = vmatpush1.bf16.msra.mxu1 %v18079_v40 }
0x11a3   : > { %13996 = vmatprep.subr.bf16.mxu1 %v18042_v55 }
0x11a6   : > { %13998 = vmatpush1.bf16.msra.mxu1 %v18080_v32 }
0x11a7   : > { %13999 = vmatprep.subr.bf16.mxu1 %v18042_v55 }
0x11aa   : > { %14001 = vmatpush1.bf16.msra.mxu1 %v18081_v58 }
0x11ab   : > { %14002 = vmatprep.subr.bf16.mxu1 %v18042_v55 }
0x11ae   : > { %14004 = vmatpush1.bf16.msra.mxu1 %v18082_v51 }
0x11af   : > { %14005 = vmatprep.subr.bf16.mxu1 %v18042_v55 }
0x1254   : > { %v8424_v18 = vpop.f32.mrb[18].mxu1 }
0x1255   : > { %v8432_v26 = vrot.slane %v8424_v18, %v18083_v63  ;;  %v8426_v5 = vpop.f32.mrb[19].mxu1 }
0x1256   : > { %v8436_v38 = vrot.slane %v8426_v5, %v18083_v63 }
0x1257   : > { %v17497_v33 = vsub.f32 %v18084_v42, %v8432_v26 }
0x1258   : > { %v17500_v2 = vsub.f32 %v18086_v0, %v8436_v38 }
0x1259   : > { %18085 = vst [vmem:[#allocation13_spill] sm:$0xff] %v17497_v33  ;;  %v8439_v16 = vmul.f32 %v17497_v33, %v17497_v33 }
0x125a   : > { %18087 = vst [vmem:[#allocation18_spill] sm:$0xff] %v17500_v2  ;;  %v8440_v41 = vmul.f32 %v17500_v2, %v17500_v2 }
0x125b   : > { %v8441_v53 = vsel %vm6960_vm5, %v8439_v16, 0.0 }
0x125c   : > { %v8442_v1 = vrot.slane %v8441_v53, 4  ;;  %v8448_v61 = vsel %vm6968_vm6, %v8440_v41, 0.0 }
0x125d   : > { %v8449_v43 = vrot.slane %v8448_v61, 4 }
0x125e   : > { %v8443_v37 = vadd.f32 %v8442_v1, %v8441_v53 }
0x125f   : > { %v8450_v10 = vadd.f32 %v8449_v43, %v8448_v61 }
0x1260   : > { %v8444_v21 = vrot.slane %v8443_v37, 2 }
0x1261   : > { %v8451_v60 = vrot.slane %v8450_v10, 2 }
0x1262   : > { %v8445_v18 = vadd.f32 %v8444_v21, %v8443_v37  ;;  %v18088_v21 = vld [vmem:[#allocation38_spill] sm:$0xff] }
0x1263   : > { %v8452_v26 = vadd.f32 %v8451_v60, %v8450_v10  ;;  %v18089_v60 = vld [vmem:[#allocation39_spill] sm:$0xff] }
0x1264   : > { %v8446_v5 = vrot.slane %v8445_v18, 1 }
0x1265   : > { %v8453_v38 = vrot.slane %v8452_v26, 1 }
0x1266   : > { %v8447_v42 = vadd.f32 %v8446_v5, %v8445_v18  ;;  %v18091_v18 = vld [vmem:[#allocation41_spill] sm:$0xff]  ;;  %v18093_v5 = vld [vmem:[#allocation43_spill] sm:$0xff] }
0x1267   : > { %v8454_v0 = vadd.f32 %v8453_v38, %v8452_v26  ;;  %v18092_v26 = vld [vmem:[#allocation42_spill] sm:$0xff]  ;;  %v18094_v38 = vld [vmem:[#allocation44_spill] sm:$0xff] }
0x1268   : > { %v17508_v33 = vand.u32 4294901760, %v8447_v42 }
0x1269   : > { %v8456_v2 = vsel %vm7000_vm7, %v8454_v0, 0  ;;  %v18096_v0 = vld [vmem:[#allocation27_spill] sm:$0xff] }
0x126a   : > { %v17511_v63 = vand.u32 4294901760, %v8456_v2  ;;  %v17514_v16 = vsub.f32 %v8447_v42, %v17508_v33  ;;  %v18095_v42 = vld [vmem:[#allocation26_spill] sm:$0xff] }
0x126c   : > { %v8547_v41 = vsub.f32 %v8456_v2, %v17511_v63  ;;  %v8554_v53 = vand.u32 4294901760, %v17514_v16  ;;  %v18090_v2 = vld [vmem:[#allocation40_spill] sm:$0xff] }
0x126e   : > { %v8548_v1 = vand.u32 4294901760, %v8547_v41  ;;  %v8555_v61 = vsub.f32 %v17514_v16, %v8554_v53 }
0x1270   : > { %v8549_v43 = vsub.f32 %v8547_v41, %v8548_v1  ;;  %v8556_v10 = vand.u32 4294901760, %v8555_v61  ;;  %v18097_v61 = vld [vmem:[#allocation28_spill] sm:$0xff] }
0x1272   : > { %v8550_v37 = vand.u32 4294901760, %v8549_v43  ;;  %v18098_v43 = vld [vmem:[#allocation29_spill] sm:$0xff] }
0x1274   : > { %8551 = vmatprep.mubr.f32.mxu1 %v8550_v37  ;;  %v18099_v37 = vld [vmem:[#allocation30_spill] sm:$0xff] }
0x1275   : > { %8557 = vmatmul.mubr.f32.vlgmr.msra.gmra.mrb[20].mxu1 %v8556_v10  ;;  %v18100_v10 = vld [vmem:[#allocation8_spill] sm:$0xff] }
0x1276   : > { %14007 = vmatpush1.bf16.msra.mxu1 %v18088_v21  ;;  %8747 = vmatprep.mubr.f32.mxu1 %v17511_v63  ;;  %v18101_v21 = vld [vmem:[#allocation9_spill] sm:$0xff] }
0x1277   : > { %14008 = vmatprep.subr.bf16.mxu1 %v18042_v55 }
0x127a   : > { %14010 = vmatpush1.bf16.msra.mxu1 %v18089_v60  ;;  %v18102_v60 = vld [vmem:[#allocation10_spill] sm:$0xff] }
0x127b   : > { %14011 = vmatprep.subr.bf16.mxu1 %v18042_v55 }
0x127e   : > { %14013 = vmatpush1.bf16.msra.mxu1 %v18090_v2  ;;  %v18103_v2 = vld [vmem:[#allocation11_spill] sm:$0xff] }
0x127f   : > { %14014 = vmatprep.subr.bf16.mxu1 %v18042_v55 }
0x1282   : > { %14016 = vmatpush1.bf16.msra.mxu1 %v18091_v18  ;;  %v18104_v18 = vld [vmem:[#allocation12_spill] sm:$0xff] }
0x1283   : > { %14017 = vmatprep.subr.bf16.mxu1 %v18042_v55 }
0x1286   : > { %14019 = vmatpush1.bf16.msra.mxu1 %v18092_v26  ;;  %v18105_v26 = vld [vmem:[#allocation14_spill] sm:$0xff] }
0x1287   : > { %14020 = vmatprep.subr.bf16.mxu1 %v18042_v55 }
0x128a   : > { %14022 = vmatpush1.bf16.msra.mxu1 %v18093_v5  ;;  %v18107_v5 = vld [vmem:[#allocation16_spill] sm:$0xff] }
0x128b   : > { %14023 = vmatprep.subr.bf16.mxu1 %v18042_v55 }
0x128e   : > { %14025 = vmatpush1.bf16.msra.mxu1 %v18094_v38  ;;  %v18108_v38 = vld [vmem:[#allocation17_spill] sm:$0xff] }
0x128f   : > { %14026 = vmatprep.subr.bf16.mxu1 %v18042_v55 }
0x1292   : > { %14028 = vmatpush1.bf16.msra.mxu1 %v18095_v42  ;;  %v18109_v42 = vld [vmem:[#allocation19_spill] sm:$0xff] }
0x1293   : > { %14029 = vmatprep.subr.bf16.mxu1 %v18042_v55 }
0x1296   : > { %14031 = vmatpush1.bf16.msra.mxu1 %v18096_v0  ;;  %v18110_v0 = vld [vmem:[#allocation21_spill] sm:$0xff] }
0x1297   : > { %14032 = vmatprep.subr.bf16.mxu1 %v18042_v55 }
0x129a   : > { %14034 = vmatpush1.bf16.msra.mxu1 %v18097_v61  ;;  %v18111_v61 = vld [vmem:[#allocation24_spill] sm:$0xff] }
0x129b   : > { %14035 = vmatprep.subr.bf16.mxu1 %v18042_v55 }
0x129e   : > { %14037 = vmatpush1.bf16.msra.mxu1 %v18098_v43  ;;  %v18113_v43 = vld [vmem:[#allocation46_spill] sm:$0xff] }
0x129f   : > { %14038 = vmatprep.subr.bf16.mxu1 %v18042_v55 }
0x12a2   : > { %14040 = vmatpush1.bf16.msra.mxu1 %v18099_v37  ;;  %v18114_v37 = vld [vmem:[#allocation47_spill] sm:$0xff] }
0x12a3   : > { %14041 = vmatprep.subr.bf16.mxu1 %v18042_v55 }
0x12a5   : > { %8749 = vmatmul.mubr.f32.vlgmr.msra.gmra.mrb[20].mxu1 %v17508_v33 }
0x12a6   : > { %14043 = vmatpush1.bf16.msra.mxu1 %v18100_v10  ;;  %8868 = vmatprep.mubr.f32.mxu1 %v8547_v41  ;;  %v18106_v41 = vld [vmem:[#allocation15_spill] sm:$0xff]  ;;  %v18115_v10 = vld [vmem:[#allocation48_spill] sm:$0xff] }
0x12a7   : > { %14044 = vmatprep.subr.bf16.mxu1 %v18042_v55 }
0x12aa   : > { %14046 = vmatpush1.bf16.msra.mxu1 %v18101_v21  ;;  %v18118_v21 = vld [vmem:[#allocation51_spill] sm:$0xff] }
0x12ab   : > { %14047 = vmatprep.subr.bf16.mxu1 %v18042_v55 }
0x12ae   : > { %14049 = vmatpush1.bf16.msra.mxu1 %v18102_v60  ;;  %v18119_v60 = vld [vmem:[#allocation31_spill] sm:$0xff] }
0x12af   : > { %14050 = vmatprep.subr.bf16.mxu1 %v18042_v55 }
0x12b2   : > { %14052 = vmatpush1.bf16.msra.mxu1 %v18103_v2  ;;  %v18120_v2 = vld [vmem:[#allocation32_spill] sm:$0xff] }
0x12b3   : > { %14053 = vmatprep.subr.bf16.mxu1 %v18042_v55 }
0x12b6   : > { %14055 = vmatpush1.bf16.msra.mxu1 %v18104_v18  ;;  %v18121_v18 = vld [vmem:[#allocation33_spill] sm:$0xff] }
0x12b7   : > { %14056 = vmatprep.subr.bf16.mxu1 %v18042_v55 }
0x12ba   : > { %14058 = vmatpush1.bf16.msra.mxu1 %v18105_v26  ;;  %v18122_v26 = vld [vmem:[#allocation34_spill] sm:$0xff] }
0x12bb   : > { %14059 = vmatprep.subr.bf16.mxu1 %v18042_v55 }
0x12be   : > { %14061 = vmatpush1.bf16.msra.mxu1 %v18106_v41  ;;  %v18123_v41 = vld [vmem:[#allocation35_spill] sm:$0xff] }
0x12bf   : > { %14062 = vmatprep.subr.bf16.mxu1 %v18042_v55 }
0x12c2   : > { %14064 = vmatpush1.bf16.msra.mxu1 %v18107_v5 }
0x12c3   : > { %14065 = vmatprep.subr.bf16.mxu1 %v18042_v55 }
0x12c6   : > { %14067 = vmatpush1.bf16.msra.mxu1 %v18108_v38 }
0x12c7   : > { %14068 = vmatprep.subr.bf16.mxu1 %v18042_v55 }
0x12ca   : > { %14070 = vmatpush1.bf16.msra.mxu1 %v18109_v42 }
0x12cb   : > { %14071 = vmatprep.subr.bf16.mxu1 %v18042_v55 }
0x12ce   : > { %14073 = vmatpush1.bf16.msra.mxu1 %v18110_v0 }
0x12cf   : > { %14074 = vmatprep.subr.bf16.mxu1 %v18042_v55 }
0x12d2   : > { %14076 = vmatpush1.bf16.msra.mxu1 %v18111_v61  ;;  %v14683_v61 = vld [vmem:[%s17907_s5] sm:$0xff]  }
0x12d3   : > { %14077 = vmatprep.subr.bf16.mxu1 %v18042_v55 }
0x12d5   : > { %8871 = vmatmul.mubr.f32.vlgmr.msra.gmra.mrb[20].mxu1 %v17514_v16  ;;  %v18116_v16 = vld [vmem:[#allocation49_spill] sm:$0xff] }
0x12d6   : > { %14079 = vmatpush1.bf16.msra.mxu1 %v16581_v22  ;;  %8967 = vmatprep.mubr.f32.mxu1 %v8548_v1  ;;  %v18112_v1 = vld [vmem:[#allocation45_spill] sm:$0xff] }
0x12d7   : > { %14080 = vmatprep.subr.bf16.mxu1 %v18042_v55 }
0x12da   : > { %14082 = vmatpush1.bf16.msra.mxu1 %v16589_v39 }
0x12db   : > { %14083 = vmatprep.subr.bf16.mxu1 %v18042_v55 }
0x12de   : > { %14085 = vmatpush1.bf16.msra.mxu1 %v16593_v25 }
0x12df   : > { %14086 = vmatprep.subr.bf16.mxu1 %v18042_v55 }
0x12e2   : > { %14088 = vmatpush1.bf16.msra.mxu1 %v16615_v11 }
0x12e3   : > { %14089 = vmatprep.subr.bf16.mxu1 %v18042_v55 }
0x12e6   : > { %14091 = vmatpush1.bf16.msra.mxu1 %v16633_v35 }
0x12e7   : > { %14092 = vmatprep.subr.bf16.mxu1 %v18042_v55 }
0x12ea   : > { %14094 = vmatpush1.bf16.msra.mxu1 %v16653_v29 }
0x12eb   : > { %14095 = vmatprep.subr.bf16.mxu1 %v18042_v55 }
0x12ee   : > { %14097 = vmatpush1.bf16.msra.mxu1 %v18077_v19 }
0x12ef   : > { %14098 = vmatprep.subr.bf16.mxu1 %v18042_v55 }
0x12f2   : > { %14100 = vmatpush1.bf16.msra.mxu1 %v18078_v52 }
0x12f3   : > { %14101 = vmatprep.subr.bf16.mxu1 %v18042_v55 }
0x12f6   : > { %14103 = vmatpush1.bf16.msra.mxu1 %v18079_v40 }
0x12f7   : > { %14104 = vmatprep.subr.bf16.mxu1 %v18042_v55 }
0x12fa   : > { %14106 = vmatpush1.bf16.msra.mxu1 %v18080_v32 }
0x12fb   : > { %14107 = vmatprep.subr.bf16.mxu1 %v18042_v55 }
0x12fe   : > { %14109 = vmatpush1.bf16.msra.mxu1 %v18081_v58 }
0x12ff   : > { %14110 = vmatprep.subr.bf16.mxu1 %v18042_v55 }
0x1302   : > { %14112 = vmatpush1.bf16.msra.mxu1 %v18082_v51 }
0x1303   : > { %14113 = vmatprep.subr.bf16.mxu1 %v18042_v55 }
0x1305   : > { %8971 = vmatmul.mubr.f32.vlgmr.msra.gmra.mrb[20].mxu1 %v8554_v53  ;;  %v18117_v53 = vld [vmem:[#allocation50_spill] sm:$0xff] }
0x1306   : > { %14115 = vmatpush1.bf16.msra.mxu1 %v18112_v1  ;;  %9113 = vmatprep.mubr.f32.mxu1 %v17511_v63 }
0x1307   : > { %14116 = vmatprep.subr.bf16.mxu1 %v18042_v55 }
0x130a   : > { %14118 = vmatpush1.bf16.msra.mxu1 %v18113_v43 }
0x130b   : > { %14119 = vmatprep.subr.bf16.mxu1 %v18042_v55 }
0x130e   : > { %14121 = vmatpush1.bf16.msra.mxu1 %v18114_v37  ;;  %v14684_v37 = vld [vmem:[%s17907_s5 + $0x8] sm:$0xff]  }
0x130f   : > { %14122 = vmatprep.subr.bf16.mxu1 %v18042_v55 }
0x1312   : > { %14124 = vmatpush1.bf16.msra.mxu1 %v18115_v10  ;;  %v14685_v10 = vld [vmem:[%s17907_s5 + $0x10] sm:$0xff]  }
0x1313   : > { %14125 = vmatprep.subr.bf16.mxu1 %v18042_v55 }
0x1316   : > { %14127 = vmatpush1.bf16.msra.mxu1 %v18116_v16  ;;  %v14686_v16 = vld [vmem:[%s17907_s5 + $0x18] sm:$0xff]  }
0x1317   : > { %14128 = vmatprep.subr.bf16.mxu1 %v18042_v55 }
0x131a   : > { %14130 = vmatpush1.bf16.msra.mxu1 %v18117_v53  ;;  %v14687_v53 = vld [vmem:[%s17907_s5 + $0x20] sm:$0xff]  }
0x131b   : > { %14131 = vmatprep.subr.bf16.mxu1 %v18042_v55 }
0x131e   : > { %14133 = vmatpush1.bf16.msra.mxu1 %v18118_v21  ;;  %v14688_v21 = vld [vmem:[%s17907_s5 + $0x28] sm:$0xff]  }
0x131f   : > { %14134 = vmatprep.subr.bf16.mxu1 %v18042_v55 }
0x1322   : > { %14136 = vmatpush1.bf16.msra.mxu1 %v18119_v60  ;;  %v14689_v60 = vld [vmem:[%s17907_s5 + $0x30] sm:$0xff]  }
0x1323   : > { %14137 = vmatprep.subr.bf16.mxu1 %v18042_v55 }
0x1326   : > { %14139 = vmatpush1.bf16.msra.mxu1 %v18120_v2  ;;  %v14690_v2 = vld [vmem:[%s17907_s5 + $0x38] sm:$0xff]  }
0x1327   : > { %14140 = vmatprep.subr.bf16.mxu1 %v18042_v55 }
0x132a   : > { %14142 = vmatpush1.bf16.msra.mxu1 %v18121_v18  ;;  %v14691_v18 = vld [vmem:[%s17907_s5 + $0x40] sm:$0xff]  }
0x132b   : > { %14143 = vmatprep.subr.bf16.mxu1 %v18042_v55 }
0x132e   : > { %14145 = vmatpush1.bf16.msra.mxu1 %v18122_v26  ;;  %v14692_v26 = vld [vmem:[%s17907_s5 + $0x48] sm:$0xff]  }
0x132f   : > { %14146 = vmatprep.subr.bf16.mxu1 %v18042_v55 }
0x1332   : > { %14148 = vmatpush1.bf16.msra.mxu1 %v18123_v41  ;;  %v14693_v41 = vld [vmem:[%s17907_s5 + $0x50] sm:$0xff]  }
0x1333   : > { %14149 = vmatprep.subr.bf16.mxu1 %v18042_v55 }
0x1335   : > { %9115 = vmatmul.mubr.f32.vlgmr.msra.gmra.mrb[20].mxu1 %v17508_v33 }
0x1336   : > { %14151 = vmatpush1.bf16.msra.mxu1 %v16581_v22  ;;  %9209 = vmatprep.mubr.f32.mxu1 %v17511_v63 }
0x1337   : > { %14152 = vmatprep.subr.bf16.mxu1 %v18042_v55 }
0x133a   : > { %14154 = vmatpush1.bf16.msra.mxu1 %v16589_v39 }
0x133b   : > { %14155 = vmatprep.subr.bf16.mxu1 %v18042_v55 }
0x133e   : > { %14157 = vmatpush1.bf16.msra.mxu1 %v16593_v25 }
0x133f   : > { %14158 = vmatprep.subr.bf16.mxu1 %v18042_v55 }
0x1342   : > { %14160 = vmatpush1.bf16.msra.mxu1 %v16615_v11 }
0x1343   : > { %14161 = vmatprep.subr.bf16.mxu1 %v18042_v55 }
0x1346   : > { %14163 = vmatpush1.bf16.msra.mxu1 %v16633_v35 }
0x1347   : > { %14164 = vmatprep.subr.bf16.mxu1 %v18042_v55 }
0x134a   : > { %14166 = vmatpush1.bf16.msra.mxu1 %v16653_v29 }
0x134b   : > { %14167 = vmatprep.subr.bf16.mxu1 %v18042_v55 }
0x134e   : > { %14169 = vmatpush1.bf16.msra.mxu1 %v18077_v19 }
0x134f   : > { %14170 = vmatprep.subr.bf16.mxu1 %v18042_v55 }
0x1352   : > { %14172 = vmatpush1.bf16.msra.mxu1 %v18078_v52 }
0x1353   : > { %14173 = vmatprep.subr.bf16.mxu1 %v18042_v55 }
0x1356   : > { %14175 = vmatpush1.bf16.msra.mxu1 %v18079_v40 }
0x1357   : > { %14176 = vmatprep.subr.bf16.mxu1 %v18042_v55 }
0x135a   : > { %14178 = vmatpush1.bf16.msra.mxu1 %v18080_v32 }
0x135b   : > { %14179 = vmatprep.subr.bf16.mxu1 %v18042_v55 }
0x135e   : > { %14181 = vmatpush1.bf16.msra.mxu1 %v18081_v58 }
0x135f   : > { %14182 = vmatprep.subr.bf16.mxu1 %v18042_v55  ;;  %v14672_v55 = vld [vmem:[%s17907_s5 + $0x68] sm:$0xff]  }
0x1362   : > { %14184 = vmatpush1.bf16.msra.mxu1 %v18082_v51 }
0x1365   : > { %9211 = vmatmul.mubr.f32.vlgmr.msra.gmra.mrb[20].mxu1 %v17508_v33 }
0x1438   : > { %v9212_v22 = vpop.f32.mrb[20].mxu1 }
0x1439   : > { %v9216_v39 = vmul.f32 0.11111111, %v9212_v22  ;;  %v9214_v25 = vpop.f32.mrb[21].mxu1 }
0x143b   : > { %v9217_v11 = vadd.f32 1e-05, %v9216_v39  ;;  %v14694_v39 = vld [vmem:[%s17907_s5 + $0x58] sm:$0xff]  }
0x143d   : > { %14723 = vrsqrt.f32 %v9217_v11 }
0x1447   : > { %v14724_v35 = vpop.eup %14723 }
0x1448   : > { %v9220_v29 = vsel %vm7000_vm7, %v14724_v35, 0  ;;  %v14695_v35 = vld [vmem:[%s17907_s5 + $0xc0] sm:$0xff]  }
0x1449   : > { %v9303_v19 = vand.u32 4294901760, %v9220_v29 }
0x144b   : > { %v9304_v52 = vsub.f32 %v9220_v29, %v9303_v19 }
0x144d   : > { %v9305_v40 = vand.u32 4294901760, %v9304_v52 }
0x144f   : > { %v9306_v32 = vsub.f32 %v9304_v52, %v9305_v40 }
0x1451   : > { %v9307_v63 = vand.u32 4294901760, %v9306_v32  ;;  %v14698_v32 = vld [vmem:[%s17907_s5 + $0xd8] sm:$0xff]  }
0x1453   : > { %9308 = vmatmul.mubr.f32.vlgmr.msra.gmra.mrb[18].mxu0 %v9307_v63  ;;  %v14699_v63 = vld [vmem:[%s17907_s5 + $0xe0] sm:$0xff]  }
0x1454   : > { %14204 = vmatpush1.bf16.msra.mxu0 %v17342_v3  ;;  %9458 = vmatprep.mubr.f32.mxu0 %v15003_v59  ;;  %v14681_v3 = vld [vmem:[%s17907_s5 + $0xb0] sm:$0xff]  }
0x1455   : > { %14206 = vmatprep.subr.bf16.mxu0 %v17355_v49  ;;  %v18124_v49 = vmov 0  }
0x1458   : > { %14208 = vmatpush1.bf16.msra.mxu0 %v17358_v17 }
0x1459   : > { %14210 = vmatprep.subr.bf16.mxu0 %v17362_v27  ;;  %v18125_v27 = vld [vmem:[#allocation7_spill] sm:$0xff] }
0x145c   : > { %14212 = vmatpush1.bf16.msra.mxu0 %v17364_v54  ;;  %v14671_v54 = vld [vmem:[%s17907_s5 + $0x60] sm:$0xff]  }
0x145d   : > { %14214 = vmatprep.subr.bf16.mxu0 %v17366_v24 }
0x1460   : > { %14216 = vmatpush1.bf16.msra.mxu0 %v17368_v46 }
0x1461   : > { %14218 = vmatprep.subr.bf16.mxu0 %v17372_v36 }
0x1463   : > { %9460 = vmatmul.mubr.f32.vlgmr.msra.gmra.mrb[18].mxu0 %v9303_v19 }
0x1464   : > { %14220 = vmatpush1.bf16.msra.mxu0 %v17376_v23  ;;  %9562 = vmatprep.mubr.f32.mxu0 %v15003_v59  ;;  %v18126_v23 = vld [vmem:[#allocation13_spill] sm:$0xff] }
0x1465   : > { %14222 = vmatprep.subr.bf16.mxu0 %v17380_v6 }
0x1468   : > { %14224 = vmatpush1.bf16.msra.mxu0 %v17384_v8  ;;  %v18127_v8 = vld [vmem:[#allocation18_spill] sm:$0xff] }
0x1469   : > { %14226 = vmatprep.subr.bf16.mxu0 %v17386_v34 }
0x146c   : > { %14228 = vmatpush1.bf16.msra.mxu0 %v17388_v45 }
0x146d   : > { %14230 = vmatprep.subr.bf16.mxu0 %v17390_v20 }
0x1470   : > { %14232 = vmatpush1.bf16.msra.mxu0 %v17392_v56 }
0x1471   : > { %14234 = vmatprep.subr.bf16.mxu0 %v17222_v48 }
0x1473   : > { %9565 = vmatmul.mubr.f32.vlgmr.msra.gmra.mrb[18].mxu0 %v9304_v52  ;;  %v14696_v52 = vld [vmem:[%s17907_s5 + $0xc8] sm:$0xff]  }
0x1474   : > { %14236 = vmatpush1.bf16.msra.mxu0 %v17234_v31  ;;  %9651 = vmatprep.mubr.f32.mxu0 %v15003_v59 }
0x1475   : > { %14238 = vmatprep.subr.bf16.mxu0 %v17250_v28 }
0x1478   : > { %14240 = vmatpush1.bf16.msra.mxu0 %v17252_v47 }
0x1479   : > { %14242 = vmatprep.subr.bf16.mxu0 %v17270_v12 }
0x147c   : > { %14244 = vmatpush1.bf16.msra.mxu0 %v17276_v57 }
0x147d   : > { %14246 = vmatprep.subr.bf16.mxu0 %v17311_v62 }
0x1480   : > { %14248 = vmatpush1.bf16.msra.mxu0 %v17319_v15 }
0x1481   : > { %14250 = vmatprep.subr.bf16.mxu0 %v17398_v9 }
0x1483   : > { %9655 = vmatmul.mubr.f32.vlgmr.msra.gmra.mrb[18].mxu0 %v9305_v40  ;;  %v14697_v40 = vld [vmem:[%s17907_s5 + $0xd0] sm:$0xff]  }
0x1484   : > { %14252 = vmatpush1.bf16.msra.mxu0 %v17404_v30  ;;  %9773 = vmatprep.mubr.f32.mxu0 %v15003_v59 }
0x1485   : > { %14254 = vmatprep.subr.bf16.mxu0 %v17410_v7 }
0x1488   : > { %14256 = vmatpush1.bf16.msra.mxu0 %v17414_v4 }
0x1489   : > { %14258 = vmatprep.subr.bf16.mxu0 %v17416_v44 }
0x148c   : > { %14260 = vmatpush1.bf16.msra.mxu0 %v17418_v13 }
0x148d   : > { %14262 = vmatprep.subr.bf16.mxu0 %v17420_v50 }
0x1490   : > { %14264 = vmatpush1.bf16.msra.mxu0 %v17422_v14 }
0x1491   : > { %14266 = vmatprep.subr.bf16.mxu0 %v17222_v48  ;;  %v14677_v48 = vld [vmem:[%s17907_s5 + $0x90] sm:$0xff]  }
0x1493   : > { %9775 = vmatmul.mubr.f32.vlgmr.msra.gmra.mrb[18].mxu0 %v9303_v19 }
0x1494   : > { %14268 = vmatpush1.bf16.msra.mxu0 %v17234_v31  ;;  %9861 = vmatprep.mubr.f32.mxu0 %v15003_v59  ;;  %v14678_v31 = vld [vmem:[%s17907_s5 + $0x98] sm:$0xff]  }
0x1495   : > { %14270 = vmatprep.subr.bf16.mxu0 %v17250_v28  ;;  %v14679_v28 = vld [vmem:[%s17907_s5 + $0xa0] sm:$0xff]   ;;  %v14682_v59 = vld [vmem:[%s17907_s5 + $0xb8] sm:$0xff]  }
0x1498   : > { %14272 = vmatpush1.bf16.msra.mxu0 %v17252_v47  ;;  %v14680_v47 = vld [vmem:[%s17907_s5 + $0xa8] sm:$0xff]  }
0x1499   : > { %14274 = vmatprep.subr.bf16.mxu0 %v17270_v12  ;;  %v14676_v12 = vld [vmem:[%s17907_s5 + $0x88] sm:$0xff]  }
0x149c   : > { %14276 = vmatpush1.bf16.msra.mxu0 %v17276_v57  ;;  %v14675_v57 = vld [vmem:[%s17907_s5 + $0x80] sm:$0xff]  }
0x149d   : > { %14278 = vmatprep.subr.bf16.mxu0 %v17311_v62  ;;  %v14673_v62 = vld [vmem:[%s17907_s5 + $0x70] sm:$0xff]  }
0x14a0   : > { %14280 = vmatpush1.bf16.msra.mxu0 %v17319_v15  ;;  %v14674_v15 = vld [vmem:[%s17907_s5 + $0x78] sm:$0xff]  }
0x14a1   : > { %10039 = vmatprep.subr.bf16.mxu0 %v18124_v49 }
0x14a3   : > { %9863 = vmatmul.mubr.f32.vlgmr.msra.gmra.mrb[18].mxu0 %v9303_v19 }
0x14a4   : > { %10040 = vmatpush1.bf16.msra.mxu0 %v14671_v54  ;;  %v14700_v54 = vld [vmem:[%s17907_s5 + $0xe8] sm:$0xff]  }
0x14a5   : > { %10041 = vmatprep.subr.bf16.mxu0 %v18124_v49 }
0x14a8   : > { %10042 = vmatpush1.bf16.msra.mxu0 %v14672_v55  ;;  %v14701_v55 = vld [vmem:[%s17907_s5 + $0xf0] sm:$0xff]  }
0x14a9   : > { %10043 = vmatprep.subr.bf16.mxu0 %v18124_v49 }
0x14ac   : > { %10044 = vmatpush1.bf16.msra.mxu0 %v14673_v62  ;;  %v14702_v62 = vld [vmem:[%s17907_s5 + $0xf8] sm:$0xff]  }
0x14ad   : > { %10045 = vmatprep.subr.bf16.mxu0 %v18124_v49 }
0x14b0   : > { %10046 = vmatpush1.bf16.msra.mxu0 %v14674_v15  ;;  %v14703_v15 = vld [vmem:[%s17907_s5 + $0x100] sm:$0xff]  }
0x14b1   : > { %10047 = vmatprep.subr.bf16.mxu0 %v18124_v49 }
0x14b4   : > { %10048 = vmatpush1.bf16.msra.mxu0 %v14675_v57 }
0x14b5   : > { %10049 = vmatprep.subr.bf16.mxu0 %v18124_v49 }
0x14b8   : > { %10050 = vmatpush1.bf16.msra.mxu0 %v14676_v12  ;;  %v14704_v12 = vld [vmem:[%s17907_s5 + $0x108] sm:$0xff]  }
0x14b9   : > { %10051 = vmatprep.subr.bf16.mxu0 %v18124_v49 }
0x14bc   : > { %10052 = vmatpush1.bf16.msra.mxu0 %v14677_v48 }
0x14bd   : > { %10053 = vmatprep.subr.bf16.mxu0 %v18124_v49 }
0x14c0   : > { %10054 = vmatpush1.bf16.msra.mxu0 %v14678_v31  ;;  %v14705_v31 = vld [vmem:[%s17907_s5 + $0x110] sm:$0xff]  }
0x14c1   : > { %10055 = vmatprep.subr.bf16.mxu0 %v18124_v49 }
0x14c4   : > { %10056 = vmatpush1.bf16.msra.mxu0 %v14679_v28 }
0x14c5   : > { %10057 = vmatprep.subr.bf16.mxu0 %v18124_v49 }
0x14c8   : > { %10058 = vmatpush1.bf16.msra.mxu0 %v14680_v47 }
0x14c9   : > { %10059 = vmatprep.subr.bf16.mxu0 %v18124_v49 }
0x14cc   : > { %10060 = vmatpush1.bf16.msra.mxu0 %v14681_v3 }
0x14cd   : > { %10061 = vmatprep.subr.bf16.mxu0 %v18124_v49 }
0x14d0   : > { %10062 = vmatpush1.bf16.msra.mxu0 %v14682_v59  ;;  %v14706_v59 = vld [vmem:[%s17907_s5 + $0x118] sm:$0xff]  }
0x14d1   : > { %10154 = vmatprep.subr.bf16.mxu0 %v18124_v49 }
0x1576   : > { %v9864_v17 = vpop.f32.mrb[18].mxu0 }
0x1577   : > { %v9872_v24 = vrot.slane %v9864_v17, %v18125_v27  ;;  %v9866_v46 = vpop.f32.mrb[19].mxu0 }
0x1578   : > { %v9876_v36 = vrot.slane %v9866_v46, %v18125_v27  ;;  %v14707_v46 = vld [vmem:[%s17907_s5 + $0x120] sm:$0xff]  }
0x1579   : > { %v9877_v6 = vmul.f32 %v9872_v24, %v18126_v23 }
0x157a   : > { %v9878_v34 = vmul.f32 %v9876_v36, %v18127_v8  ;;  %v14709_v8 = vld [vmem:[%s17907_s5 + $0x130] sm:$0xff]  }
0x157b   : > { %v9879_v45 = vmul.f32 0.2, %v9877_v6 }
0x157c   : > { %v9880_v20 = vmul.f32 0.2, %v9878_v34 }
0x157d   : > { %v9881_v56 = vmax.f32 %v9877_v6, %v9879_v45  ;;  %v14708_v6 = vld [vmem:[%s17907_s5 + $0x128] sm:$0xff]   ;;  %v14711_v45 = vld [vmem:[%s17907_s5 + $0x140] sm:$0xff]  }
0x157e   : > { %v9882_v9 = vmax.f32 %v9878_v34, %v9880_v20  ;;  %v14710_v34 = vld [vmem:[%s17907_s5 + $0x138] sm:$0xff]   ;;  %v14712_v20 = vld [vmem:[%s17907_s5 + $0x148] sm:$0xff]  }
0x157f   : > { %v9885_v30 = vrot.slane %v9881_v56, 7  ;;  %v14713_v56 = vld [vmem:[%s17907_s5 + $0x150] sm:$0xff]  }
0x1580   : > { %v9886_v7 = vrot.slane %v9882_v9, 7  ;;  %v14714_v9 = vld [vmem:[%s17907_s5 + $0x158] sm:$0xff]  }
0x1581   : > { %9889 = vst [vmem:[#allocation5] sm:$0xe] %v9885_v30  ;;  %v14715_v30 = vld [vmem:[%s17907_s5 + $0x160] sm:$0xff]  }
0x1582   : > { %9891 = vst.msk [vmem:[#allocation5 + $0x8] sm:$0xe] %vm9890_vm9, %v9886_v7 }
0x1588   : > { %v9920_v4 = vld [vmem:[#allocation5] sm:$0x6]  ;;  %v10344_v7 = vld [vmem:[#allocation5] sm:$0x18] }
0x1589   : > { %v9921_v44 = vld [vmem:[#allocation5 + $0x8] sm:$0x6]  ;;  %v9922_v13 = vpack.c.bf16 %v9920_v4, %v9920_v4  ;;  %v9892_v25 = vld [vmem:[#allocation5] sm:$0x3]  ;;  %v10345_v57 = vld [vmem:[#allocation5 + $0x8] sm:$0x18] }
0x158a   : > { %v9923_v50 = vpack.c.bf16 %v9921_v44, %v9921_v44  ;;  %v9893_v42 = vld [vmem:[#allocation5 + $0x8] sm:$0x3]  ;;  %v10195_v22 = vld [vmem:[#allocation5 + $0x8] sm:$0xc]  ;;  %v9894_v29 = vpack.c.bf16 %v9892_v25, %v9892_v25  ;;  %v10347_v48 = vpack.c.bf16 %v10345_v57, %v10345_v57  ;;  %v10194_v28 = vld [vmem:[#allocation5] sm:$0xc]  ;;  %v10346_v44 = vpack.c.bf16 %v10344_v7, %v10344_v7 }
0x158b   : > { %v9952_v14 = vshll.u32 %v9922_v13, 16  ;;  %v9950_v38 = vshrl.u32 %v9922_v13, 16  ;;  %v9895_v43 = vpack.c.bf16 %v9893_v42, %v9893_v42  ;;  %v10197_v11 = vpack.c.bf16 %v10195_v22, %v10195_v22  ;;  %v14716_v4 = vld [vmem:[%s17907_s5 + $0x168] sm:$0xff]   ;;  %v14717_v13 = vld [vmem:[%s17907_s5 + $0x170] sm:$0xff]  }
0x158c   : > { %v9959_v58 = vshll.u32 %v9923_v50, 16  ;;  %v9957_v33 = vshrl.u32 %v9923_v50, 16  ;;  %v10382_v47 = vshrl.u32 %v10347_v48, 16  ;;  %v10385_v3 = vshll.u32 %v10347_v48, 16 }
0x158d   : > { %v9954_v51 = vrot.slane %v9952_v14, 1  ;;  %v10226_v19 = vrot.slane %v10197_v11, 1  ;;  %v10196_v17 = vpack.c.bf16 %v10194_v28, %v10194_v28  ;;  %v10374_v50 = vshrl.u32 %v10346_v44, 16 }
0x158e   : > { %v9961_v5 = vrot.slane %v9959_v58, 1  ;;  %v10384_v27 = vrot.slane %v10382_v47, 1  ;;  %v10387_v24 = vrot.slane %v10385_v3, 2  ;;  %v10377_v14 = vshll.u32 %v10346_v44, 16  ;;  %v14718_v58 = vld [vmem:[%s17907_s5 + $0x178] sm:$0xff]  }
0x158f   : > { %v9955_v1 = vor.u32 %v9954_v51, %v9950_v38  ;;  %v10225_v36 = vrot.slane %v10196_v17, 1  ;;  %v10376_v51 = vrot.slane %v10374_v50, 1 }
0x1590   : > { %v9962_v0 = vor.u32 %v9961_v5, %v9957_v33  ;;  %v10388_v23 = vor.u32 %v10387_v24, %v10384_v27  ;;  %v10379_v33 = vrot.slane %v10377_v14, 2 }
0x1592   : > { %10975 = vmatprep.mubr.msk.bf16.mxu0 %vm7000_vm7, %v9962_v0  ;;  %v10380_v5 = vor.u32 %v10379_v33, %v10376_v51 }
0x1593   : > { %10072 = vmatmul.mubr.bf16.vlgmr.msra.gmra.mrb[20].mxu0 %v9955_v1 }
0x1594   : > { %10155 = vmatpush1.bf16.msra.mxu0 %v14683_v61  ;;  %10988 = vmatprep.mubr.msk.bf16.mxu0 %vm7000_vm7, %v9895_v43 }
0x1595   : > { %10156 = vmatprep.subr.bf16.mxu0 %v18124_v49 }
0x1598   : > { %10157 = vmatpush1.bf16.msra.mxu0 %v14684_v37 }
0x1599   : > { %10158 = vmatprep.subr.bf16.mxu0 %v18124_v49 }
0x159c   : > { %10159 = vmatpush1.bf16.msra.mxu0 %v14685_v10 }
0x159d   : > { %10160 = vmatprep.subr.bf16.mxu0 %v18124_v49 }
0x15a0   : > { %10161 = vmatpush1.bf16.msra.mxu0 %v14686_v16 }
0x15a1   : > { %10162 = vmatprep.subr.bf16.mxu0 %v18124_v49 }
0x15a4   : > { %10163 = vmatpush1.bf16.msra.mxu0 %v14687_v53 }
0x15a5   : > { %10164 = vmatprep.subr.bf16.mxu0 %v18124_v49 }
0x15a8   : > { %10165 = vmatpush1.bf16.msra.mxu0 %v14688_v21 }
0x15a9   : > { %10166 = vmatprep.subr.bf16.mxu0 %v18124_v49 }
0x15ac   : > { %10167 = vmatpush1.bf16.msra.mxu0 %v14689_v60 }
0x15ad   : > { %10168 = vmatprep.subr.bf16.mxu0 %v18124_v49 }
0x15b0   : > { %10169 = vmatpush1.bf16.msra.mxu0 %v14690_v2  ;;  %v10519_v2 = vld [vmem:[#allocation6] sm:$0x1] }
0x15b1   : > { %10170 = vmatprep.subr.bf16.mxu0 %v18124_v49 }
0x15b4   : > { %10171 = vmatpush1.bf16.msra.mxu0 %v14691_v18 }
0x15b5   : > { %10172 = vmatprep.subr.bf16.mxu0 %v18124_v49 }
0x15b8   : > { %10173 = vmatpush1.bf16.msra.mxu0 %v14692_v26 }
0x15b9   : > { %10174 = vmatprep.subr.bf16.mxu0 %v18124_v49 }
0x15bc   : > { %10175 = vmatpush1.bf16.msra.mxu0 %v14693_v41 }
0x15bd   : > { %10176 = vmatprep.subr.bf16.mxu0 %v18124_v49 }
0x15c0   : > { %10177 = vmatpush1.bf16.msra.mxu0 %v14694_v39 }
0x15c1   : > { %10303 = vmatprep.subr.bf16.mxu0 %v18124_v49 }
0x15c3   : > { %10187 = vmatmul.mubr.bf16.vlgmr.msra.gmra.mrb[20].mxu0 %v9894_v29 }
0x15c4   : > { %10304 = vmatpush1.bf16.msra.mxu0 %v14695_v35  ;;  %11025 = vmatprep.mubr.msk.bf16.mxu0 %vm7000_vm7, %v10226_v19 }
0x15c5   : > { %10305 = vmatprep.subr.bf16.mxu0 %v18124_v49 }
0x15c8   : > { %10306 = vmatpush1.bf16.msra.mxu0 %v14696_v52 }
0x15c9   : > { %10307 = vmatprep.subr.bf16.mxu0 %v18124_v49 }
0x15cc   : > { %10308 = vmatpush1.bf16.msra.mxu0 %v14697_v40 }
0x15cd   : > { %10309 = vmatprep.subr.bf16.mxu0 %v18124_v49 }
0x15d0   : > { %10310 = vmatpush1.bf16.msra.mxu0 %v14698_v32 }
0x15d1   : > { %10311 = vmatprep.subr.bf16.mxu0 %v18124_v49 }
0x15d4   : > { %10312 = vmatpush1.bf16.msra.mxu0 %v14699_v63 }
0x15d5   : > { %10313 = vmatprep.subr.bf16.mxu0 %v18124_v49 }
0x15d8   : > { %10314 = vmatpush1.bf16.msra.mxu0 %v14700_v54 }
0x15d9   : > { %10315 = vmatprep.subr.bf16.mxu0 %v18124_v49 }
0x15dc   : > { %10316 = vmatpush1.bf16.msra.mxu0 %v14701_v55 }
0x15dd   : > { %10317 = vmatprep.subr.bf16.mxu0 %v18124_v49 }
0x15e0   : > { %10318 = vmatpush1.bf16.msra.mxu0 %v14702_v62 }
0x15e1   : > { %10319 = vmatprep.subr.bf16.mxu0 %v18124_v49 }
0x15e4   : > { %10320 = vmatpush1.bf16.msra.mxu0 %v14703_v15 }
0x15e5   : > { %10321 = vmatprep.subr.bf16.mxu0 %v18124_v49 }
0x15e8   : > { %10322 = vmatpush1.bf16.msra.mxu0 %v14704_v12 }
0x15e9   : > { %10323 = vmatprep.subr.bf16.mxu0 %v18124_v49 }
0x15ec   : > { %10324 = vmatpush1.bf16.msra.mxu0 %v14705_v31 }
0x15ed   : > { %10325 = vmatprep.subr.bf16.mxu0 %v18124_v49 }
0x15f0   : > { %10326 = vmatpush1.bf16.msra.mxu0 %v14706_v59 }
0x15f1   : > { %10465 = vmatprep.subr.bf16.mxu0 %v18124_v49 }
0x15f3   : > { %10336 = vmatmul.mubr.bf16.vlgmr.msra.gmra.mrb[20].mxu0 %v10225_v36 }
0x15f4   : > { %10466 = vmatpush1.bf16.msra.mxu0 %v14707_v46  ;;  %11062 = vmatprep.mubr.msk.bf16.mxu0 %vm7000_vm7, %v10388_v23 }
0x15f5   : > { %10467 = vmatprep.subr.bf16.mxu0 %v18124_v49 }
0x15f8   : > { %10468 = vmatpush1.bf16.msra.mxu0 %v14708_v6 }
0x15f9   : > { %10469 = vmatprep.subr.bf16.mxu0 %v18124_v49 }
0x15fc   : > { %10470 = vmatpush1.bf16.msra.mxu0 %v14709_v8 }
0x15fd   : > { %10471 = vmatprep.subr.bf16.mxu0 %v18124_v49 }
0x1600   : > { %10472 = vmatpush1.bf16.msra.mxu0 %v14710_v34 }
0x1601   : > { %10473 = vmatprep.subr.bf16.mxu0 %v18124_v49 }
0x1604   : > { %10474 = vmatpush1.bf16.msra.mxu0 %v14711_v45 }
0x1605   : > { %10475 = vmatprep.subr.bf16.mxu0 %v18124_v49 }
0x1608   : > { %10476 = vmatpush1.bf16.msra.mxu0 %v14712_v20 }
0x1609   : > { %10477 = vmatprep.subr.bf16.mxu0 %v18124_v49 }
0x160c   : > { %10478 = vmatpush1.bf16.msra.mxu0 %v14713_v56 }
0x160d   : > { %10479 = vmatprep.subr.bf16.mxu0 %v18124_v49 }
0x1610   : > { %10480 = vmatpush1.bf16.msra.mxu0 %v14714_v9 }
0x1611   : > { %10481 = vmatprep.subr.bf16.mxu0 %v18124_v49 }
0x1614   : > { %10482 = vmatpush1.bf16.msra.mxu0 %v14715_v30 }
0x1615   : > { %10483 = vmatprep.subr.bf16.mxu0 %v18124_v49 }
0x1618   : > { %10484 = vmatpush1.bf16.msra.mxu0 %v14716_v4 }
0x1619   : > { %10485 = vmatprep.subr.bf16.mxu0 %v18124_v49 }
0x161c   : > { %10486 = vmatpush1.bf16.msra.mxu0 %v14717_v13 }
0x161d   : > { %10487 = vmatprep.subr.bf16.mxu0 %v18124_v49 }
0x1620   : > { %10488 = vmatpush1.bf16.msra.mxu0 %v14718_v58 }
0x1623   : > { %10498 = vmatmul.mubr.bf16.vlgmr.msra.gmra.mrb[20].mxu0 %v10380_v5 }
0x16f6   : > { %v10499_v38 = vpop.f32.mrb[20].mxu0 }
0x16f7   : > { %v10501_v42 = vpop.f32.mrb[21].mxu0  ;;  %v10507_v0 = vsel %vm10506_vm10, %v10499_v38, 0.0 }
0x16f8   : > { %v10502_v61 = vpop.f32.mrb[22].mxu0  ;;  %10508 = vadd.xlane.f32.xlu0 %v10507_v0 }
0x16f9   : > { %v10503_v1 = vpop.f32.mrb[23].mxu0 }
0x1785   : > { %v10509_v43 = vpop.xlane.xlu0 %10508 }
0x1786   : > { %v10511_v37 = vsel %vm10510_vm11, %v10509_v43, 0.0 }
0x1787   : > { %v10512_v10 = vrot.slane %v10511_v37, 4 }
0x1789   : > { %v10513_v16 = vadd.f32 %v10512_v10, %v10511_v37 }
0x178b   : > { %v10514_v53 = vrot.slane %v10513_v16, 2 }
0x178d   : > { %v10515_v49 = vadd.f32 %v10514_v53, %v10513_v16 }
0x178f   : > { %v10516_v21 = vrot.slane %v10515_v49, 1 }
0x1791   : > { %v10517_v60 = vadd.f32 %v10516_v21, %v10515_v49 }
0x1793   : > { %v10518_v18 = vmul.f32 0.25, %v10517_v60 }
0x1795   : > { %v10520_v26 = vadd.f32 %v10519_v2, %v10518_v18 }
0x1797   : > { %10522 = vst.msk [vmem:[%s438_s15] sm:$0x1] %vm10521_vm12, %v10520_v26 }
0x1798 PF: > { %s25_s27 = sadd.s32 1, %s14732_s27  }
0x1799   : > { %p22_p4 = scmp.ge.s32.totalorder %s25_s27, 4  }
0x179b   :  { %24 = sbr.rel (!%p22_p4) target bundleno = 3 (0x3), region = 120 }

</bundles_post_ra>
